<compile_context>
chip_gen: v6e
topology: v6e:2x2x1
jax: 0.10.0
libtpu: 0.0.40
codegen_flags: <defaults>
</compile_context>

<pallas_src>
import jax
import jax.numpy as jnp
from jax.experimental import pallas as pl
from jax.experimental.pallas import tpu as pltpu

_VMEM_LIMIT = 48 * 1024 * 1024  # < v7x's 64 MiB physical VMEM, > default scoped limits


# ----------------------------------------------------------------------------
# Tiled matmul + bias:  (M, K) @ (K, N) + (1, N) -> (M, N), f32 accumulated
# directly into the (k-resident) output block.  Used for the final fc layer.
# ----------------------------------------------------------------------------
def _matmul_bias_kernel(x_ref, w_ref, b_ref, o_ref):
    @pl.when(pl.program_id(2) == 0)
    def _():
        o_ref[...] = jnp.broadcast_to(b_ref[...], o_ref.shape)

    o_ref[...] += jnp.dot(x_ref[...], w_ref[...],
                          preferred_element_type=jnp.float32)


def _round_up(x, m):
    return (x + m - 1) // m * m


def _pick_tile(dim, pref, align):
    """Largest multiple of `align` that divides `dim` (dim is already align-padded)."""
    t = min(pref, dim)
    t = (t // align) * align
    while dim % t != 0:
        t -= align
    return t


def matmul_bias(x, w, b, *, tm_pref=256, tn_pref=512, tk_pref=512):
    """x: (M, K) bf16/f32, w: (K, N), b: (1, N) f32.  Returns (M, N) f32."""
    M, K = x.shape
    Kw, N = w.shape
    # Pad to (8, 128)-aligned shapes so blocks stay small and pipelined for any vocab.
    Mp, Kp, Np = _round_up(M, 8), _round_up(K, 128), _round_up(N, 128)
    if (Mp, Kp) != (M, K):
        x = jnp.pad(x, ((0, Mp - M), (0, Kp - K)))
    if (Kp, Np) != (Kw, N):
        w = jnp.pad(w, ((0, Kp - Kw), (0, Np - N)))
    if Np != N:
        b = jnp.pad(b, ((0, 0), (0, Np - N)))

    tm = _pick_tile(Mp, tm_pref, 8)
    tn = _pick_tile(Np, tn_pref, 128)
    tk = _pick_tile(Kp, tk_pref, 128)

    out = pl.pallas_call(
        _matmul_bias_kernel,
        out_shape=jax.ShapeDtypeStruct((Mp, Np), jnp.float32),
        grid=(Mp // tm, Np // tn, Kp // tk),
        in_specs=[
            pl.BlockSpec((tm, tk), lambda i, j, k: (i, k)),
            pl.BlockSpec((tk, tn), lambda i, j, k: (k, j)),
            pl.BlockSpec((1, tn), lambda i, j, k: (0, j)),
        ],
        out_specs=pl.BlockSpec((tm, tn), lambda i, j, k: (i, j)),
        compiler_params=pltpu.CompilerParams(
            dimension_semantics=("parallel", "parallel", "arbitrary"),
            vmem_limit_bytes=_VMEM_LIMIT),
    )(x, w, b)

    if (Mp, Np) != (M, N):
        out = out[:M, :N]
    return out


# ----------------------------------------------------------------------------
# Streamed LSTM layer with fused input projection.
#   grid = (batch_tiles, time_blocks); h/c carried in VMEM scratch across the
#   (arbitrary) time axis; x blocks streamed; weights VMEM-resident.
#   Gate column order is (i, f, o, g).
# ----------------------------------------------------------------------------
def _lstm_block(x_ref, wih_ref, b_ref, whh_ref, h0_ref, c0_ref,
                hN_ref, cN_ref, h_s, c_s, *, out_ref):
    t_idx = pl.program_id(1)
    T_blk, B, E = x_ref.shape
    H = h_s.shape[-1]

    @pl.when(t_idx == 0)
    def _():
        h_s[...] = h0_ref[...]
        c_s[...] = c0_ref[...]

    # Fused input projection for the whole time-block on the MXU (bf16 in, f32 acc).
    gx = jnp.dot(x_ref[...].reshape(T_blk * B, E), wih_ref[...],
                 preferred_element_type=jnp.float32) + b_ref[...]     # (T_blk*B, 4H)

    h = h_s[...]
    c = c_s[...]
    for t in range(T_blk):  # static unroll; the grid axis bounds total work
        gates = gx[t * B:(t + 1) * B, :] + jnp.dot(
            h.astype(whh_ref.dtype), whh_ref[...],
            preferred_element_type=jnp.float32)                       # (B, 4H)
        ifo = jax.nn.sigmoid(gates[:, :3 * H])                        # i | f | o
        g = jnp.tanh(gates[:, 3 * H:])
        c = ifo[:, H:2 * H] * c + ifo[:, :H] * g
        h = ifo[:, 2 * H:] * jnp.tanh(c)
        if out_ref is not None:
            out_ref[:, t, :] = h.astype(out_ref.dtype)                # batch-major write

    h_s[...] = h
    c_s[...] = c

    @pl.when(t_idx == pl.num_programs(1) - 1)
    def _():
        hN_ref[...] = h.astype(hN_ref.dtype)
        cN_ref[...] = c.astype(cN_ref.dtype)


def _lstm_kernel_final_only(x_ref, wih_ref, b_ref, whh_ref, h0_ref, c0_ref,
                            hN_ref, cN_ref, h_s, c_s):
    _lstm_block(x_ref, wih_ref, b_ref, whh_ref, h0_ref, c0_ref,
                hN_ref, cN_ref, h_s, c_s, out_ref=None)


def _lstm_kernel_with_out(x_ref, wih_ref, b_ref, whh_ref, h0_ref, c0_ref,
                          out_ref, hN_ref, cN_ref, h_s, c_s):
    _lstm_block(x_ref, wih_ref, b_ref, whh_ref, h0_ref, c0_ref,
                hN_ref, cN_ref, h_s, c_s, out_ref=out_ref)


def lstm_layer(x_tbe, h0, c0, w_ih, bias, w_hh, *, return_outputs):
    """x_tbe: (T, B, E) bf16 time-major embedded input.
    Returns (out_bth, hN, cN) if return_outputs (out is (B, T, H) batch-major),
    else (hN, cN)."""
    T, B, E = x_tbe.shape
    H = h0.shape[-1]

    # Time-block: short static unroll per grid step, (8,128)-aligned output blocks.
    T_blk = 8 if T % 8 == 0 else T
    # Batch tiles: split across the two TensorCores (v7x) when B allows.
    B_blk = B // 2 if (B % 16 == 0) else B
    grid = (B // B_blk, T // T_blk)

    in_specs = [
        pl.BlockSpec((T_blk, B_blk, E), lambda bi, ti: (ti, bi, 0)),   # streamed x
        pl.BlockSpec((E, 4 * H), lambda bi, ti: (0, 0)),               # resident W_ih
        pl.BlockSpec((1, 4 * H), lambda bi, ti: (0, 0)),               # resident bias
        pl.BlockSpec((H, 4 * H), lambda bi, ti: (0, 0)),               # resident W_hh
        pl.BlockSpec((B_blk, H), lambda bi, ti: (bi, 0)),              # h0
        pl.BlockSpec((B_blk, H), lambda bi, ti: (bi, 0)),              # c0
    ]
    scratch = [pltpu.VMEM((B_blk, H), jnp.float32),                    # carried h
               pltpu.VMEM((B_blk, H), jnp.float32)]                    # carried c
    cparams = pltpu.CompilerParams(
        dimension_semantics=("parallel", "arbitrary"),
        vmem_limit_bytes=_VMEM_LIMIT)

    if return_outputs:
        out_shape = (jax.ShapeDtypeStruct((B, T, H), jnp.float32),
                     jax.ShapeDtypeStruct((B, H), jnp.float32),
                     jax.ShapeDtypeStruct((B, H), jnp.float32))
        out_specs = (pl.BlockSpec((B_blk, T_blk, H), lambda bi, ti: (bi, ti, 0)),
                     pl.BlockSpec((B_blk, H), lambda bi, ti: (bi, 0)),
                     pl.BlockSpec((B_blk, H), lambda bi, ti: (bi, 0)))
        return pl.pallas_call(
            _lstm_kernel_with_out, out_shape=out_shape, grid=grid,
            in_specs=in_specs, out_specs=out_specs, scratch_shapes=scratch,
            compiler_params=cparams,
        )(x_tbe, w_ih, bias, w_hh, h0, c0)
    else:
        out_shape = (jax.ShapeDtypeStruct((B, H), jnp.float32),
                     jax.ShapeDtypeStruct((B, H), jnp.float32))
        out_specs = (pl.BlockSpec((B_blk, H), lambda bi, ti: (bi, 0)),
                     pl.BlockSpec((B_blk, H), lambda bi, ti: (bi, 0)))
        return pl.pallas_call(
            _lstm_kernel_final_only, out_shape=out_shape, grid=grid,
            in_specs=in_specs, out_specs=out_specs, scratch_shapes=scratch,
            compiler_params=cparams,
        )(x_tbe, w_ih, bias, w_hh, h0, c0)


# ----------------------------------------------------------------------------
# Full Seq2Seq forward.
# ----------------------------------------------------------------------------
def seq2seq_forward(params, src, tgt, *, compute_dtype=jnp.bfloat16):
    # src, tgt: (B, T) int32 token ids (PyTorch batch_first convention).
    emb = params["embedding"]                       # (vocab, E) f32
    V, E = emb.shape
    B, T_src = src.shape
    _, T_tgt = tgt.shape
    H = params["enc_whh"].shape[0]
    cd = compute_dtype

    # TODO(synk): the embedding gather could be fused into the recurrence kernel via
    # scalar-prefetched ids + a pl.Element row-gather BlockSpec; kept as XLA glue here.
    src_e = jnp.take(emb, src.T, axis=0).astype(cd)  # (T_src, B, E) bf16, time-major
    tgt_e = jnp.take(emb, tgt.T, axis=0).astype(cd)  # (T_tgt, B, E)

    h0 = jnp.zeros((B, H), jnp.float32)
    c0 = jnp.zeros((B, H), jnp.float32)

    # Encoder: only the final (h, c) are needed -> no per-step output traffic.
    h_enc, c_enc = lstm_layer(src_e, h0, c0,
                              params["enc_wih"].astype(cd), params["enc_b"],
                              params["enc_whh"].astype(cd), return_outputs=False)

    # Decoder, initialized with the encoder final state; outputs batch-major (B,T,H).
    dec_out, _, _ = lstm_layer(tgt_e, h_enc, c_enc,
                               params["dec_wih"].astype(cd), params["dec_b"],
                               params["dec_whh"].astype(cd), return_outputs=True)

    # Final projection; output is already batch-major so no logits transpose.
    logits = matmul_bias(dec_out.reshape(B * T_tgt, H).astype(cd),
                         params["fc_w"].astype(cd), params["fc_b"])
    return logits.reshape(B, T_tgt, V)


# ----------------------------------------------------------------------------
# Pure-JAX reference (lax.scan) with identical bf16-operand / f32-accumulate math
# and the same (i, f, o, g) gate column layout.
# ----------------------------------------------------------------------------
def _lstm_ref(x_tbe, h0, c0, w_ih, w_hh, bias, cd):
    T, B, E = x_tbe.shape
    H = h0.shape[-1]
    gx = (jnp.dot(x_tbe.astype(cd).reshape(T * B, E), w_ih.astype(cd),
                  preferred_element_type=jnp.float32) + bias).reshape(T, B, 4 * H)
    w_hh_c = w_hh.astype(cd)

    def step(carry, gx_t):
        h, c = carry
        gates = gx_t + jnp.dot(h.astype(cd), w_hh_c,
                               preferred_element_type=jnp.float32)
        ifo = jax.nn.sigmoid(gates[:, :3 * H])
        g = jnp.tanh(gates[:, 3 * H:])
        c = ifo[:, H:2 * H] * c + ifo[:, :H] * g
        h = ifo[:, 2 * H:] * jnp.tanh(c)
        return (h, c), h

    (hN, cN), ys = jax.lax.scan(step, (h0, c0), gx)
    return ys, hN, cN


def seq2seq_ref(params, src, tgt, *, compute_dtype=jnp.bfloat16):
    emb = params["embedding"]
    V, E = emb.shape
    B, T_tgt = tgt.shape
    H = params["enc_whh"].shape[0]
    cd = compute_dtype
    src_e = jnp.take(emb, src.T, axis=0)
    tgt_e = jnp.take(emb, tgt.T, axis=0)
    h0 = jnp.zeros((B, H), jnp.float32)
    c0 = jnp.zeros((B, H), jnp.float32)
    _, h_enc, c_enc = _lstm_ref(src_e, h0, c0, params["enc_wih"],
                                params["enc_whh"], params["enc_b"], cd)
    ys, _, _ = _lstm_ref(tgt_e, h_enc, c_enc, params["dec_wih"],
                         params["dec_whh"], params["dec_b"], cd)        # (T, B, H)
    dec_bt = jnp.transpose(ys, (1, 0, 2)).reshape(B * T_tgt, H)
    logits = (jnp.dot(dec_bt.astype(cd), params["fc_w"].astype(cd),
                      preferred_element_type=jnp.float32) + params["fc_b"])
    return logits.reshape(B, T_tgt, V)


# ----------------------------------------------------------------------------
# Deterministic parameter init (shapes follow nn.Embedding / nn.LSTM / nn.Linear).
# LSTM weights stored transposed (in, 4H); gate column order is (i, f, o, g);
# bias is the folded b_ih + b_hh.
# ----------------------------------------------------------------------------
def init_params(key, vocab_size, embed_size, hidden_size):
    ks = jax.random.split(key, 9)
    k = 1.0 / jnp.sqrt(hidden_size)

    def uni(key, shape):
        return jax.random.uniform(key, shape, jnp.float32, -k, k)

    return {
        "embedding": jax.random.normal(ks[0], (vocab_size, embed_size), jnp.float32),
        "enc_wih": uni(ks[1], (embed_size, 4 * hidden_size)),
        "enc_whh": uni(ks[2], (hidden_size, 4 * hidden_size)),
        "enc_b": uni(ks[3], (1, 4 * hidden_size)),
        "dec_wih": uni(ks[4], (embed_size, 4 * hidden_size)),
        "dec_whh": uni(ks[5], (hidden_size, 4 * hidden_size)),
        "dec_b": uni(ks[6], (1, 4 * hidden_size)),
        "fc_w": uni(ks[7], (hidden_size, vocab_size)),
        "fc_b": uni(ks[8], (1, vocab_size)),
    }


if __name__ == "__main__":
    # Small, lane/sublane-aligned shapes consistent with the module's forward.
    vocab_size, embed_size, hidden_size = 256, 128, 128
    B, T_src, T_tgt = 8, 8, 8

    key = jax.random.PRNGKey(0)
    kp, ks, kt = jax.random.split(key, 3)
    params = init_params(kp, vocab_size, embed_size, hidden_size)
    src = jax.random.randint(ks, (B, T_src), 0, vocab_size, dtype=jnp.int32)
    tgt = jax.random.randint(kt, (B, T_tgt), 0, vocab_size, dtype=jnp.int32)

    fwd = jax.jit(seq2seq_forward)
    out = jax.block_until_ready(fwd(params, src, tgt))
    assert out.shape == (B, T_tgt, vocab_size), out.shape

    ref = jax.block_until_ready(jax.jit(seq2seq_ref)(params, src, tgt))
    max_err = float(jnp.max(jnp.abs(out - ref)))
    assert jnp.allclose(out, ref, atol=3e-3, rtol=3e-3), max_err

    print("KERNEL_OK")
</pallas_src>

<mosaic_0001>
module attributes {stable_mosaic.version = 11 : i64} {
  func.func @_lstm_kernel_final_only(%arg0: i32, %arg1: i32, %arg2: memref<8x8x128xbf16, #tpu.memory_space<vmem>>, %arg3: memref<128x512xbf16, #tpu.memory_space<vmem>>, %arg4: memref<1x512xf32, #tpu.memory_space<vmem>>, %arg5: memref<128x512xbf16, #tpu.memory_space<vmem>>, %arg6: memref<8x128xf32, #tpu.memory_space<vmem>>, %arg7: memref<8x128xf32, #tpu.memory_space<vmem>>, %arg8: memref<8x128xf32, #tpu.memory_space<vmem>>, %arg9: memref<8x128xf32, #tpu.memory_space<vmem>>, %arg10: memref<8x128xf32, #tpu.memory_space<vmem>>, %arg11: memref<8x128xf32, #tpu.memory_space<vmem>>) attributes {dimension_semantics = [#tpu.dimension_semantics<parallel>, #tpu.dimension_semantics<arbitrary>], iteration_bounds = array<i64: 1, 1>, scalar_prefetch = 0 : i64, scratch_operands = 2 : i64, tpu.core_type = #tpu.core_type<tc>, window_params = [{transform_indices = @transform_0, window_bounds = array<i64: 8, 8, 128>}, {pipeline_mode = #tpu.pipeline_mode<synchronous>, transform_indices = @transform_1, window_bounds = array<i64: 128, 512>}, {pipeline_mode = #tpu.pipeline_mode<synchronous>, transform_indices = @transform_2, window_bounds = array<i64: 1, 512>}, {pipeline_mode = #tpu.pipeline_mode<synchronous>, transform_indices = @transform_3, window_bounds = array<i64: 128, 512>}, {transform_indices = @transform_4, window_bounds = array<i64: 8, 128>}, {transform_indices = @transform_5, window_bounds = array<i64: 8, 128>}, {transform_indices = @transform_6, window_bounds = array<i64: 8, 128>}, {transform_indices = @transform_7, window_bounds = array<i64: 8, 128>}]} {
    %c0_i32 = arith.constant 0 : i32
    %0 = arith.cmpi eq, %arg1, %c0_i32 : i32
    %1 = arith.extui %0 : i1 to i32
    %c0_i32_0 = arith.constant 0 : i32
    %2 = arith.cmpi ne, %1, %c0_i32_0 : i32
    scf.if %2 {
      %c0_49 = arith.constant 0 : index
      %c0_50 = arith.constant 0 : index
      %185 = vector.load %arg6[%c0_49, %c0_50] : memref<8x128xf32, #tpu.memory_space<vmem>>, vector<8x128xf32>
      %c0_51 = arith.constant 0 : index
      %c0_52 = arith.constant 0 : index
      %186 = vector.load %arg10[%c0_51, %c0_52] : memref<8x128xf32, #tpu.memory_space<vmem>>, vector<8x128xf32>
      tpu.vector_store %arg10[%c0_51, %c0_52], %185 {strides = array<i32>} : memref<8x128xf32, #tpu.memory_space<vmem>>, vector<8x128xf32>,
      %c0_53 = arith.constant 0 : index
      %c0_54 = arith.constant 0 : index
      %187 = vector.load %arg7[%c0_53, %c0_54] : memref<8x128xf32, #tpu.memory_space<vmem>>, vector<8x128xf32>
      %c0_55 = arith.constant 0 : index
      %c0_56 = arith.constant 0 : index
      %188 = vector.load %arg11[%c0_55, %c0_56] : memref<8x128xf32, #tpu.memory_space<vmem>>, vector<8x128xf32>
      tpu.vector_store %arg11[%c0_55, %c0_56], %187 {strides = array<i32>} : memref<8x128xf32, #tpu.memory_space<vmem>>, vector<8x128xf32>,
    } else {
    }
    %c0 = arith.constant 0 : index
    %c0_1 = arith.constant 0 : index
    %c0_2 = arith.constant 0 : index
    %3 = vector.load %arg2[%c0, %c0_1, %c0_2] : memref<8x8x128xbf16, #tpu.memory_space<vmem>>, vector<8x8x128xbf16>
    %4 = vector.shape_cast %3 : vector<8x8x128xbf16> to vector<64x128xbf16>
    %c0_3 = arith.constant 0 : index
    %c0_4 = arith.constant 0 : index
    %5 = vector.load %arg3[%c0_3, %c0_4] : memref<128x512xbf16, #tpu.memory_space<vmem>>, vector<128x512xbf16>
    %cst = arith.constant dense<0.000000e+00> : vector<64x512xf32>
    %6 = tpu.matmul %4, %5, %cst {dimension_numbers = #tpu.dot_dimension_numbers<[1], [0], [0], [1], [0, 0, 1, 1], [], []>} : vector<64x128xbf16>, vector<128x512xbf16>, vector<64x512xf32> -> vector<64x512xf32>
    %c0_5 = arith.constant 0 : index
    %c0_6 = arith.constant 0 : index
    %7 = vector.load %arg4[%c0_5, %c0_6] : memref<1x512xf32, #tpu.memory_space<vmem>>, vector<1x512xf32>
    %8 = vector.broadcast %7 : vector<1x512xf32> to vector<64x512xf32>
    %9 = arith.addf %6, %8 : vector<64x512xf32>
    %c0_7 = arith.constant 0 : index
    %c0_8 = arith.constant 0 : index
    %10 = vector.load %arg10[%c0_7, %c0_8] : memref<8x128xf32, #tpu.memory_space<vmem>>, vector<8x128xf32>
    %c0_9 = arith.constant 0 : index
    %c0_10 = arith.constant 0 : index
    %11 = vector.load %arg11[%c0_9, %c0_10] : memref<8x128xf32, #tpu.memory_space<vmem>>, vector<8x128xf32>
    %12 = vector.extract_strided_slice %9 {offsets = [0, 0], sizes = [8, 512], strides = [1, 1]} : vector<64x512xf32> to vector<8x512xf32>
    %13 = arith.truncf %10 : vector<8x128xf32> to vector<8x128xbf16>
    %c0_11 = arith.constant 0 : index
    %c0_12 = arith.constant 0 : index
    %14 = vector.load %arg5[%c0_11, %c0_12] : memref<128x512xbf16, #tpu.memory_space<vmem>>, vector<128x512xbf16>
    %cst_13 = arith.constant dense<0.000000e+00> : vector<8x512xf32>
    %15 = tpu.matmul %13, %14, %cst_13 {dimension_numbers = #tpu.dot_dimension_numbers<[1], [0], [0], [1], [0, 0, 1, 1], [], []>} : vector<8x128xbf16>, vector<128x512xbf16>, vector<8x512xf32> -> vector<8x512xf32>
    %16 = arith.addf %12, %15 : vector<8x512xf32>
    %17 = vector.extract_strided_slice %16 {offsets = [0, 0], sizes = [8, 384], strides = [1, 1]} : vector<8x512xf32> to vector<8x384xf32>
    %18 = arith.negf %17 : vector<8x384xf32>
    %19 = math.exp %18 : vector<8x384xf32>
    %cst_14 = arith.constant 1.000000e+00 : f32
    %20 = vector.broadcast %cst_14 : f32 to vector<8x384xf32>
    %21 = arith.addf %20, %19 : vector<8x384xf32>
    %22 = arith.divf %20, %21 : vector<8x384xf32>
    %23 = vector.extract_strided_slice %16 {offsets = [0, 384], sizes = [8, 128], strides = [1, 1]} : vector<8x512xf32> to vector<8x128xf32>
    %24 = math.tanh %23 : vector<8x128xf32>
    %25 = vector.extract_strided_slice %22 {offsets = [0, 128], sizes = [8, 128], strides = [1, 1]} : vector<8x384xf32> to vector<8x128xf32>
    %26 = arith.mulf %25, %11 : vector<8x128xf32>
    %27 = vector.extract_strided_slice %22 {offsets = [0, 0], sizes = [8, 128], strides = [1, 1]} : vector<8x384xf32> to vector<8x128xf32>
    %28 = arith.mulf %27, %24 : vector<8x128xf32>
    %29 = arith.addf %26, %28 : vector<8x128xf32>
    %30 = vector.extract_strided_slice %22 {offsets = [0, 256], sizes = [8, 128], strides = [1, 1]} : vector<8x384xf32> to vector<8x128xf32>
    %31 = math.tanh %29 : vector<8x128xf32>
    %32 = arith.mulf %30, %31 : vector<8x128xf32>
    %33 = vector.extract_strided_slice %9 {offsets = [8, 0], sizes = [8, 512], strides = [1, 1]} : vector<64x512xf32> to vector<8x512xf32>
    %34 = arith.truncf %32 : vector<8x128xf32> to vector<8x128xbf16>
    %c0_15 = arith.constant 0 : index
    %c0_16 = arith.constant 0 : index
    %35 = vector.load %arg5[%c0_15, %c0_16] : memref<128x512xbf16, #tpu.memory_space<vmem>>, vector<128x512xbf16>
    %cst_17 = arith.constant dense<0.000000e+00> : vector<8x512xf32>
    %36 = tpu.matmul %34, %35, %cst_17 {dimension_numbers = #tpu.dot_dimension_numbers<[1], [0], [0], [1], [0, 0, 1, 1], [], []>} : vector<8x128xbf16>, vector<128x512xbf16>, vector<8x512xf32> -> vector<8x512xf32>
    %37 = arith.addf %33, %36 : vector<8x512xf32>
    %38 = vector.extract_strided_slice %37 {offsets = [0, 0], sizes = [8, 384], strides = [1, 1]} : vector<8x512xf32> to vector<8x384xf32>
    %39 = arith.negf %38 : vector<8x384xf32>
    %40 = math.exp %39 : vector<8x384xf32>
    %cst_18 = arith.constant 1.000000e+00 : f32
    %41 = vector.broadcast %cst_18 : f32 to vector<8x384xf32>
    %42 = arith.addf %41, %40 : vector<8x384xf32>
    %43 = arith.divf %41, %42 : vector<8x384xf32>
    %44 = vector.extract_strided_slice %37 {offsets = [0, 384], sizes = [8, 128], strides = [1, 1]} : vector<8x512xf32> to vector<8x128xf32>
    %45 = math.tanh %44 : vector<8x128xf32>
    %46 = vector.extract_strided_slice %43 {offsets = [0, 128], sizes = [8, 128], strides = [1, 1]} : vector<8x384xf32> to vector<8x128xf32>
    %47 = arith.mulf %46, %29 : vector<8x128xf32>
    %48 = vector.extract_strided_slice %43 {offsets = [0, 0], sizes = [8, 128], strides = [1, 1]} : vector<8x384xf32> to vector<8x128xf32>
    %49 = arith.mulf %48, %45 : vector<8x128xf32>
    %50 = arith.addf %47, %49 : vector<8x128xf32>
    %51 = vector.extract_strided_slice %43 {offsets = [0, 256], sizes = [8, 128], strides = [1, 1]} : vector<8x384xf32> to vector<8x128xf32>
    %52 = math.tanh %50 : vector<8x128xf32>
    %53 = arith.mulf %51, %52 : vector<8x128xf32>
    %54 = vector.extract_strided_slice %9 {offsets = [16, 0], sizes = [8, 512], strides = [1, 1]} : vector<64x512xf32> to vector<8x512xf32>
    %55 = arith.truncf %53 : vector<8x128xf32> to vector<8x128xbf16>
    %c0_19 = arith.constant 0 : index
    %c0_20 = arith.constant 0 : index
    %56 = vector.load %arg5[%c0_19, %c0_20] : memref<128x512xbf16, #tpu.memory_space<vmem>>, vector<128x512xbf16>
    %cst_21 = arith.constant dense<0.000000e+00> : vector<8x512xf32>
    %57 = tpu.matmul %55, %56, %cst_21 {dimension_numbers = #tpu.dot_dimension_numbers<[1], [0], [0], [1], [0, 0, 1, 1], [], []>} : vector<8x128xbf16>, vector<128x512xbf16>, vector<8x512xf32> -> vector<8x512xf32>
    %58 = arith.addf %54, %57 : vector<8x512xf32>
    %59 = vector.extract_strided_slice %58 {offsets = [0, 0], sizes = [8, 384], strides = [1, 1]} : vector<8x512xf32> to vector<8x384xf32>
    %60 = arith.negf %59 : vector<8x384xf32>
    %61 = math.exp %60 : vector<8x384xf32>
    %cst_22 = arith.constant 1.000000e+00 : f32
    %62 = vector.broadcast %cst_22 : f32 to vector<8x384xf32>
    %63 = arith.addf %62, %61 : vector<8x384xf32>
    %64 = arith.divf %62, %63 : vector<8x384xf32>
    %65 = vector.extract_strided_slice %58 {offsets = [0, 384], sizes = [8, 128], strides = [1, 1]} : vector<8x512xf32> to vector<8x128xf32>
    %66 = math.tanh %65 : vector<8x128xf32>
    %67 = vector.extract_strided_slice %64 {offsets = [0, 128], sizes = [8, 128], strides = [1, 1]} : vector<8x384xf32> to vector<8x128xf32>
    %68 = arith.mulf %67, %50 : vector<8x128xf32>
    %69 = vector.extract_strided_slice %64 {offsets = [0, 0], sizes = [8, 128], strides = [1, 1]} : vector<8x384xf32> to vector<8x128xf32>
    %70 = arith.mulf %69, %66 : vector<8x128xf32>
    %71 = arith.addf %68, %70 : vector<8x128xf32>
    %72 = vector.extract_strided_slice %64 {offsets = [0, 256], sizes = [8, 128], strides = [1, 1]} : vector<8x384xf32> to vector<8x128xf32>
    %73 = math.tanh %71 : vector<8x128xf32>
    %74 = arith.mulf %72, %73 : vector<8x128xf32>
    %75 = vector.extract_strided_slice %9 {offsets = [24, 0], sizes = [8, 512], strides = [1, 1]} : vector<64x512xf32> to vector<8x512xf32>
    %76 = arith.truncf %74 : vector<8x128xf32> to vector<8x128xbf16>
    %c0_23 = arith.constant 0 : index
    %c0_24 = arith.constant 0 : index
    %77 = vector.load %arg5[%c0_23, %c0_24] : memref<128x512xbf16, #tpu.memory_space<vmem>>, vector<128x512xbf16>
    %cst_25 = arith.constant dense<0.000000e+00> : vector<8x512xf32>
    %78 = tpu.matmul %76, %77, %cst_25 {dimension_numbers = #tpu.dot_dimension_numbers<[1], [0], [0], [1], [0, 0, 1, 1], [], []>} : vector<8x128xbf16>, vector<128x512xbf16>, vector<8x512xf32> -> vector<8x512xf32>
    %79 = arith.addf %75, %78 : vector<8x512xf32>
    %80 = vector.extract_strided_slice %79 {offsets = [0, 0], sizes = [8, 384], strides = [1, 1]} : vector<8x512xf32> to vector<8x384xf32>
    %81 = arith.negf %80 : vector<8x384xf32>
    %82 = math.exp %81 : vector<8x384xf32>
    %cst_26 = arith.constant 1.000000e+00 : f32
    %83 = vector.broadcast %cst_26 : f32 to vector<8x384xf32>
    %84 = arith.addf %83, %82 : vector<8x384xf32>
    %85 = arith.divf %83, %84 : vector<8x384xf32>
    %86 = vector.extract_strided_slice %79 {offsets = [0, 384], sizes = [8, 128], strides = [1, 1]} : vector<8x512xf32> to vector<8x128xf32>
    %87 = math.tanh %86 : vector<8x128xf32>
    %88 = vector.extract_strided_slice %85 {offsets = [0, 128], sizes = [8, 128], strides = [1, 1]} : vector<8x384xf32> to vector<8x128xf32>
    %89 = arith.mulf %88, %71 : vector<8x128xf32>
    %90 = vector.extract_strided_slice %85 {offsets = [0, 0], sizes = [8, 128], strides = [1, 1]} : vector<8x384xf32> to vector<8x128xf32>
    %91 = arith.mulf %90, %87 : vector<8x128xf32>
    %92 = arith.addf %89, %91 : vector<8x128xf32>
    %93 = vector.extract_strided_slice %85 {offsets = [0, 256], sizes = [8, 128], strides = [1, 1]} : vector<8x384xf32> to vector<8x128xf32>
    %94 = math.tanh %92 : vector<8x128xf32>
    %95 = arith.mulf %93, %94 : vector<8x128xf32>
    %96 = vector.extract_strided_slice %9 {offsets = [32, 0], sizes = [8, 512], strides = [1, 1]} : vector<64x512xf32> to vector<8x512xf32>
    %97 = arith.truncf %95 : vector<8x128xf32> to vector<8x128xbf16>
    %c0_27 = arith.constant 0 : index
    %c0_28 = arith.constant 0 : index
    %98 = vector.load %arg5[%c0_27, %c0_28] : memref<128x512xbf16, #tpu.memory_space<vmem>>, vector<128x512xbf16>
    %cst_29 = arith.constant dense<0.000000e+00> : vector<8x512xf32>
    %99 = tpu.matmul %97, %98, %cst_29 {dimension_numbers = #tpu.dot_dimension_numbers<[1], [0], [0], [1], [0, 0, 1, 1], [], []>} : vector<8x128xbf16>, vector<128x512xbf16>, vector<8x512xf32> -> vector<8x512xf32>
    %100 = arith.addf %96, %99 : vector<8x512xf32>
    %101 = vector.extract_strided_slice %100 {offsets = [0, 0], sizes = [8, 384], strides = [1, 1]} : vector<8x512xf32> to vector<8x384xf32>
    %102 = arith.negf %101 : vector<8x384xf32>
    %103 = math.exp %102 : vector<8x384xf32>
    %cst_30 = arith.constant 1.000000e+00 : f32
    %104 = vector.broadcast %cst_30 : f32 to vector<8x384xf32>
    %105 = arith.addf %104, %103 : vector<8x384xf32>
    %106 = arith.divf %104, %105 : vector<8x384xf32>
    %107 = vector.extract_strided_slice %100 {offsets = [0, 384], sizes = [8, 128], strides = [1, 1]} : vector<8x512xf32> to vector<8x128xf32>
    %108 = math.tanh %107 : vector<8x128xf32>
    %109 = vector.extract_strided_slice %106 {offsets = [0, 128], sizes = [8, 128], strides = [1, 1]} : vector<8x384xf32> to vector<8x128xf32>
    %110 = arith.mulf %109, %92 : vector<8x128xf32>
    %111 = vector.extract_strided_slice %106 {offsets = [0, 0], sizes = [8, 128], strides = [1, 1]} : vector<8x384xf32> to vector<8x128xf32>
    %112 = arith.mulf %111, %108 : vector<8x128xf32>
    %113 = arith.addf %110, %112 : vector<8x128xf32>
    %114 = vector.extract_strided_slice %106 {offsets = [0, 256], sizes = [8, 128], strides = [1, 1]} : vector<8x384xf32> to vector<8x128xf32>
    %115 = math.tanh %113 : vector<8x128xf32>
    %116 = arith.mulf %114, %115 : vector<8x128xf32>
    %117 = vector.extract_strided_slice %9 {offsets = [40, 0], sizes = [8, 512], strides = [1, 1]} : vector<64x512xf32> to vector<8x512xf32>
    %118 = arith.truncf %116 : vector<8x128xf32> to vector<8x128xbf16>
    %c0_31 = arith.constant 0 : index
    %c0_32 = arith.constant 0 : index
    %119 = vector.load %arg5[%c0_31, %c0_32] : memref<128x512xbf16, #tpu.memory_space<vmem>>, vector<128x512xbf16>
    %cst_33 = arith.constant dense<0.000000e+00> : vector<8x512xf32>
    %120 = tpu.matmul %118, %119, %cst_33 {dimension_numbers = #tpu.dot_dimension_numbers<[1], [0], [0], [1], [0, 0, 1, 1], [], []>} : vector<8x128xbf16>, vector<128x512xbf16>, vector<8x512xf32> -> vector<8x512xf32>
    %121 = arith.addf %117, %120 : vector<8x512xf32>
    %122 = vector.extract_strided_slice %121 {offsets = [0, 0], sizes = [8, 384], strides = [1, 1]} : vector<8x512xf32> to vector<8x384xf32>
    %123 = arith.negf %122 : vector<8x384xf32>
    %124 = math.exp %123 : vector<8x384xf32>
    %cst_34 = arith.constant 1.000000e+00 : f32
    %125 = vector.broadcast %cst_34 : f32 to vector<8x384xf32>
    %126 = arith.addf %125, %124 : vector<8x384xf32>
    %127 = arith.divf %125, %126 : vector<8x384xf32>
    %128 = vector.extract_strided_slice %121 {offsets = [0, 384], sizes = [8, 128], strides = [1, 1]} : vector<8x512xf32> to vector<8x128xf32>
    %129 = math.tanh %128 : vector<8x128xf32>
    %130 = vector.extract_strided_slice %127 {offsets = [0, 128], sizes = [8, 128], strides = [1, 1]} : vector<8x384xf32> to vector<8x128xf32>
    %131 = arith.mulf %130, %113 : vector<8x128xf32>
    %132 = vector.extract_strided_slice %127 {offsets = [0, 0], sizes = [8, 128], strides = [1, 1]} : vector<8x384xf32> to vector<8x128xf32>
    %133 = arith.mulf %132, %129 : vector<8x128xf32>
    %134 = arith.addf %131, %133 : vector<8x128xf32>
    %135 = vector.extract_strided_slice %127 {offsets = [0, 256], sizes = [8, 128], strides = [1, 1]} : vector<8x384xf32> to vector<8x128xf32>
    %136 = math.tanh %134 : vector<8x128xf32>
    %137 = arith.mulf %135, %136 : vector<8x128xf32>
    %138 = vector.extract_strided_slice %9 {offsets = [48, 0], sizes = [8, 512], strides = [1, 1]} : vector<64x512xf32> to vector<8x512xf32>
    %139 = arith.truncf %137 : vector<8x128xf32> to vector<8x128xbf16>
    %c0_35 = arith.constant 0 : index
    %c0_36 = arith.constant 0 : index
    %140 = vector.load %arg5[%c0_35, %c0_36] : memref<128x512xbf16, #tpu.memory_space<vmem>>, vector<128x512xbf16>
    %cst_37 = arith.constant dense<0.000000e+00> : vector<8x512xf32>
    %141 = tpu.matmul %139, %140, %cst_37 {dimension_numbers = #tpu.dot_dimension_numbers<[1], [0], [0], [1], [0, 0, 1, 1], [], []>} : vector<8x128xbf16>, vector<128x512xbf16>, vector<8x512xf32> -> vector<8x512xf32>
    %142 = arith.addf %138, %141 : vector<8x512xf32>
    %143 = vector.extract_strided_slice %142 {offsets = [0, 0], sizes = [8, 384], strides = [1, 1]} : vector<8x512xf32> to vector<8x384xf32>
    %144 = arith.negf %143 : vector<8x384xf32>
    %145 = math.exp %144 : vector<8x384xf32>
    %cst_38 = arith.constant 1.000000e+00 : f32
    %146 = vector.broadcast %cst_38 : f32 to vector<8x384xf32>
    %147 = arith.addf %146, %145 : vector<8x384xf32>
    %148 = arith.divf %146, %147 : vector<8x384xf32>
    %149 = vector.extract_strided_slice %142 {offsets = [0, 384], sizes = [8, 128], strides = [1, 1]} : vector<8x512xf32> to vector<8x128xf32>
    %150 = math.tanh %149 : vector<8x128xf32>
    %151 = vector.extract_strided_slice %148 {offsets = [0, 128], sizes = [8, 128], strides = [1, 1]} : vector<8x384xf32> to vector<8x128xf32>
    %152 = arith.mulf %151, %134 : vector<8x128xf32>
    %153 = vector.extract_strided_slice %148 {offsets = [0, 0], sizes = [8, 128], strides = [1, 1]} : vector<8x384xf32> to vector<8x128xf32>
    %154 = arith.mulf %153, %150 : vector<8x128xf32>
    %155 = arith.addf %152, %154 : vector<8x128xf32>
    %156 = vector.extract_strided_slice %148 {offsets = [0, 256], sizes = [8, 128], strides = [1, 1]} : vector<8x384xf32> to vector<8x128xf32>
    %157 = math.tanh %155 : vector<8x128xf32>
    %158 = arith.mulf %156, %157 : vector<8x128xf32>
    %159 = vector.extract_strided_slice %9 {offsets = [56, 0], sizes = [8, 512], strides = [1, 1]} : vector<64x512xf32> to vector<8x512xf32>
    %160 = arith.truncf %158 : vector<8x128xf32> to vector<8x128xbf16>
    %c0_39 = arith.constant 0 : index
    %c0_40 = arith.constant 0 : index
    %161 = vector.load %arg5[%c0_39, %c0_40] : memref<128x512xbf16, #tpu.memory_space<vmem>>, vector<128x512xbf16>
    %cst_41 = arith.constant dense<0.000000e+00> : vector<8x512xf32>
    %162 = tpu.matmul %160, %161, %cst_41 {dimension_numbers = #tpu.dot_dimension_numbers<[1], [0], [0], [1], [0, 0, 1, 1], [], []>} : vector<8x128xbf16>, vector<128x512xbf16>, vector<8x512xf32> -> vector<8x512xf32>
    %163 = arith.addf %159, %162 : vector<8x512xf32>
    %164 = vector.extract_strided_slice %163 {offsets = [0, 0], sizes = [8, 384], strides = [1, 1]} : vector<8x512xf32> to vector<8x384xf32>
    %165 = arith.negf %164 : vector<8x384xf32>
    %166 = math.exp %165 : vector<8x384xf32>
    %cst_42 = arith.constant 1.000000e+00 : f32
    %167 = vector.broadcast %cst_42 : f32 to vector<8x384xf32>
    %168 = arith.addf %167, %166 : vector<8x384xf32>
    %169 = arith.divf %167, %168 : vector<8x384xf32>
    %170 = vector.extract_strided_slice %163 {offsets = [0, 384], sizes = [8, 128], strides = [1, 1]} : vector<8x512xf32> to vector<8x128xf32>
    %171 = math.tanh %170 : vector<8x128xf32>
    %172 = vector.extract_strided_slice %169 {offsets = [0, 128], sizes = [8, 128], strides = [1, 1]} : vector<8x384xf32> to vector<8x128xf32>
    %173 = arith.mulf %172, %155 : vector<8x128xf32>
    %174 = vector.extract_strided_slice %169 {offsets = [0, 0], sizes = [8, 128], strides = [1, 1]} : vector<8x384xf32> to vector<8x128xf32>
    %175 = arith.mulf %174, %171 : vector<8x128xf32>
    %176 = arith.addf %173, %175 : vector<8x128xf32>
    %177 = vector.extract_strided_slice %169 {offsets = [0, 256], sizes = [8, 128], strides = [1, 1]} : vector<8x384xf32> to vector<8x128xf32>
    %178 = math.tanh %176 : vector<8x128xf32>
    %179 = arith.mulf %177, %178 : vector<8x128xf32>
    %c0_43 = arith.constant 0 : index
    %c0_44 = arith.constant 0 : index
    %180 = vector.load %arg10[%c0_43, %c0_44] : memref<8x128xf32, #tpu.memory_space<vmem>>, vector<8x128xf32>
    tpu.vector_store %arg10[%c0_43, %c0_44], %179 {strides = array<i32>} : memref<8x128xf32, #tpu.memory_space<vmem>>, vector<8x128xf32>,
    %c0_45 = arith.constant 0 : index
    %c0_46 = arith.constant 0 : index
    %181 = vector.load %arg11[%c0_45, %c0_46] : memref<8x128xf32, #tpu.memory_space<vmem>>, vector<8x128xf32>
    tpu.vector_store %arg11[%c0_45, %c0_46], %176 {strides = array<i32>} : memref<8x128xf32, #tpu.memory_space<vmem>>, vector<8x128xf32>,
    %c0_i32_47 = arith.constant 0 : i32
    %182 = arith.cmpi eq, %arg1, %c0_i32_47 : i32
    %183 = arith.extui %182 : i1 to i32
    %c0_i32_48 = arith.constant 0 : i32
    %184 = arith.cmpi ne, %183, %c0_i32_48 : i32
    scf.if %184 {
      %c0_49 = arith.constant 0 : index
      %c0_50 = arith.constant 0 : index
      %185 = vector.load %arg8[%c0_49, %c0_50] : memref<8x128xf32, #tpu.memory_space<vmem>>, vector<8x128xf32>
      tpu.vector_store %arg8[%c0_49, %c0_50], %179 {strides = array<i32>} : memref<8x128xf32, #tpu.memory_space<vmem>>, vector<8x128xf32>,
      %c0_51 = arith.constant 0 : index
      %c0_52 = arith.constant 0 : index
      %186 = vector.load %arg9[%c0_51, %c0_52] : memref<8x128xf32, #tpu.memory_space<vmem>>, vector<8x128xf32>
      tpu.vector_store %arg9[%c0_51, %c0_52], %176 {strides = array<i32>} : memref<8x128xf32, #tpu.memory_space<vmem>>, vector<8x128xf32>,
    } else {
    }
    return
  }
  func.func @transform_0(%arg0: i32, %arg1: i32) -> (i32, i32, i32) {
    %c0_i32 = arith.constant 0 : i32
    %c0_i32_0 = arith.constant 0 : i32
    return %arg1, %arg0, %c0_i32 : i32, i32, i32
  }
  func.func @transform_1(%arg0: i32, %arg1: i32) -> (i32, i32) {
    %c0_i32 = arith.constant 0 : i32
    %c0_i32_0 = arith.constant 0 : i32
    %c0_i32_1 = arith.constant 0 : i32
    return %c0_i32, %c0_i32_0 : i32, i32
  }
  func.func @transform_2(%arg0: i32, %arg1: i32) -> (i32, i32) {
    %c0_i32 = arith.constant 0 : i32
    %c0_i32_0 = arith.constant 0 : i32
    %c0_i32_1 = arith.constant 0 : i32
    return %c0_i32, %c0_i32_0 : i32, i32
  }
  func.func @transform_3(%arg0: i32, %arg1: i32) -> (i32, i32) {
    %c0_i32 = arith.constant 0 : i32
    %c0_i32_0 = arith.constant 0 : i32
    %c0_i32_1 = arith.constant 0 : i32
    return %c0_i32, %c0_i32_0 : i32, i32
  }
  func.func @transform_4(%arg0: i32, %arg1: i32) -> (i32, i32) {
    %c0_i32 = arith.constant 0 : i32
    %c0_i32_0 = arith.constant 0 : i32
    return %arg0, %c0_i32 : i32, i32
  }
  func.func @transform_5(%arg0: i32, %arg1: i32) -> (i32, i32) {
    %c0_i32 = arith.constant 0 : i32
    %c0_i32_0 = arith.constant 0 : i32
    return %arg0, %c0_i32 : i32, i32
  }
  func.func @transform_6(%arg0: i32, %arg1: i32) -> (i32, i32) {
    %c0_i32 = arith.constant 0 : i32
    %c0_i32_0 = arith.constant 0 : i32
    return %arg0, %c0_i32 : i32, i32
  }
  func.func @transform_7(%arg0: i32, %arg1: i32) -> (i32, i32) {
    %c0_i32 = arith.constant 0 : i32
    %c0_i32_0 = arith.constant 0 : i32
    return %arg0, %c0_i32 : i32, i32
  }
}

module attributes {stable_mosaic.version = 11 : i64} {
  func.func @_matmul_bias_kernel(%arg0: i32, %arg1: i32, %arg2: i32, %arg3: memref<64x128xbf16, #tpu.memory_space<vmem>>, %arg4: memref<128x256xbf16, #tpu.memory_space<vmem>>, %arg5: memref<1x256xf32, #tpu.memory_space<vmem>>, %arg6: memref<64x256xf32, #tpu.memory_space<vmem>>) attributes {dimension_semantics = [#tpu.dimension_semantics<parallel>, #tpu.dimension_semantics<parallel>, #tpu.dimension_semantics<arbitrary>], iteration_bounds = array<i64: 1, 1, 1>, scalar_prefetch = 0 : i64, scratch_operands = 0 : i64, tpu.core_type = #tpu.core_type<tc>, window_params = [{transform_indices = @transform_0, window_bounds = array<i64: 64, 128>}, {transform_indices = @transform_1, window_bounds = array<i64: 128, 256>}, {transform_indices = @transform_2, window_bounds = array<i64: 1, 256>}, {transform_indices = @transform_3, window_bounds = array<i64: 64, 256>}]} {
    %c0_i32 = arith.constant 0 : i32
    %0 = arith.cmpi eq, %arg2, %c0_i32 : i32
    %1 = arith.extui %0 : i1 to i32
    %c0_i32_0 = arith.constant 0 : i32
    %2 = arith.cmpi ne, %1, %c0_i32_0 : i32
    scf.if %2 {
      %c0_8 = arith.constant 0 : index
      %c0_9 = arith.constant 0 : index
      %9 = vector.load %arg5[%c0_8, %c0_9] : memref<1x256xf32, #tpu.memory_space<vmem>>, vector<1x256xf32>
      %10 = vector.shape_cast %9 : vector<1x256xf32> to vector<1x256xf32>
      %11 = vector.broadcast %10 : vector<1x256xf32> to vector<64x256xf32>
      %c0_10 = arith.constant 0 : index
      %c0_11 = arith.constant 0 : index
      %12 = vector.load %arg6[%c0_10, %c0_11] : memref<64x256xf32, #tpu.memory_space<vmem>>, vector<64x256xf32>
      tpu.vector_store %arg6[%c0_10, %c0_11], %11 {strides = array<i32>} : memref<64x256xf32, #tpu.memory_space<vmem>>, vector<64x256xf32>,
    } else {
    }
    %c0 = arith.constant 0 : index
    %c0_1 = arith.constant 0 : index
    %3 = vector.load %arg6[%c0, %c0_1] : memref<64x256xf32, #tpu.memory_space<vmem>>, vector<64x256xf32>
    %c0_2 = arith.constant 0 : index
    %c0_3 = arith.constant 0 : index
    %4 = vector.load %arg3[%c0_2, %c0_3] : memref<64x128xbf16, #tpu.memory_space<vmem>>, vector<64x128xbf16>
    %c0_4 = arith.constant 0 : index
    %c0_5 = arith.constant 0 : index
    %5 = vector.load %arg4[%c0_4, %c0_5] : memref<128x256xbf16, #tpu.memory_space<vmem>>, vector<128x256xbf16>
    %cst = arith.constant dense<0.000000e+00> : vector<64x256xf32>
    %6 = tpu.matmul %4, %5, %cst {dimension_numbers = #tpu.dot_dimension_numbers<[1], [0], [0], [1], [0, 0, 1, 1], [], []>} : vector<64x128xbf16>, vector<128x256xbf16>, vector<64x256xf32> -> vector<64x256xf32>
    %7 = arith.addf %3, %6 : vector<64x256xf32>
    %c0_6 = arith.constant 0 : index
    %c0_7 = arith.constant 0 : index
    %8 = vector.load %arg6[%c0_6, %c0_7] : memref<64x256xf32, #tpu.memory_space<vmem>>, vector<64x256xf32>
    tpu.vector_store %arg6[%c0_6, %c0_7], %7 {strides = array<i32>} : memref<64x256xf32, #tpu.memory_space<vmem>>, vector<64x256xf32>,
    return
  }
  func.func @transform_0(%arg0: i32, %arg1: i32, %arg2: i32) -> (i32, i32) {
    %c0_i32 = arith.constant 0 : i32
    return %arg0, %arg2 : i32, i32
  }
  func.func @transform_1(%arg0: i32, %arg1: i32, %arg2: i32) -> (i32, i32) {
    %c0_i32 = arith.constant 0 : i32
    return %arg2, %arg1 : i32, i32
  }
  func.func @transform_2(%arg0: i32, %arg1: i32, %arg2: i32) -> (i32, i32) {
    %c0_i32 = arith.constant 0 : i32
    %c0_i32_0 = arith.constant 0 : i32
    return %c0_i32, %arg1 : i32, i32
  }
  func.func @transform_3(%arg0: i32, %arg1: i32, %arg2: i32) -> (i32, i32) {
    %c0_i32 = arith.constant 0 : i32
    return %arg0, %arg1 : i32, i32
  }
}

module attributes {stable_mosaic.version = 11 : i64} {
  func.func @_lstm_kernel_with_out(%arg0: i32, %arg1: i32, %arg2: memref<8x8x128xbf16, #tpu.memory_space<vmem>>, %arg3: memref<128x512xbf16, #tpu.memory_space<vmem>>, %arg4: memref<1x512xf32, #tpu.memory_space<vmem>>, %arg5: memref<128x512xbf16, #tpu.memory_space<vmem>>, %arg6: memref<8x128xf32, #tpu.memory_space<vmem>>, %arg7: memref<8x128xf32, #tpu.memory_space<vmem>>, %arg8: memref<8x8x128xf32, #tpu.memory_space<vmem>>, %arg9: memref<8x128xf32, #tpu.memory_space<vmem>>, %arg10: memref<8x128xf32, #tpu.memory_space<vmem>>, %arg11: memref<8x128xf32, #tpu.memory_space<vmem>>, %arg12: memref<8x128xf32, #tpu.memory_space<vmem>>) attributes {dimension_semantics = [#tpu.dimension_semantics<parallel>, #tpu.dimension_semantics<arbitrary>], iteration_bounds = array<i64: 1, 1>, scalar_prefetch = 0 : i64, scratch_operands = 2 : i64, tpu.core_type = #tpu.core_type<tc>, window_params = [{transform_indices = @transform_0, window_bounds = array<i64: 8, 8, 128>}, {pipeline_mode = #tpu.pipeline_mode<synchronous>, transform_indices = @transform_1, window_bounds = array<i64: 128, 512>}, {pipeline_mode = #tpu.pipeline_mode<synchronous>, transform_indices = @transform_2, window_bounds = array<i64: 1, 512>}, {pipeline_mode = #tpu.pipeline_mode<synchronous>, transform_indices = @transform_3, window_bounds = array<i64: 128, 512>}, {transform_indices = @transform_4, window_bounds = array<i64: 8, 128>}, {transform_indices = @transform_5, window_bounds = array<i64: 8, 128>}, {transform_indices = @transform_6, window_bounds = array<i64: 8, 8, 128>}, {transform_indices = @transform_7, window_bounds = array<i64: 8, 128>}, {transform_indices = @transform_8, window_bounds = array<i64: 8, 128>}]} {
    %c0_i32 = arith.constant 0 : i32
    %0 = arith.cmpi eq, %arg1, %c0_i32 : i32
    %1 = arith.extui %0 : i1 to i32
    %c0_i32_0 = arith.constant 0 : i32
    %2 = arith.cmpi ne, %1, %c0_i32_0 : i32
    scf.if %2 {
      %c0_66 = arith.constant 0 : index
      %c0_67 = arith.constant 0 : index
      %209 = vector.load %arg6[%c0_66, %c0_67] : memref<8x128xf32, #tpu.memory_space<vmem>>, vector<8x128xf32>
      %c0_68 = arith.constant 0 : index
      %c0_69 = arith.constant 0 : index
      %210 = vector.load %arg11[%c0_68, %c0_69] : memref<8x128xf32, #tpu.memory_space<vmem>>, vector<8x128xf32>
      tpu.vector_store %arg11[%c0_68, %c0_69], %209 {strides = array<i32>} : memref<8x128xf32, #tpu.memory_space<vmem>>, vector<8x128xf32>,
      %c0_70 = arith.constant 0 : index
      %c0_71 = arith.constant 0 : index
      %211 = vector.load %arg7[%c0_70, %c0_71] : memref<8x128xf32, #tpu.memory_space<vmem>>, vector<8x128xf32>
      %c0_72 = arith.constant 0 : index
      %c0_73 = arith.constant 0 : index
      %212 = vector.load %arg12[%c0_72, %c0_73] : memref<8x128xf32, #tpu.memory_space<vmem>>, vector<8x128xf32>
      tpu.vector_store %arg12[%c0_72, %c0_73], %211 {strides = array<i32>} : memref<8x128xf32, #tpu.memory_space<vmem>>, vector<8x128xf32>,
    } else {
    }
    %c0 = arith.constant 0 : index
    %c0_1 = arith.constant 0 : index
    %c0_2 = arith.constant 0 : index
    %3 = vector.load %arg2[%c0, %c0_1, %c0_2] : memref<8x8x128xbf16, #tpu.memory_space<vmem>>, vector<8x8x128xbf16>
    %4 = vector.shape_cast %3 : vector<8x8x128xbf16> to vector<64x128xbf16>
    %c0_3 = arith.constant 0 : index
    %c0_4 = arith.constant 0 : index
    %5 = vector.load %arg3[%c0_3, %c0_4] : memref<128x512xbf16, #tpu.memory_space<vmem>>, vector<128x512xbf16>
    %cst = arith.constant dense<0.000000e+00> : vector<64x512xf32>
    %6 = tpu.matmul %4, %5, %cst {dimension_numbers = #tpu.dot_dimension_numbers<[1], [0], [0], [1], [0, 0, 1, 1], [], []>} : vector<64x128xbf16>, vector<128x512xbf16>, vector<64x512xf32> -> vector<64x512xf32>
    %c0_5 = arith.constant 0 : index
    %c0_6 = arith.constant 0 : index
    %7 = vector.load %arg4[%c0_5, %c0_6] : memref<1x512xf32, #tpu.memory_space<vmem>>, vector<1x512xf32>
    %8 = vector.broadcast %7 : vector<1x512xf32> to vector<64x512xf32>
    %9 = arith.addf %6, %8 : vector<64x512xf32>
    %c0_7 = arith.constant 0 : index
    %c0_8 = arith.constant 0 : index
    %10 = vector.load %arg11[%c0_7, %c0_8] : memref<8x128xf32, #tpu.memory_space<vmem>>, vector<8x128xf32>
    %c0_9 = arith.constant 0 : index
    %c0_10 = arith.constant 0 : index
    %11 = vector.load %arg12[%c0_9, %c0_10] : memref<8x128xf32, #tpu.memory_space<vmem>>, vector<8x128xf32>
    %12 = vector.extract_strided_slice %9 {offsets = [0, 0], sizes = [8, 512], strides = [1, 1]} : vector<64x512xf32> to vector<8x512xf32>
    %13 = arith.truncf %10 : vector<8x128xf32> to vector<8x128xbf16>
    %c0_11 = arith.constant 0 : index
    %c0_12 = arith.constant 0 : index
    %14 = vector.load %arg5[%c0_11, %c0_12] : memref<128x512xbf16, #tpu.memory_space<vmem>>, vector<128x512xbf16>
    %cst_13 = arith.constant dense<0.000000e+00> : vector<8x512xf32>
    %15 = tpu.matmul %13, %14, %cst_13 {dimension_numbers = #tpu.dot_dimension_numbers<[1], [0], [0], [1], [0, 0, 1, 1], [], []>} : vector<8x128xbf16>, vector<128x512xbf16>, vector<8x512xf32> -> vector<8x512xf32>
    %16 = arith.addf %12, %15 : vector<8x512xf32>
    %17 = vector.extract_strided_slice %16 {offsets = [0, 0], sizes = [8, 384], strides = [1, 1]} : vector<8x512xf32> to vector<8x384xf32>
    %18 = arith.negf %17 : vector<8x384xf32>
    %19 = math.exp %18 : vector<8x384xf32>
    %cst_14 = arith.constant 1.000000e+00 : f32
    %20 = vector.broadcast %cst_14 : f32 to vector<8x384xf32>
    %21 = arith.addf %20, %19 : vector<8x384xf32>
    %22 = arith.divf %20, %21 : vector<8x384xf32>
    %23 = vector.extract_strided_slice %16 {offsets = [0, 384], sizes = [8, 128], strides = [1, 1]} : vector<8x512xf32> to vector<8x128xf32>
    %24 = math.tanh %23 : vector<8x128xf32>
    %25 = vector.extract_strided_slice %22 {offsets = [0, 128], sizes = [8, 128], strides = [1, 1]} : vector<8x384xf32> to vector<8x128xf32>
    %26 = arith.mulf %25, %11 : vector<8x128xf32>
    %27 = vector.extract_strided_slice %22 {offsets = [0, 0], sizes = [8, 128], strides = [1, 1]} : vector<8x384xf32> to vector<8x128xf32>
    %28 = arith.mulf %27, %24 : vector<8x128xf32>
    %29 = arith.addf %26, %28 : vector<8x128xf32>
    %30 = vector.extract_strided_slice %22 {offsets = [0, 256], sizes = [8, 128], strides = [1, 1]} : vector<8x384xf32> to vector<8x128xf32>
    %31 = math.tanh %29 : vector<8x128xf32>
    %32 = arith.mulf %30, %31 : vector<8x128xf32>
    %c0_15 = arith.constant 0 : index
    %c0_16 = arith.constant 0 : index
    %c0_17 = arith.constant 0 : index
    %33 = vector.load %arg8[%c0_15, %c0_16, %c0_17] : memref<8x8x128xf32, #tpu.memory_space<vmem>>, vector<8x1x128xf32>
    %34 = vector.shape_cast %33 : vector<8x1x128xf32> to vector<8x128xf32>
    %35 = vector.shape_cast %32 : vector<8x128xf32> to vector<8x1x128xf32>
    tpu.vector_store %arg8[%c0_15, %c0_16, %c0_17], %35 {strides = array<i32>} : memref<8x8x128xf32, #tpu.memory_space<vmem>>, vector<8x1x128xf32>,
    %36 = vector.extract_strided_slice %9 {offsets = [8, 0], sizes = [8, 512], strides = [1, 1]} : vector<64x512xf32> to vector<8x512xf32>
    %37 = arith.truncf %32 : vector<8x128xf32> to vector<8x128xbf16>
    %c0_18 = arith.constant 0 : index
    %c0_19 = arith.constant 0 : index
    %38 = vector.load %arg5[%c0_18, %c0_19] : memref<128x512xbf16, #tpu.memory_space<vmem>>, vector<128x512xbf16>
    %cst_20 = arith.constant dense<0.000000e+00> : vector<8x512xf32>
    %39 = tpu.matmul %37, %38, %cst_20 {dimension_numbers = #tpu.dot_dimension_numbers<[1], [0], [0], [1], [0, 0, 1, 1], [], []>} : vector<8x128xbf16>, vector<128x512xbf16>, vector<8x512xf32> -> vector<8x512xf32>
    %40 = arith.addf %36, %39 : vector<8x512xf32>
    %41 = vector.extract_strided_slice %40 {offsets = [0, 0], sizes = [8, 384], strides = [1, 1]} : vector<8x512xf32> to vector<8x384xf32>
    %42 = arith.negf %41 : vector<8x384xf32>
    %43 = math.exp %42 : vector<8x384xf32>
    %cst_21 = arith.constant 1.000000e+00 : f32
    %44 = vector.broadcast %cst_21 : f32 to vector<8x384xf32>
    %45 = arith.addf %44, %43 : vector<8x384xf32>
    %46 = arith.divf %44, %45 : vector<8x384xf32>
    %47 = vector.extract_strided_slice %40 {offsets = [0, 384], sizes = [8, 128], strides = [1, 1]} : vector<8x512xf32> to vector<8x128xf32>
    %48 = math.tanh %47 : vector<8x128xf32>
    %49 = vector.extract_strided_slice %46 {offsets = [0, 128], sizes = [8, 128], strides = [1, 1]} : vector<8x384xf32> to vector<8x128xf32>
    %50 = arith.mulf %49, %29 : vector<8x128xf32>
    %51 = vector.extract_strided_slice %46 {offsets = [0, 0], sizes = [8, 128], strides = [1, 1]} : vector<8x384xf32> to vector<8x128xf32>
    %52 = arith.mulf %51, %48 : vector<8x128xf32>
    %53 = arith.addf %50, %52 : vector<8x128xf32>
    %54 = vector.extract_strided_slice %46 {offsets = [0, 256], sizes = [8, 128], strides = [1, 1]} : vector<8x384xf32> to vector<8x128xf32>
    %55 = math.tanh %53 : vector<8x128xf32>
    %56 = arith.mulf %54, %55 : vector<8x128xf32>
    %c0_22 = arith.constant 0 : index
    %c1 = arith.constant 1 : index
    %c0_23 = arith.constant 0 : index
    %57 = vector.load %arg8[%c0_22, %c1, %c0_23] : memref<8x8x128xf32, #tpu.memory_space<vmem>>, vector<8x1x128xf32>
    %58 = vector.shape_cast %57 : vector<8x1x128xf32> to vector<8x128xf32>
    %59 = vector.shape_cast %56 : vector<8x128xf32> to vector<8x1x128xf32>
    tpu.vector_store %arg8[%c0_22, %c1, %c0_23], %59 {strides = array<i32>} : memref<8x8x128xf32, #tpu.memory_space<vmem>>, vector<8x1x128xf32>,
    %60 = vector.extract_strided_slice %9 {offsets = [16, 0], sizes = [8, 512], strides = [1, 1]} : vector<64x512xf32> to vector<8x512xf32>
    %61 = arith.truncf %56 : vector<8x128xf32> to vector<8x128xbf16>
    %c0_24 = arith.constant 0 : index
    %c0_25 = arith.constant 0 : index
    %62 = vector.load %arg5[%c0_24, %c0_25] : memref<128x512xbf16, #tpu.memory_space<vmem>>, vector<128x512xbf16>
    %cst_26 = arith.constant dense<0.000000e+00> : vector<8x512xf32>
    %63 = tpu.matmul %61, %62, %cst_26 {dimension_numbers = #tpu.dot_dimension_numbers<[1], [0], [0], [1], [0, 0, 1, 1], [], []>} : vector<8x128xbf16>, vector<128x512xbf16>, vector<8x512xf32> -> vector<8x512xf32>
    %64 = arith.addf %60, %63 : vector<8x512xf32>
    %65 = vector.extract_strided_slice %64 {offsets = [0, 0], sizes = [8, 384], strides = [1, 1]} : vector<8x512xf32> to vector<8x384xf32>
    %66 = arith.negf %65 : vector<8x384xf32>
    %67 = math.exp %66 : vector<8x384xf32>
    %cst_27 = arith.constant 1.000000e+00 : f32
    %68 = vector.broadcast %cst_27 : f32 to vector<8x384xf32>
    %69 = arith.addf %68, %67 : vector<8x384xf32>
    %70 = arith.divf %68, %69 : vector<8x384xf32>
    %71 = vector.extract_strided_slice %64 {offsets = [0, 384], sizes = [8, 128], strides = [1, 1]} : vector<8x512xf32> to vector<8x128xf32>
    %72 = math.tanh %71 : vector<8x128xf32>
    %73 = vector.extract_strided_slice %70 {offsets = [0, 128], sizes = [8, 128], strides = [1, 1]} : vector<8x384xf32> to vector<8x128xf32>
    %74 = arith.mulf %73, %53 : vector<8x128xf32>
    %75 = vector.extract_strided_slice %70 {offsets = [0, 0], sizes = [8, 128], strides = [1, 1]} : vector<8x384xf32> to vector<8x128xf32>
    %76 = arith.mulf %75, %72 : vector<8x128xf32>
    %77 = arith.addf %74, %76 : vector<8x128xf32>
    %78 = vector.extract_strided_slice %70 {offsets = [0, 256], sizes = [8, 128], strides = [1, 1]} : vector<8x384xf32> to vector<8x128xf32>
    %79 = math.tanh %77 : vector<8x128xf32>
    %80 = arith.mulf %78, %79 : vector<8x128xf32>
    %c0_28 = arith.constant 0 : index
    %c2 = arith.constant 2 : index
    %c0_29 = arith.constant 0 : index
    %81 = vector.load %arg8[%c0_28, %c2, %c0_29] : memref<8x8x128xf32, #tpu.memory_space<vmem>>, vector<8x1x128xf32>
    %82 = vector.shape_cast %81 : vector<8x1x128xf32> to vector<8x128xf32>
    %83 = vector.shape_cast %80 : vector<8x128xf32> to vector<8x1x128xf32>
    tpu.vector_store %arg8[%c0_28, %c2, %c0_29], %83 {strides = array<i32>} : memref<8x8x128xf32, #tpu.memory_space<vmem>>, vector<8x1x128xf32>,
    %84 = vector.extract_strided_slice %9 {offsets = [24, 0], sizes = [8, 512], strides = [1, 1]} : vector<64x512xf32> to vector<8x512xf32>
    %85 = arith.truncf %80 : vector<8x128xf32> to vector<8x128xbf16>
    %c0_30 = arith.constant 0 : index
    %c0_31 = arith.constant 0 : index
    %86 = vector.load %arg5[%c0_30, %c0_31] : memref<128x512xbf16, #tpu.memory_space<vmem>>, vector<128x512xbf16>
    %cst_32 = arith.constant dense<0.000000e+00> : vector<8x512xf32>
    %87 = tpu.matmul %85, %86, %cst_32 {dimension_numbers = #tpu.dot_dimension_numbers<[1], [0], [0], [1], [0, 0, 1, 1], [], []>} : vector<8x128xbf16>, vector<128x512xbf16>, vector<8x512xf32> -> vector<8x512xf32>
    %88 = arith.addf %84, %87 : vector<8x512xf32>
    %89 = vector.extract_strided_slice %88 {offsets = [0, 0], sizes = [8, 384], strides = [1, 1]} : vector<8x512xf32> to vector<8x384xf32>
    %90 = arith.negf %89 : vector<8x384xf32>
    %91 = math.exp %90 : vector<8x384xf32>
    %cst_33 = arith.constant 1.000000e+00 : f32
    %92 = vector.broadcast %cst_33 : f32 to vector<8x384xf32>
    %93 = arith.addf %92, %91 : vector<8x384xf32>
    %94 = arith.divf %92, %93 : vector<8x384xf32>
    %95 = vector.extract_strided_slice %88 {offsets = [0, 384], sizes = [8, 128], strides = [1, 1]} : vector<8x512xf32> to vector<8x128xf32>
    %96 = math.tanh %95 : vector<8x128xf32>
    %97 = vector.extract_strided_slice %94 {offsets = [0, 128], sizes = [8, 128], strides = [1, 1]} : vector<8x384xf32> to vector<8x128xf32>
    %98 = arith.mulf %97, %77 : vector<8x128xf32>
    %99 = vector.extract_strided_slice %94 {offsets = [0, 0], sizes = [8, 128], strides = [1, 1]} : vector<8x384xf32> to vector<8x128xf32>
    %100 = arith.mulf %99, %96 : vector<8x128xf32>
    %101 = arith.addf %98, %100 : vector<8x128xf32>
    %102 = vector.extract_strided_slice %94 {offsets = [0, 256], sizes = [8, 128], strides = [1, 1]} : vector<8x384xf32> to vector<8x128xf32>
    %103 = math.tanh %101 : vector<8x128xf32>
    %104 = arith.mulf %102, %103 : vector<8x128xf32>
    %c0_34 = arith.constant 0 : index
    %c3 = arith.constant 3 : index
    %c0_35 = arith.constant 0 : index
    %105 = vector.load %arg8[%c0_34, %c3, %c0_35] : memref<8x8x128xf32, #tpu.memory_space<vmem>>, vector<8x1x128xf32>
    %106 = vector.shape_cast %105 : vector<8x1x128xf32> to vector<8x128xf32>
    %107 = vector.shape_cast %104 : vector<8x128xf32> to vector<8x1x128xf32>
    tpu.vector_store %arg8[%c0_34, %c3, %c0_35], %107 {strides = array<i32>} : memref<8x8x128xf32, #tpu.memory_space<vmem>>, vector<8x1x128xf32>,
    %108 = vector.extract_strided_slice %9 {offsets = [32, 0], sizes = [8, 512], strides = [1, 1]} : vector<64x512xf32> to vector<8x512xf32>
    %109 = arith.truncf %104 : vector<8x128xf32> to vector<8x128xbf16>
    %c0_36 = arith.constant 0 : index
    %c0_37 = arith.constant 0 : index
    %110 = vector.load %arg5[%c0_36, %c0_37] : memref<128x512xbf16, #tpu.memory_space<vmem>>, vector<128x512xbf16>
    %cst_38 = arith.constant dense<0.000000e+00> : vector<8x512xf32>
    %111 = tpu.matmul %109, %110, %cst_38 {dimension_numbers = #tpu.dot_dimension_numbers<[1], [0], [0], [1], [0, 0, 1, 1], [], []>} : vector<8x128xbf16>, vector<128x512xbf16>, vector<8x512xf32> -> vector<8x512xf32>
    %112 = arith.addf %108, %111 : vector<8x512xf32>
    %113 = vector.extract_strided_slice %112 {offsets = [0, 0], sizes = [8, 384], strides = [1, 1]} : vector<8x512xf32> to vector<8x384xf32>
    %114 = arith.negf %113 : vector<8x384xf32>
    %115 = math.exp %114 : vector<8x384xf32>
    %cst_39 = arith.constant 1.000000e+00 : f32
    %116 = vector.broadcast %cst_39 : f32 to vector<8x384xf32>
    %117 = arith.addf %116, %115 : vector<8x384xf32>
    %118 = arith.divf %116, %117 : vector<8x384xf32>
    %119 = vector.extract_strided_slice %112 {offsets = [0, 384], sizes = [8, 128], strides = [1, 1]} : vector<8x512xf32> to vector<8x128xf32>
    %120 = math.tanh %119 : vector<8x128xf32>
    %121 = vector.extract_strided_slice %118 {offsets = [0, 128], sizes = [8, 128], strides = [1, 1]} : vector<8x384xf32> to vector<8x128xf32>
    %122 = arith.mulf %121, %101 : vector<8x128xf32>
    %123 = vector.extract_strided_slice %118 {offsets = [0, 0], sizes = [8, 128], strides = [1, 1]} : vector<8x384xf32> to vector<8x128xf32>
    %124 = arith.mulf %123, %120 : vector<8x128xf32>
    %125 = arith.addf %122, %124 : vector<8x128xf32>
    %126 = vector.extract_strided_slice %118 {offsets = [0, 256], sizes = [8, 128], strides = [1, 1]} : vector<8x384xf32> to vector<8x128xf32>
    %127 = math.tanh %125 : vector<8x128xf32>
    %128 = arith.mulf %126, %127 : vector<8x128xf32>
    %c0_40 = arith.constant 0 : index
    %c4 = arith.constant 4 : index
    %c0_41 = arith.constant 0 : index
    %129 = vector.load %arg8[%c0_40, %c4, %c0_41] : memref<8x8x128xf32, #tpu.memory_space<vmem>>, vector<8x1x128xf32>
    %130 = vector.shape_cast %129 : vector<8x1x128xf32> to vector<8x128xf32>
    %131 = vector.shape_cast %128 : vector<8x128xf32> to vector<8x1x128xf32>
    tpu.vector_store %arg8[%c0_40, %c4, %c0_41], %131 {strides = array<i32>} : memref<8x8x128xf32, #tpu.memory_space<vmem>>, vector<8x1x128xf32>,
    %132 = vector.extract_strided_slice %9 {offsets = [40, 0], sizes = [8, 512], strides = [1, 1]} : vector<64x512xf32> to vector<8x512xf32>
    %133 = arith.truncf %128 : vector<8x128xf32> to vector<8x128xbf16>
    %c0_42 = arith.constant 0 : index
    %c0_43 = arith.constant 0 : index
    %134 = vector.load %arg5[%c0_42, %c0_43] : memref<128x512xbf16, #tpu.memory_space<vmem>>, vector<128x512xbf16>
    %cst_44 = arith.constant dense<0.000000e+00> : vector<8x512xf32>
    %135 = tpu.matmul %133, %134, %cst_44 {dimension_numbers = #tpu.dot_dimension_numbers<[1], [0], [0], [1], [0, 0, 1, 1], [], []>} : vector<8x128xbf16>, vector<128x512xbf16>, vector<8x512xf32> -> vector<8x512xf32>
    %136 = arith.addf %132, %135 : vector<8x512xf32>
    %137 = vector.extract_strided_slice %136 {offsets = [0, 0], sizes = [8, 384], strides = [1, 1]} : vector<8x512xf32> to vector<8x384xf32>
    %138 = arith.negf %137 : vector<8x384xf32>
    %139 = math.exp %138 : vector<8x384xf32>
    %cst_45 = arith.constant 1.000000e+00 : f32
    %140 = vector.broadcast %cst_45 : f32 to vector<8x384xf32>
    %141 = arith.addf %140, %139 : vector<8x384xf32>
    %142 = arith.divf %140, %141 : vector<8x384xf32>
    %143 = vector.extract_strided_slice %136 {offsets = [0, 384], sizes = [8, 128], strides = [1, 1]} : vector<8x512xf32> to vector<8x128xf32>
    %144 = math.tanh %143 : vector<8x128xf32>
    %145 = vector.extract_strided_slice %142 {offsets = [0, 128], sizes = [8, 128], strides = [1, 1]} : vector<8x384xf32> to vector<8x128xf32>
    %146 = arith.mulf %145, %125 : vector<8x128xf32>
    %147 = vector.extract_strided_slice %142 {offsets = [0, 0], sizes = [8, 128], strides = [1, 1]} : vector<8x384xf32> to vector<8x128xf32>
    %148 = arith.mulf %147, %144 : vector<8x128xf32>
    %149 = arith.addf %146, %148 : vector<8x128xf32>
    %150 = vector.extract_strided_slice %142 {offsets = [0, 256], sizes = [8, 128], strides = [1, 1]} : vector<8x384xf32> to vector<8x128xf32>
    %151 = math.tanh %149 : vector<8x128xf32>
    %152 = arith.mulf %150, %151 : vector<8x128xf32>
    %c0_46 = arith.constant 0 : index
    %c5 = arith.constant 5 : index
    %c0_47 = arith.constant 0 : index
    %153 = vector.load %arg8[%c0_46, %c5, %c0_47] : memref<8x8x128xf32, #tpu.memory_space<vmem>>, vector<8x1x128xf32>
    %154 = vector.shape_cast %153 : vector<8x1x128xf32> to vector<8x128xf32>
    %155 = vector.shape_cast %152 : vector<8x128xf32> to vector<8x1x128xf32>
    tpu.vector_store %arg8[%c0_46, %c5, %c0_47], %155 {strides = array<i32>} : memref<8x8x128xf32, #tpu.memory_space<vmem>>, vector<8x1x128xf32>,
    %156 = vector.extract_strided_slice %9 {offsets = [48, 0], sizes = [8, 512], strides = [1, 1]} : vector<64x512xf32> to vector<8x512xf32>
    %157 = arith.truncf %152 : vector<8x128xf32> to vector<8x128xbf16>
    %c0_48 = arith.constant 0 : index
    %c0_49 = arith.constant 0 : index
    %158 = vector.load %arg5[%c0_48, %c0_49] : memref<128x512xbf16, #tpu.memory_space<vmem>>, vector<128x512xbf16>
    %cst_50 = arith.constant dense<0.000000e+00> : vector<8x512xf32>
    %159 = tpu.matmul %157, %158, %cst_50 {dimension_numbers = #tpu.dot_dimension_numbers<[1], [0], [0], [1], [0, 0, 1, 1], [], []>} : vector<8x128xbf16>, vector<128x512xbf16>, vector<8x512xf32> -> vector<8x512xf32>
    %160 = arith.addf %156, %159 : vector<8x512xf32>
    %161 = vector.extract_strided_slice %160 {offsets = [0, 0], sizes = [8, 384], strides = [1, 1]} : vector<8x512xf32> to vector<8x384xf32>
    %162 = arith.negf %161 : vector<8x384xf32>
    %163 = math.exp %162 : vector<8x384xf32>
    %cst_51 = arith.constant 1.000000e+00 : f32
    %164 = vector.broadcast %cst_51 : f32 to vector<8x384xf32>
    %165 = arith.addf %164, %163 : vector<8x384xf32>
    %166 = arith.divf %164, %165 : vector<8x384xf32>
    %167 = vector.extract_strided_slice %160 {offsets = [0, 384], sizes = [8, 128], strides = [1, 1]} : vector<8x512xf32> to vector<8x128xf32>
    %168 = math.tanh %167 : vector<8x128xf32>
    %169 = vector.extract_strided_slice %166 {offsets = [0, 128], sizes = [8, 128], strides = [1, 1]} : vector<8x384xf32> to vector<8x128xf32>
    %170 = arith.mulf %169, %149 : vector<8x128xf32>
    %171 = vector.extract_strided_slice %166 {offsets = [0, 0], sizes = [8, 128], strides = [1, 1]} : vector<8x384xf32> to vector<8x128xf32>
    %172 = arith.mulf %171, %168 : vector<8x128xf32>
    %173 = arith.addf %170, %172 : vector<8x128xf32>
    %174 = vector.extract_strided_slice %166 {offsets = [0, 256], sizes = [8, 128], strides = [1, 1]} : vector<8x384xf32> to vector<8x128xf32>
    %175 = math.tanh %173 : vector<8x128xf32>
    %176 = arith.mulf %174, %175 : vector<8x128xf32>
    %c0_52 = arith.constant 0 : index
    %c6 = arith.constant 6 : index
    %c0_53 = arith.constant 0 : index
    %177 = vector.load %arg8[%c0_52, %c6, %c0_53] : memref<8x8x128xf32, #tpu.memory_space<vmem>>, vector<8x1x128xf32>
    %178 = vector.shape_cast %177 : vector<8x1x128xf32> to vector<8x128xf32>
    %179 = vector.shape_cast %176 : vector<8x128xf32> to vector<8x1x128xf32>
    tpu.vector_store %arg8[%c0_52, %c6, %c0_53], %179 {strides = array<i32>} : memref<8x8x128xf32, #tpu.memory_space<vmem>>, vector<8x1x128xf32>,
    %180 = vector.extract_strided_slice %9 {offsets = [56, 0], sizes = [8, 512], strides = [1, 1]} : vector<64x512xf32> to vector<8x512xf32>
    %181 = arith.truncf %176 : vector<8x128xf32> to vector<8x128xbf16>
    %c0_54 = arith.constant 0 : index
    %c0_55 = arith.constant 0 : index
    %182 = vector.load %arg5[%c0_54, %c0_55] : memref<128x512xbf16, #tpu.memory_space<vmem>>, vector<128x512xbf16>
    %cst_56 = arith.constant dense<0.000000e+00> : vector<8x512xf32>
    %183 = tpu.matmul %181, %182, %cst_56 {dimension_numbers = #tpu.dot_dimension_numbers<[1], [0], [0], [1], [0, 0, 1, 1], [], []>} : vector<8x128xbf16>, vector<128x512xbf16>, vector<8x512xf32> -> vector<8x512xf32>
    %184 = arith.addf %180, %183 : vector<8x512xf32>
    %185 = vector.extract_strided_slice %184 {offsets = [0, 0], sizes = [8, 384], strides = [1, 1]} : vector<8x512xf32> to vector<8x384xf32>
    %186 = arith.negf %185 : vector<8x384xf32>
    %187 = math.exp %186 : vector<8x384xf32>
    %cst_57 = arith.constant 1.000000e+00 : f32
    %188 = vector.broadcast %cst_57 : f32 to vector<8x384xf32>
    %189 = arith.addf %188, %187 : vector<8x384xf32>
    %190 = arith.divf %188, %189 : vector<8x384xf32>
    %191 = vector.extract_strided_slice %184 {offsets = [0, 384], sizes = [8, 128], strides = [1, 1]} : vector<8x512xf32> to vector<8x128xf32>
    %192 = math.tanh %191 : vector<8x128xf32>
    %193 = vector.extract_strided_slice %190 {offsets = [0, 128], sizes = [8, 128], strides = [1, 1]} : vector<8x384xf32> to vector<8x128xf32>
    %194 = arith.mulf %193, %173 : vector<8x128xf32>
    %195 = vector.extract_strided_slice %190 {offsets = [0, 0], sizes = [8, 128], strides = [1, 1]} : vector<8x384xf32> to vector<8x128xf32>
    %196 = arith.mulf %195, %192 : vector<8x128xf32>
    %197 = arith.addf %194, %196 : vector<8x128xf32>
    %198 = vector.extract_strided_slice %190 {offsets = [0, 256], sizes = [8, 128], strides = [1, 1]} : vector<8x384xf32> to vector<8x128xf32>
    %199 = math.tanh %197 : vector<8x128xf32>
    %200 = arith.mulf %198, %199 : vector<8x128xf32>
    %c0_58 = arith.constant 0 : index
    %c7 = arith.constant 7 : index
    %c0_59 = arith.constant 0 : index
    %201 = vector.load %arg8[%c0_58, %c7, %c0_59] : memref<8x8x128xf32, #tpu.memory_space<vmem>>, vector<8x1x128xf32>
    %202 = vector.shape_cast %201 : vector<8x1x128xf32> to vector<8x128xf32>
    %203 = vector.shape_cast %200 : vector<8x128xf32> to vector<8x1x128xf32>
    tpu.vector_store %arg8[%c0_58, %c7, %c0_59], %203 {strides = array<i32>} : memref<8x8x128xf32, #tpu.memory_space<vmem>>, vector<8x1x128xf32>,
    %c0_60 = arith.constant 0 : index
    %c0_61 = arith.constant 0 : index
    %204 = vector.load %arg11[%c0_60, %c0_61] : memref<8x128xf32, #tpu.memory_space<vmem>>, vector<8x128xf32>
    tpu.vector_store %arg11[%c0_60, %c0_61], %200 {strides = array<i32>} : memref<8x128xf32, #tpu.memory_space<vmem>>, vector<8x128xf32>,
    %c0_62 = arith.constant 0 : index
    %c0_63 = arith.constant 0 : index
    %205 = vector.load %arg12[%c0_62, %c0_63] : memref<8x128xf32, #tpu.memory_space<vmem>>, vector<8x128xf32>
    tpu.vector_store %arg12[%c0_62, %c0_63], %197 {strides = array<i32>} : memref<8x128xf32, #tpu.memory_space<vmem>>, vector<8x128xf32>,
    %c0_i32_64 = arith.constant 0 : i32
    %206 = arith.cmpi eq, %arg1, %c0_i32_64 : i32
    %207 = arith.extui %206 : i1 to i32
    %c0_i32_65 = arith.constant 0 : i32
    %208 = arith.cmpi ne, %207, %c0_i32_65 : i32
    scf.if %208 {
      %c0_66 = arith.constant 0 : index
      %c0_67 = arith.constant 0 : index
      %209 = vector.load %arg9[%c0_66, %c0_67] : memref<8x128xf32, #tpu.memory_space<vmem>>, vector<8x128xf32>
      tpu.vector_store %arg9[%c0_66, %c0_67], %200 {strides = array<i32>} : memref<8x128xf32, #tpu.memory_space<vmem>>, vector<8x128xf32>,
      %c0_68 = arith.constant 0 : index
      %c0_69 = arith.constant 0 : index
      %210 = vector.load %arg10[%c0_68, %c0_69] : memref<8x128xf32, #tpu.memory_space<vmem>>, vector<8x128xf32>
      tpu.vector_store %arg10[%c0_68, %c0_69], %197 {strides = array<i32>} : memref<8x128xf32, #tpu.memory_space<vmem>>, vector<8x128xf32>,
    } else {
    }
    return
  }
  func.func @transform_0(%arg0: i32, %arg1: i32) -> (i32, i32, i32) {
    %c0_i32 = arith.constant 0 : i32
    %c0_i32_0 = arith.constant 0 : i32
    return %arg1, %arg0, %c0_i32 : i32, i32, i32
  }
  func.func @transform_1(%arg0: i32, %arg1: i32) -> (i32, i32) {
    %c0_i32 = arith.constant 0 : i32
    %c0_i32_0 = arith.constant 0 : i32
    %c0_i32_1 = arith.constant 0 : i32
    return %c0_i32, %c0_i32_0 : i32, i32
  }
  func.func @transform_2(%arg0: i32, %arg1: i32) -> (i32, i32) {
    %c0_i32 = arith.constant 0 : i32
    %c0_i32_0 = arith.constant 0 : i32
    %c0_i32_1 = arith.constant 0 : i32
    return %c0_i32, %c0_i32_0 : i32, i32
  }
  func.func @transform_3(%arg0: i32, %arg1: i32) -> (i32, i32) {
    %c0_i32 = arith.constant 0 : i32
    %c0_i32_0 = arith.constant 0 : i32
    %c0_i32_1 = arith.constant 0 : i32
    return %c0_i32, %c0_i32_0 : i32, i32
  }
  func.func @transform_4(%arg0: i32, %arg1: i32) -> (i32, i32) {
    %c0_i32 = arith.constant 0 : i32
    %c0_i32_0 = arith.constant 0 : i32
    return %arg0, %c0_i32 : i32, i32
  }
  func.func @transform_5(%arg0: i32, %arg1: i32) -> (i32, i32) {
    %c0_i32 = arith.constant 0 : i32
    %c0_i32_0 = arith.constant 0 : i32
    return %arg0, %c0_i32 : i32, i32
  }
  func.func @transform_6(%arg0: i32, %arg1: i32) -> (i32, i32, i32) {
    %c0_i32 = arith.constant 0 : i32
    %c0_i32_0 = arith.constant 0 : i32
    return %arg0, %arg1, %c0_i32 : i32, i32, i32
  }
  func.func @transform_7(%arg0: i32, %arg1: i32) -> (i32, i32) {
    %c0_i32 = arith.constant 0 : i32
    %c0_i32_0 = arith.constant 0 : i32
    return %arg0, %c0_i32 : i32, i32
  }
  func.func @transform_8(%arg0: i32, %arg1: i32) -> (i32, i32) {
    %c0_i32 = arith.constant 0 : i32
    %c0_i32_0 = arith.constant 0 : i32
    return %arg0, %c0_i32 : i32, i32
  }
}

</mosaic_0001>

<bundles_post_ra>
// kernel: seq2seq_forward.5
= control target key start
LH: loop header
LB: loop body
LE: loop exit
PB: predicated region body
PF: predicated region fallthrough
CT: control target
= control target key end

     0   :  { %v403_v2 = vmov 0   ;;  %s493_s0 = inlined_call_operand.vmem [shape: bf16[64,128], index: 0, kind: input, shape index: {}]   ;;  %s494_s1 = inlined_call_operand.vmem [shape: bf16[128,256], index: 1, kind: input, shape index: {}]   ;;  %s495_s2 = inlined_call_operand.vmem [shape: f32[1,256], index: 2, kind: input, shape index: {}]   ;;  %s496_s3 = inlined_call_operand.hbm [shape: f32[64,256], index: 3, kind: output, shape index: {}]  }
   0x1   :  { %v353_v0 = vld [vmem:[%s494_s1 + $0x74] ss:$8 sps:$4 sm:$0xff]   ;;  %v355_v1 = vld [vmem:[%s494_s1 + $0x70] ss:$8 sps:$4 sm:$0xff]   ;;  %224 = vmatprep.mubr.bf16.mxu0 %v403_v2  ;;  %244 = vmatprep.mubr.bf16.mxu1 %v403_v2  ;;  %v356_v3 = vld [vmem:[%s494_s1 + $0x64] ss:$8 sps:$4 sm:$0xff]  }
   0x2   :  { %192 = vmatprep.subr.bf16.mxu0 %v353_v0  ;;  %333 = vmatprep.subr.bf16.mxu1 %v353_v0  ;;  %v358_v4 = vld [vmem:[%s494_s1 + $0x60] ss:$8 sps:$4 sm:$0xff]   ;;  %v359_v5 = vld [vmem:[%s494_s1 + $0x54] ss:$8 sps:$4 sm:$0xff]   ;;  %v361_v6 = vld [vmem:[%s494_s1 + $0x50] ss:$8 sps:$4 sm:$0xff]  }
   0x3   :  { %193 = vmatpush1.bf16.msra.mxu0 %v355_v1  ;;  %341 = vmatpush1.bf16.msra.mxu1 %v355_v1  ;;  %v362_v7 = vld [vmem:[%s494_s1 + $0x44] ss:$8 sps:$4 sm:$0xff]   ;;  %v364_v8 = vld [vmem:[%s494_s1 + $0x40] ss:$8 sps:$4 sm:$0xff]   ;;  %v365_v9 = vld [vmem:[%s494_s1 + $0x34] ss:$8 sps:$4 sm:$0xff]  }
   0x4   :  { %194 = vmatprep.subr.bf16.mxu0 %v356_v3  ;;  %334 = vmatprep.subr.bf16.mxu1 %v356_v3  ;;  %v367_v10 = vld [vmem:[%s494_s1 + $0x30] ss:$8 sps:$4 sm:$0xff]  }
   0x7   :  { %195 = vmatpush1.bf16.msra.mxu0 %v358_v4  ;;  %342 = vmatpush1.bf16.msra.mxu1 %v358_v4 }
   0x8   :  { %196 = vmatprep.subr.bf16.mxu0 %v359_v5  ;;  %335 = vmatprep.subr.bf16.mxu1 %v359_v5 }
   0xb   :  { %197 = vmatpush1.bf16.msra.mxu0 %v361_v6  ;;  %343 = vmatpush1.bf16.msra.mxu1 %v361_v6 }
   0xc   :  { %198 = vmatprep.subr.bf16.mxu0 %v362_v7  ;;  %336 = vmatprep.subr.bf16.mxu1 %v362_v7 }
   0xf   :  { %199 = vmatpush1.bf16.msra.mxu0 %v364_v8  ;;  %344 = vmatpush1.bf16.msra.mxu1 %v364_v8 }
  0x10   :  { %8 = vsyncpa [#allocation3], 0  ;;  %200 = vmatprep.subr.bf16.mxu0 %v365_v9  ;;  %337 = vmatprep.subr.bf16.mxu1 %v365_v9  ;;  %v368_v11 = vld [vmem:[%s494_s1 + $0x24] ss:$8 sps:$4 sm:$0xff]   ;;  %v370_v12 = vld [vmem:[%s494_s1 + $0x20] ss:$8 sps:$4 sm:$0xff]   ;;  %v22_v21 = vlaneseq }
  0x11   :  { %v371_v13 = vld [vmem:[%s494_s1 + $0x14] ss:$8 sps:$4 sm:$0xff]   ;;  %v373_v14 = vld [vmem:[%s494_s1 + $0x10] ss:$8 sps:$4 sm:$0xff]   ;;  %v374_v15 = vld [vmem:[%s494_s1 + $0x4] ss:$8 sps:$4 sm:$0xff]  }
  0x12   :  { %v376_v16 = vld [vmem:[%s494_s1] ss:$8 sps:$4 sm:$0xff]   ;;  %v378_v18 = vld [vmem:[%s493_s0 + $0x10] sm:$0xff]   ;;  %v380_v20 = vld [vmem:[%s493_s0 + $0x18] sm:$0xff]   ;;  %v23_v22 = vshrl.u32 %v22_v21, 7 }
  0x13   :  { %201 = vmatpush1.bf16.msra.mxu0 %v367_v10  ;;  %345 = vmatpush1.bf16.msra.mxu1 %v367_v10  ;;  %v377_v17 = vld [vmem:[%s493_s0] sm:$0xff]   ;;  %v379_v19 = vld [vmem:[%s493_s0 + $0x8] sm:$0xff]   ;;  %s404_s0 = smov [#allocation2]  }
  0x14   :  { %202 = vmatprep.subr.bf16.mxu0 %v368_v11  ;;  %338 = vmatprep.subr.bf16.mxu1 %v368_v11  ;;  %v24_v23 = vsub.s32 0, %v23_v22  ;;  %v20_v24 = vld [vmem:[%s495_s2] sm:$0x3]  ;;  %v28_v25 = vsub.s32 1, %v23_v22  ;;  %s302_s2 = sshll.u32 %s404_s0, 4  ;;  %s303_s2 = int_to_ptr.vmem [resolvable:$true] %s302_s2 }
  0x15   :  { %s381_s26 = scalar_lea.vmem %s303_s2, 2048  ;;  %p386_p1 = scmp.lt.s32.totalorder %s303_s2, %s303_s2 }
  0x16   :  { %v25_v26 = vrot.slane %v20_v24, %v24_v23  ;;  %v29_v27 = vrot.slane %v20_v24, %v28_v25  ;;  %p382_p0 = scmp.ne.s32.totalorder %s303_s2, %s381_s26  ;;  %p387_p2 = scmp.lt.s32.totalorder %s381_s26, %s381_s26 }
  0x17   :  { %203 = vmatpush1.bf16.msra.mxu0 %v370_v12  ;;  %346 = vmatpush1.bf16.msra.mxu1 %v370_v12 }
  0x18   :  { %204 = vmatprep.subr.bf16.mxu0 %v371_v13  ;;  %339 = vmatprep.subr.bf16.mxu1 %v371_v13  ;;  %p388_p3 = por %p387_p2, %p386_p1 }
  0x1a   :  { %p389_p4 = pnand %p388_p3, %p382_p0 }
  0x1b   :  { %205 = vmatpush1.bf16.msra.mxu0 %v373_v14  ;;  %347 = vmatpush1.bf16.msra.mxu1 %v373_v14 }
  0x1c   :  { %206 = vmatprep.subr.bf16.mxu0 %v374_v15  ;;  %340 = vmatprep.subr.bf16.mxu1 %v374_v15 }
  0x1f   :  { %207 = vmatpush1.bf16.msra.mxu0 %v376_v16  ;;  %348 = vmatpush1.bf16.msra.mxu1 %v376_v16 }
  0x22   :  { %225 = vmatmul.mubr.bf16.vlgmr.msra.gmra.mxu0 %v377_v17  ;;  %245 = vmatmul.mubr.bf16.vlgmr.msra.gmra.mxu1 %v378_v18 }
  0x23   :  { %234 = vmatprep.mubr.bf16.mxu0 %v403_v2  ;;  %254 = vmatprep.mubr.bf16.mxu1 %v403_v2 }
  0x2a   :  { %235 = vmatmul.mubr.bf16.gmra.mxu0 %v379_v19  ;;  %255 = vmatmul.mubr.bf16.gmra.mxu1 %v380_v20 }
  0xe2   :  { %v226_v28 = vpop.f32.mrf.mxu0  ;;  %v246_v29 = vpop.f32.mrf.mxu1 }
  0xe3   :  { %v265_v30 = vadd.f32 %v226_v28, %v25_v26  ;;  %v273_v31 = vadd.f32 %v246_v29, %v25_v26 }
  0xe4   :  { %v228_v32 = vpop.f32.mrf.mxu0  ;;  %v248_v33 = vpop.f32.mrf.mxu1 }
  0xe5   :  { %281 = vst [vmem:[#allocation2] sm:$0xff] %v265_v30  ;;  %289 = vst [vmem:[#allocation2 + $0x40] sm:$0xff] %v273_v31  ;;  %v266_v34 = vadd.f32 %v228_v32, %v29_v27  ;;  %v274_v35 = vadd.f32 %v248_v33, %v29_v27 }
  0xe6   :  { %v230_v36 = vpop.f32.mrf.mxu0  ;;  %v250_v37 = vpop.f32.mrf.mxu1 }
  0xe7   :  { %282 = vst [vmem:[#allocation2 + $0x8] sm:$0xff] %v266_v34  ;;  %290 = vst [vmem:[#allocation2 + $0x48] sm:$0xff] %v274_v35  ;;  %v267_v38 = vadd.f32 %v230_v36, %v25_v26  ;;  %v275_v39 = vadd.f32 %v250_v37, %v25_v26 }
  0xe8   :  { %v232_v40 = vpop.f32.mrf.mxu0  ;;  %v252_v41 = vpop.f32.mrf.mxu1 }
  0xe9   :  { %283 = vst [vmem:[#allocation2 + $0x10] sm:$0xff] %v267_v38  ;;  %291 = vst [vmem:[#allocation2 + $0x50] sm:$0xff] %v275_v39  ;;  %v268_v42 = vadd.f32 %v232_v40, %v29_v27  ;;  %v276_v43 = vadd.f32 %v252_v41, %v29_v27 }
  0xea   :  { %v236_v44 = vpop.f32.mrf.mxu0  ;;  %v256_v45 = vpop.f32.mrf.mxu1 }
  0xeb   :  { %284 = vst [vmem:[#allocation2 + $0x18] sm:$0xff] %v268_v42  ;;  %292 = vst [vmem:[#allocation2 + $0x58] sm:$0xff] %v276_v43  ;;  %v269_v46 = vadd.f32 %v236_v44, %v25_v26  ;;  %v277_v47 = vadd.f32 %v256_v45, %v25_v26 }
  0xec   :  { %v238_v48 = vpop.f32.mrf.mxu0  ;;  %v258_v49 = vpop.f32.mrf.mxu1 }
  0xed   :  { %285 = vst [vmem:[#allocation2 + $0x20] sm:$0xff] %v269_v46  ;;  %293 = vst [vmem:[#allocation2 + $0x60] sm:$0xff] %v277_v47  ;;  %v270_v50 = vadd.f32 %v238_v48, %v29_v27  ;;  %v278_v51 = vadd.f32 %v258_v49, %v29_v27 }
  0xee   :  { %v240_v52 = vpop.f32.mrf.mxu0  ;;  %v260_v53 = vpop.f32.mrf.mxu1 }
  0xef   :  { %286 = vst [vmem:[#allocation2 + $0x28] sm:$0xff] %v270_v50  ;;  %294 = vst [vmem:[#allocation2 + $0x68] sm:$0xff] %v278_v51  ;;  %v271_v54 = vadd.f32 %v240_v52, %v25_v26  ;;  %v279_v55 = vadd.f32 %v260_v53, %v25_v26 }
  0xf0   :  { %v242_v56 = vpop.f32.mrf.mxu0  ;;  %v262_v57 = vpop.f32.mrf.mxu1 }
  0xf1   :  { %287 = vst [vmem:[#allocation2 + $0x30] sm:$0xff] %v271_v54  ;;  %295 = vst [vmem:[#allocation2 + $0x70] sm:$0xff] %v279_v55  ;;  %v272_v58 = vadd.f32 %v242_v56, %v29_v27  ;;  %v280_v59 = vadd.f32 %v262_v57, %v29_v27 }
  0xf3   :  { %288 = vst [vmem:[#allocation2 + $0x38] sm:$0xff] %v272_v58  ;;  %296 = vst [vmem:[#allocation2 + $0x78] sm:$0xff] %v280_v59 }
  0xf4   :  { %392 = shalt.err (!%p389_p4)
}
  0xf5   :  { %s405_s27 = smov 256   ;;  %s406_s28 = smov 16  }
  0xf6   :  { %308 = dma.vmem_to_hbm [thread:$0]  %s303_s2, 2048, %s496_s3, [#allocation3], %s405_s27, %s405_s27, %s406_s28  }
  0xf7   :  { %401 = dma.done.wait [#allocation3], 2048  }
  0xf8   :  { %402 = vsyncadd [#allocation3], 4294965248 }
  0xf9   :  { %312 = vsyncpa [#allocation3], 1 }

// kernel: seq2seq_forward.3
= control target key start
LH: loop header
LB: loop body
LE: loop exit
PB: predicated region body
PF: predicated region fallthrough
CT: control target
= control target key end

     0   :  { %v2758_v1 = vmov 0   ;;  %s2750_s1 = inlined_call_operand.vmem [shape: bf16[128,512], index: 1, kind: input, shape index: {}]   ;;  %s2751_s0 = inlined_call_operand.vmem [shape: bf16[8,8,128], index: 0, kind: input, shape index: {}]   ;;  %s2752_s3 = inlined_call_operand.vmem [shape: bf16[128,512], index: 3, kind: input, shape index: {}]   ;;  %s2753_s4 = inlined_call_operand.vmem [shape: f32[8,128], index: 4, kind: input, shape index: {}, may-alias: {4,5}]   ;;  %s2754_s2 = inlined_call_operand.vmem [shape: f32[1,512], index: 2, kind: input, shape index: {}]   ;;  %s2755_s5 = inlined_call_operand.vmem [shape: f32[8,128], index: 5, kind: input, shape index: {}, may-alias: {4,5}]   ;;  %s2756_s7 = inlined_call_operand.vmem [shape: f32[8,128], index: 7, kind: output, shape index: {1}]   ;;  %s2757_s6 = inlined_call_operand.vmem [shape: f32[8,128], index: 6, kind: output, shape index: {0}]  }
   0x1   :  { %v1616_v0 = vld [vmem:[%s2750_s1 + $0xe4] ss:$16 sps:$4 sm:$0xff]   ;;  %312 = vmatprep.mubr.bf16.mxu0 %v2758_v1  ;;  %385 = vmatprep.mubr.bf16.mxu1 %v2758_v1  ;;  %v1618_v2 = vld [vmem:[%s2750_s1 + $0xec] ss:$16 sps:$4 sm:$0xff]   ;;  %v1620_v3 = vld [vmem:[%s2750_s1 + $0xe0] ss:$16 sps:$4 sm:$0xff]  }
   0x2   :  { %280 = vmatprep.subr.bf16.mxu0 %v1616_v0  ;;  %v1621_v4 = vld [vmem:[%s2750_s1 + $0xe8] ss:$16 sps:$4 sm:$0xff]   ;;  %353 = vmatprep.subr.bf16.mxu1 %v1618_v2  ;;  %v1622_v5 = vld [vmem:[%s2750_s1 + $0xc4] ss:$16 sps:$4 sm:$0xff]   ;;  %v1624_v6 = vld [vmem:[%s2750_s1 + $0xcc] ss:$16 sps:$4 sm:$0xff]  }
   0x3   :  { %281 = vmatpush1.bf16.msra.mxu0 %v1620_v3  ;;  %354 = vmatpush1.bf16.msra.mxu1 %v1621_v4  ;;  %v1626_v7 = vld [vmem:[%s2750_s1 + $0xc0] ss:$16 sps:$4 sm:$0xff]   ;;  %v1627_v8 = vld [vmem:[%s2750_s1 + $0xc8] ss:$16 sps:$4 sm:$0xff]   ;;  %v1628_v9 = vld [vmem:[%s2750_s1 + $0xa4] ss:$16 sps:$4 sm:$0xff]  }
   0x4   :  { %282 = vmatprep.subr.bf16.mxu0 %v1622_v5  ;;  %355 = vmatprep.subr.bf16.mxu1 %v1624_v6  ;;  %v1630_v10 = vld [vmem:[%s2750_s1 + $0xac] ss:$16 sps:$4 sm:$0xff]   ;;  %v1632_v11 = vld [vmem:[%s2750_s1 + $0xa0] ss:$16 sps:$4 sm:$0xff]   ;;  %v1633_v12 = vld [vmem:[%s2750_s1 + $0xa8] ss:$16 sps:$4 sm:$0xff]  }
   0x5   :  { %v1634_v13 = vld [vmem:[%s2750_s1 + $0x84] ss:$16 sps:$4 sm:$0xff]   ;;  %v1636_v14 = vld [vmem:[%s2750_s1 + $0x8c] ss:$16 sps:$4 sm:$0xff]   ;;  %v1638_v15 = vld [vmem:[%s2750_s1 + $0x80] ss:$16 sps:$4 sm:$0xff]  }
   0x6   :  { %v1639_v16 = vld [vmem:[%s2750_s1 + $0x88] ss:$16 sps:$4 sm:$0xff]   ;;  %v1640_v17 = vld [vmem:[%s2750_s1 + $0x64] ss:$16 sps:$4 sm:$0xff]   ;;  %v1642_v18 = vld [vmem:[%s2750_s1 + $0x6c] ss:$16 sps:$4 sm:$0xff]  }
   0x7   :  { %283 = vmatpush1.bf16.msra.mxu0 %v1626_v7  ;;  %356 = vmatpush1.bf16.msra.mxu1 %v1627_v8  ;;  %v1644_v19 = vld [vmem:[%s2750_s1 + $0x60] ss:$16 sps:$4 sm:$0xff]   ;;  %v1645_v20 = vld [vmem:[%s2750_s1 + $0x68] ss:$16 sps:$4 sm:$0xff]   ;;  %v1646_v21 = vld [vmem:[%s2750_s1 + $0x44] ss:$16 sps:$4 sm:$0xff]   ;;  %v76_v8 = vlaneseq }
   0x8   :  { %284 = vmatprep.subr.bf16.mxu0 %v1628_v9  ;;  %357 = vmatprep.subr.bf16.mxu1 %v1630_v10  ;;  %v1648_v22 = vld [vmem:[%s2750_s1 + $0x4c] ss:$16 sps:$4 sm:$0xff]   ;;  %v1650_v23 = vld [vmem:[%s2750_s1 + $0x40] ss:$16 sps:$4 sm:$0xff]   ;;  %v1651_v24 = vld [vmem:[%s2750_s1 + $0x48] ss:$16 sps:$4 sm:$0xff]  }
   0x9   :  { %v1652_v25 = vld [vmem:[%s2750_s1 + $0x24] ss:$16 sps:$4 sm:$0xff]   ;;  %v1654_v26 = vld [vmem:[%s2750_s1 + $0x2c] ss:$16 sps:$4 sm:$0xff]   ;;  %v1656_v27 = vld [vmem:[%s2750_s1 + $0x20] ss:$16 sps:$4 sm:$0xff]  }
   0xa   :  { %v1657_v28 = vld [vmem:[%s2750_s1 + $0x28] ss:$16 sps:$4 sm:$0xff]   ;;  %v1658_v29 = vld [vmem:[%s2750_s1 + $0x4] ss:$16 sps:$4 sm:$0xff]   ;;  %v1660_v30 = vld [vmem:[%s2750_s1 + $0xc] ss:$16 sps:$4 sm:$0xff]  }
   0xb   :  { %285 = vmatpush1.bf16.msra.mxu0 %v1632_v11  ;;  %358 = vmatpush1.bf16.msra.mxu1 %v1633_v12  ;;  %v1662_v31 = vld [vmem:[%s2750_s1] ss:$16 sps:$4 sm:$0xff]   ;;  %v1663_v32 = vld [vmem:[%s2750_s1 + $0x8] ss:$16 sps:$4 sm:$0xff]   ;;  %v2018_v33 = vld [vmem:[%s2752_s3 + $0xe4] ss:$16 sps:$4 sm:$0xff]  }
   0xc   :  { %286 = vmatprep.subr.bf16.mxu0 %v1634_v13  ;;  %359 = vmatprep.subr.bf16.mxu1 %v1636_v14  ;;  %v2023_v34 = vld [vmem:[%s2752_s3 + $0xec] ss:$16 sps:$4 sm:$0xff]   ;;  %v1664_v35 = vld [vmem:[%s2751_s0] sm:$0xff]   ;;  %v2036_v37 = vld [vmem:[%s2752_s3 + $0xe8] ss:$16 sps:$4 sm:$0xff]   ;;  %v77_v9 = vshrl.u32 %v76_v8, 7 }
   0xd   :  { %v2031_v36 = vld [vmem:[%s2752_s3 + $0xe0] ss:$16 sps:$4 sm:$0xff]   ;;  %v2043_v38 = vld [vmem:[%s2752_s3 + $0xc4] ss:$16 sps:$4 sm:$0xff]   ;;  %v2048_v39 = vld [vmem:[%s2752_s3 + $0xcc] ss:$16 sps:$4 sm:$0xff]  }
   0xe   :  { %v2053_v40 = vld [vmem:[%s2752_s3 + $0xc0] ss:$16 sps:$4 sm:$0xff]   ;;  %v2060_v41 = vld [vmem:[%s2752_s3 + $0xc8] ss:$16 sps:$4 sm:$0xff]   ;;  %v2067_v42 = vld [vmem:[%s2752_s3 + $0xa4] ss:$16 sps:$4 sm:$0xff]  }
   0xf   :  { %287 = vmatpush1.bf16.msra.mxu0 %v1638_v15  ;;  %360 = vmatpush1.bf16.msra.mxu1 %v1639_v16  ;;  %v2072_v43 = vld [vmem:[%s2752_s3 + $0xac] ss:$16 sps:$4 sm:$0xff]   ;;  %v2082_v45 = vld [vmem:[%s2752_s3 + $0xa0] ss:$16 sps:$4 sm:$0xff]   ;;  %v2087_v46 = vld [vmem:[%s2752_s3 + $0xa8] ss:$16 sps:$4 sm:$0xff]  }
  0x10   :  { %288 = vmatprep.subr.bf16.mxu0 %v1640_v17  ;;  %361 = vmatprep.subr.bf16.mxu1 %v1642_v18  ;;  %v1677_v44 = vld [vmem:[%s2751_s0 + $0x8] sm:$0xff]   ;;  %v2094_v47 = vld [vmem:[%s2752_s3 + $0x84] ss:$16 sps:$4 sm:$0xff]   ;;  %v2106_v49 = vld [vmem:[%s2752_s3 + $0x80] ss:$16 sps:$4 sm:$0xff]   ;;  %v86_v10 = vsub.s32 2, %v77_v9 }
  0x11   :  { %v2101_v48 = vld [vmem:[%s2752_s3 + $0x8c] ss:$16 sps:$4 sm:$0xff]   ;;  %v2111_v50 = vld [vmem:[%s2752_s3 + $0x88] ss:$16 sps:$4 sm:$0xff]   ;;  %v2118_v51 = vld [vmem:[%s2752_s3 + $0x64] ss:$16 sps:$4 sm:$0xff]  }
  0x12   :  { %v2125_v52 = vld [vmem:[%s2752_s3 + $0x6c] ss:$16 sps:$4 sm:$0xff]   ;;  %v1690_v53 = vld [vmem:[%s2751_s0 + $0x10] sm:$0xff]   ;;  %v2142_v55 = vld [vmem:[%s2752_s3 + $0x68] ss:$16 sps:$4 sm:$0xff]   ;;  %v78_v11 = vsub.s32 0, %v77_v9 }
  0x13   :  { %289 = vmatpush1.bf16.msra.mxu0 %v1644_v19  ;;  %362 = vmatpush1.bf16.msra.mxu1 %v1645_v20  ;;  %v2137_v54 = vld [vmem:[%s2752_s3 + $0x60] ss:$16 sps:$4 sm:$0xff]   ;;  %v2149_v56 = vld [vmem:[%s2752_s3 + $0x44] ss:$16 sps:$4 sm:$0xff]   ;;  %v2154_v57 = vld [vmem:[%s2752_s3 + $0x4c] ss:$16 sps:$4 sm:$0xff]  }
  0x14   :  { %290 = vmatprep.subr.bf16.mxu0 %v1646_v21  ;;  %363 = vmatprep.subr.bf16.mxu1 %v1648_v22  ;;  %v2161_v58 = vld [vmem:[%s2752_s3 + $0x40] ss:$16 sps:$4 sm:$0xff]   ;;  %v2166_v59 = vld [vmem:[%s2752_s3 + $0x48] ss:$16 sps:$4 sm:$0xff]   ;;  %v2173_v60 = vld [vmem:[%s2752_s3 + $0x24] ss:$16 sps:$4 sm:$0xff]  }
  0x15   :  { %v2178_v61 = vld [vmem:[%s2752_s3 + $0x2c] ss:$16 sps:$4 sm:$0xff]   ;;  %v2190_v63 = vld [vmem:[%s2752_s3 + $0x20] ss:$16 sps:$4 sm:$0xff]   ;;  %v2195_v0 = vld [vmem:[%s2752_s3 + $0x28] ss:$16 sps:$4 sm:$0xff]  }
  0x16   :  { %v1703_v62 = vld [vmem:[%s2751_s0 + $0x18] sm:$0xff]   ;;  %v2202_v2 = vld [vmem:[%s2752_s3 + $0x4] ss:$16 sps:$4 sm:$0xff]   ;;  %v2214_v4 = vld [vmem:[%s2752_s3] ss:$16 sps:$4 sm:$0xff]   ;;  %v90_v12 = vsub.s32 3, %v77_v9 }
  0x17   :  { %291 = vmatpush1.bf16.msra.mxu0 %v1650_v23  ;;  %364 = vmatpush1.bf16.msra.mxu1 %v1651_v24  ;;  %v2207_v3 = vld [vmem:[%s2752_s3 + $0xc] ss:$16 sps:$4 sm:$0xff]   ;;  %v2219_v5 = vld [vmem:[%s2752_s3 + $0x8] ss:$16 sps:$4 sm:$0xff]   ;;  %v30_v6 = vld [vmem:[%s2753_s4] sm:$0xff]  ;;  %v82_v17 = vsub.s32 1, %v77_v9 }
  0x18   :  { %292 = vmatprep.subr.bf16.mxu0 %v1652_v25  ;;  %365 = vmatprep.subr.bf16.mxu1 %v1654_v26  ;;  %v428_v7 = vpack.c.bf16 %v30_v6, %v30_v6  ;;  %v74_v13 = vld [vmem:[%s2754_s2] sm:$0xf] }
  0x19   :  { %v2273_v16 = vrot.slane %v74_v13, %v86_v10  ;;  %v79_v20 = vrot.slane %v74_v13, %v78_v11  ;;  %v2279_v21 = vrot.slane %v74_v13, %v90_v12  ;;  %v83_v24 = vrot.slane %v74_v13, %v82_v17 }
  0x1b   :  { %293 = vmatpush1.bf16.msra.mxu0 %v1656_v27  ;;  %366 = vmatpush1.bf16.msra.mxu1 %v1657_v28 }
  0x1c   :  { %294 = vmatprep.subr.bf16.mxu0 %v1658_v29  ;;  %367 = vmatprep.subr.bf16.mxu1 %v1660_v30 }
  0x1f   :  { %295 = vmatpush1.bf16.msra.mxu0 %v1662_v31  ;;  %368 = vmatpush1.bf16.msra.mxu1 %v1663_v32 }
  0x20   :  { %621 = vmatprep.subr.bf16.mxu0 %v2018_v33  ;;  %662 = vmatprep.subr.bf16.mxu1 %v2023_v34 }
  0x22   :  { %313 = vmatmul.mubr.bf16.vlgmr.msra.gmra.mxu0 %v1664_v35  ;;  %386 = vmatmul.mubr.bf16.vlgmr.msra.gmra.mxu1 %v1664_v35 }
  0x23   :  { %622 = vmatpush1.bf16.msra.mxu0 %v2031_v36  ;;  %663 = vmatpush1.bf16.msra.mxu1 %v2036_v37 }
  0x24   :  { %623 = vmatprep.subr.bf16.mxu0 %v2043_v38  ;;  %664 = vmatprep.subr.bf16.mxu1 %v2048_v39 }
  0x25   :  { %322 = vmatprep.mubr.bf16.mxu0 %v2758_v1  ;;  %395 = vmatprep.mubr.bf16.mxu1 %v2758_v1 }
  0x27   :  { %624 = vmatpush1.bf16.msra.mxu0 %v2053_v40  ;;  %665 = vmatpush1.bf16.msra.mxu1 %v2060_v41 }
  0x28   :  { %625 = vmatprep.subr.bf16.mxu0 %v2067_v42  ;;  %666 = vmatprep.subr.bf16.mxu1 %v2072_v43 }
  0x2a   :  { %323 = vmatmul.mubr.bf16.gmra.mxu0 %v1677_v44  ;;  %396 = vmatmul.mubr.bf16.gmra.mxu1 %v1677_v44 }
  0x2b   :  { %626 = vmatpush1.bf16.msra.mxu0 %v2082_v45  ;;  %667 = vmatpush1.bf16.msra.mxu1 %v2087_v46 }
  0x2c   :  { %627 = vmatprep.subr.bf16.mxu0 %v2094_v47  ;;  %668 = vmatprep.subr.bf16.mxu1 %v2101_v48 }
  0x2d   :  { %332 = vmatprep.mubr.bf16.mxu0 %v2758_v1  ;;  %405 = vmatprep.mubr.bf16.mxu1 %v2758_v1 }
  0x2f   :  { %628 = vmatpush1.bf16.msra.mxu0 %v2106_v49  ;;  %669 = vmatpush1.bf16.msra.mxu1 %v2111_v50 }
  0x30   :  { %629 = vmatprep.subr.bf16.mxu0 %v2118_v51  ;;  %670 = vmatprep.subr.bf16.mxu1 %v2125_v52 }
  0x32   :  { %333 = vmatmul.mubr.bf16.gmra.mxu0 %v1690_v53  ;;  %406 = vmatmul.mubr.bf16.gmra.mxu1 %v1690_v53 }
  0x33   :  { %630 = vmatpush1.bf16.msra.mxu0 %v2137_v54  ;;  %671 = vmatpush1.bf16.msra.mxu1 %v2142_v55 }
  0x34   :  { %631 = vmatprep.subr.bf16.mxu0 %v2149_v56  ;;  %672 = vmatprep.subr.bf16.mxu1 %v2154_v57 }
  0x35   :  { %342 = vmatprep.mubr.bf16.mxu0 %v2758_v1  ;;  %415 = vmatprep.mubr.bf16.mxu1 %v2758_v1 }
  0x37   :  { %632 = vmatpush1.bf16.msra.mxu0 %v2161_v58  ;;  %673 = vmatpush1.bf16.msra.mxu1 %v2166_v59 }
  0x38   :  { %633 = vmatprep.subr.bf16.mxu0 %v2173_v60  ;;  %674 = vmatprep.subr.bf16.mxu1 %v2178_v61 }
  0x3a   :  { %343 = vmatmul.mubr.bf16.gmra.mxu0 %v1703_v62  ;;  %416 = vmatmul.mubr.bf16.gmra.mxu1 %v1703_v62 }
  0x3b   :  { %634 = vmatpush1.bf16.msra.mxu0 %v2190_v63  ;;  %675 = vmatpush1.bf16.msra.mxu1 %v2195_v0 }
  0x3c   :  { %635 = vmatprep.subr.bf16.mxu0 %v2202_v2  ;;  %676 = vmatprep.subr.bf16.mxu1 %v2207_v3 }
  0x3d   :  { %653 = vmatprep.mubr.bf16.mxu0 %v2758_v1  ;;  %694 = vmatprep.mubr.bf16.mxu1 %v2758_v1 }
  0x3f   :  { %636 = vmatpush1.bf16.msra.mxu0 %v2214_v4  ;;  %677 = vmatpush1.bf16.msra.mxu1 %v2219_v5 }
  0x40   :  { %732 = vmatprep.subr.bf16.mxu0 %v2018_v33  ;;  %773 = vmatprep.subr.bf16.mxu1 %v2023_v34 }
  0x42   :  { %654 = vmatmul.mubr.bf16.vlgmr.msra.gmra.mxu0 %v428_v7  ;;  %695 = vmatmul.mubr.bf16.vlgmr.msra.gmra.mxu1 %v428_v7 }
  0x43   :  { %733 = vmatpush1.bf16.msra.mxu0 %v2031_v36  ;;  %774 = vmatpush1.bf16.msra.mxu1 %v2036_v37 }
  0x44   :  { %734 = vmatprep.subr.bf16.mxu0 %v2043_v38  ;;  %775 = vmatprep.subr.bf16.mxu1 %v2048_v39 }
  0x45   :  { %764 = vmatprep.mubr.bf16.mxu0 %v2758_v1  ;;  %805 = vmatprep.mubr.bf16.mxu1 %v2758_v1 }
  0x47   :  { %735 = vmatpush1.bf16.msra.mxu0 %v2053_v40  ;;  %776 = vmatpush1.bf16.msra.mxu1 %v2060_v41 }
  0x48   :  { %736 = vmatprep.subr.bf16.mxu0 %v2067_v42  ;;  %777 = vmatprep.subr.bf16.mxu1 %v2072_v43 }
  0x4b   :  { %737 = vmatpush1.bf16.msra.mxu0 %v2082_v45  ;;  %778 = vmatpush1.bf16.msra.mxu1 %v2087_v46 }
  0x4c   :  { %738 = vmatprep.subr.bf16.mxu0 %v2094_v47  ;;  %779 = vmatprep.subr.bf16.mxu1 %v2101_v48 }
  0x4f   :  { %739 = vmatpush1.bf16.msra.mxu0 %v2106_v49  ;;  %780 = vmatpush1.bf16.msra.mxu1 %v2111_v50 }
  0x50   :  { %740 = vmatprep.subr.bf16.mxu0 %v2118_v51  ;;  %781 = vmatprep.subr.bf16.mxu1 %v2125_v52 }
  0x53   :  { %741 = vmatpush1.bf16.msra.mxu0 %v2137_v54  ;;  %782 = vmatpush1.bf16.msra.mxu1 %v2142_v55 }
  0x54   :  { %742 = vmatprep.subr.bf16.mxu0 %v2149_v56  ;;  %783 = vmatprep.subr.bf16.mxu1 %v2154_v57 }
  0x57   :  { %743 = vmatpush1.bf16.msra.mxu0 %v2161_v58  ;;  %784 = vmatpush1.bf16.msra.mxu1 %v2166_v59 }
  0x58   :  { %744 = vmatprep.subr.bf16.mxu0 %v2173_v60  ;;  %785 = vmatprep.subr.bf16.mxu1 %v2178_v61 }
  0x5b   :  { %745 = vmatpush1.bf16.msra.mxu0 %v2190_v63  ;;  %786 = vmatpush1.bf16.msra.mxu1 %v2195_v0 }
  0x5c   :  { %746 = vmatprep.subr.bf16.mxu0 %v2202_v2  ;;  %787 = vmatprep.subr.bf16.mxu1 %v2207_v3 }
  0x5f   :  { %747 = vmatpush1.bf16.msra.mxu0 %v2214_v4  ;;  %788 = vmatpush1.bf16.msra.mxu1 %v2219_v5 }
  0x60   :  { %843 = vmatprep.subr.bf16.mxu0 %v2018_v33  ;;  %884 = vmatprep.subr.bf16.mxu1 %v2023_v34 }
  0xe2   :  { %v2269_v14 = vpop.f32.mrf.mxu0  ;;  %v2271_v15 = vpop.f32.mrf.mxu1 }
  0xe4   :  { %v2275_v18 = vpop.f32.mrf.mxu0  ;;  %v2277_v19 = vpop.f32.mrf.mxu1 }
  0xe6   :  { %v318_v22 = vpop.f32.mrf.mxu0  ;;  %v391_v23 = vpop.f32.mrf.mxu1 }
  0xe7   :  { %v2281_v25 = vadd.f32 %v318_v22, %v79_v20  ;;  %v2284_v26 = vadd.f32 %v391_v23, %v2273_v16 }
  0xe8   :  { %v320_v27 = vpop.f32.mrf.mxu0  ;;  %v393_v28 = vpop.f32.mrf.mxu1 }
  0xe9   :  { %v2286_v29 = vadd.f32 %v320_v27, %v83_v24  ;;  %v2289_v30 = vadd.f32 %v393_v28, %v2279_v21 }
  0xea   :  { %v324_v31 = vpop.f32.mrf.mxu0  ;;  %v397_v32 = vpop.f32.mrf.mxu1 }
  0xeb   :  { %v2291_v35 = vadd.f32 %v324_v31, %v79_v20  ;;  %v2294_v44 = vadd.f32 %v397_v32, %v2273_v16 }
  0xec   :  { %v326_v53 = vpop.f32.mrf.mxu0  ;;  %v399_v62 = vpop.f32.mrf.mxu1 }
  0xed   :  { %v2296_v6 = vadd.f32 %v326_v53, %v83_v24  ;;  %v2299_v7 = vadd.f32 %v399_v62, %v2279_v21 }
  0xee   :  { %v328_v8 = vpop.f32.mrf.mxu0  ;;  %v401_v9 = vpop.f32.mrf.mxu1 }
  0xef   :  { %2760 = vst [vmem:[#allocation4_spill] sm:$0xff] %v2299_v7  ;;  %v2301_v10 = vadd.f32 %v328_v8, %v79_v20  ;;  %v2304_v11 = vadd.f32 %v401_v9, %v2273_v16 }
  0xf0   :  { %v330_v12 = vpop.f32.mrf.mxu0  ;;  %v403_v13 = vpop.f32.mrf.mxu1 }
  0xf1   :  { %2761 = vst [vmem:[#allocation5_spill] sm:$0xff] %v2301_v10  ;;  %2762 = vst [vmem:[#allocation6_spill] sm:$0xff] %v2304_v11  ;;  %v2306_v17 = vadd.f32 %v330_v12, %v83_v24  ;;  %v2309_v22 = vadd.f32 %v403_v13, %v2279_v21 }
  0xf2   :  { %v334_v23 = vpop.f32.mrf.mxu0  ;;  %v407_v27 = vpop.f32.mrf.mxu1 }
  0xf3   :  { %2763 = vst [vmem:[#allocation7_spill] sm:$0xff] %v2306_v17  ;;  %2764 = vst [vmem:[#allocation8_spill] sm:$0xff] %v2309_v22  ;;  %v2311_v28 = vadd.f32 %v334_v23, %v79_v20  ;;  %v2314_v31 = vadd.f32 %v407_v27, %v2273_v16 }
  0xf4   :  { %v336_v32 = vpop.f32.mrf.mxu0  ;;  %v409_v53 = vpop.f32.mrf.mxu1 }
  0xf5   :  { %2765 = vst [vmem:[#allocation9_spill] sm:$0xff] %v2311_v28  ;;  %2766 = vst [vmem:[#allocation10_spill] sm:$0xff] %v2314_v31  ;;  %v2316_v62 = vadd.f32 %v336_v32, %v83_v24  ;;  %v2319_v8 = vadd.f32 %v409_v53, %v2279_v21 }
  0xf6   :  { %v338_v9 = vpop.f32.mrf.mxu0  ;;  %v411_v12 = vpop.f32.mrf.mxu1 }
  0xf7   :  { %2767 = vst [vmem:[#allocation11_spill] sm:$0xff] %v2316_v62  ;;  %2768 = vst [vmem:[#allocation12_spill] sm:$0xff] %v2319_v8  ;;  %v2321_v1 = vadd.f32 %v338_v9, %v79_v20  ;;  %v2324_v13 = vadd.f32 %v411_v12, %v2273_v16 }
  0xf8   :  { %v340_v22 = vpop.f32.mrf.mxu0  ;;  %v413_v23 = vpop.f32.mrf.mxu1 }
  0xf9   :  { %2769 = vst [vmem:[#allocation13_spill] sm:$0xff] %v2321_v1  ;;  %2770 = vst [vmem:[#allocation14_spill] sm:$0xff] %v2324_v13  ;;  %v2326_v28 = vadd.f32 %v340_v22, %v83_v24  ;;  %v2329_v27 = vadd.f32 %v413_v23, %v2279_v21 }
  0xfa   :  { %v344_v31 = vpop.f32.mrf.mxu0  ;;  %v417_v32 = vpop.f32.mrf.mxu1 }
  0xfb   :  { %2771 = vst [vmem:[#allocation15_spill] sm:$0xff] %v2326_v28  ;;  %2772 = vst [vmem:[#allocation16_spill] sm:$0xff] %v2329_v27  ;;  %v2331_v62 = vadd.f32 %v344_v31, %v79_v20  ;;  %v2334_v53 = vadd.f32 %v417_v32, %v2273_v16 }
  0xfc   :  { %v346_v8 = vpop.f32.mrf.mxu0  ;;  %v419_v9 = vpop.f32.mrf.mxu1 }
  0xfd   :  { %2773 = vst [vmem:[#allocation17_spill] sm:$0xff] %v2331_v62  ;;  %2774 = vst [vmem:[#allocation18_spill] sm:$0xff] %v2334_v53  ;;  %v2336_v1 = vadd.f32 %v346_v8, %v83_v24  ;;  %v2339_v12 = vadd.f32 %v419_v9, %v2279_v21  ;;  %v315_v62 = vadd.f32 %v2269_v14, %v79_v20 }
  0xfe   :  { %v348_v13 = vpop.f32.mrf.mxu0  ;;  %v421_v22 = vpop.f32.mrf.mxu1  ;;  %v317_v9 = vadd.f32 %v2275_v18, %v83_v24 }
  0xff   :  { %2775 = vst [vmem:[#allocation19_spill] sm:$0xff] %v2336_v1  ;;  %2776 = vst [vmem:[#allocation20_spill] sm:$0xff] %v2339_v12  ;;  %v2341_v28 = vadd.f32 %v348_v13, %v79_v20  ;;  %v2344_v23 = vadd.f32 %v421_v22, %v2273_v16  ;;  %v388_v20 = vadd.f32 %v2271_v15, %v2273_v16  ;;  %v32_v15 = vld [vmem:[%s2755_s5] sm:$0xff] }
 0x100   :  { %v350_v27 = vpop.f32.mrf.mxu0  ;;  %v423_v31 = vpop.f32.mrf.mxu1 }
 0x101   :  { %2777 = vst [vmem:[#allocation21_spill] sm:$0xff] %v2341_v28  ;;  %2778 = vst [vmem:[#allocation22_spill] sm:$0xff] %v2344_v23  ;;  %v2347_v32 = vadd.f32 %v350_v27, %v83_v24  ;;  %v2350_v53 = vadd.f32 %v423_v31, %v2279_v21  ;;  %v390_v31 = vadd.f32 %v2277_v19, %v2279_v21 }
 0x102   :  { %v655_v8 = vpop.f32.mrf.mxu0  ;;  %v696_v1 = vpop.f32.mrf.mxu1 }
 0x103   :  { %v703_v12 = vadd.f32 %v655_v8, %v315_v62  ;;  %v705_v27 = vadd.f32 %v696_v1, %v388_v20 }
 0x104   :  { %v657_v11 = vpop.f32.mrf.mxu0  ;;  %v698_v13 = vpop.f32.mrf.mxu1 }
 0x105   :  { %v1591_v28 = vmul.f32 -1.442695, %v703_v12  ;;  %v704_v17 = vadd.f32 %v657_v11, %v317_v9  ;;  %v1593_v18 = vmul.f32 -1.442695, %v705_v27  ;;  %v706_v62 = vadd.f32 %v698_v13, %v390_v31 }
 0x106   :  { %v659_v22 = vpop.f32.mrf.mxu0  ;;  %v700_v23 = vpop.f32.mrf.mxu1 }
 0x107   :  { %1716 = vpow2.f32 %v1591_v28  ;;  %v1592_v10 = vmul.f32 -1.442695, %v704_v17 }
 0x108   :  { %v660_v7 = vpop.f32.mrf.mxu0  ;;  %v701_v14 = vpop.f32.mrf.mxu1 }
 0x109   :  { %1718 = vpow2.f32 %v1592_v10  ;;  %v2779_v14 = vmov 0  }
 0x10a   :  { %1720 = vpow2.f32 %v1593_v18 }
 0x114   :  { %v1717_v24 = vpop.eup %1716 }
 0x115   :  { %v716_v8 = vadd.f32 1.0, %v1717_v24 }
 0x116   :  { %v1719_v12 = vpop.eup %1718 }
 0x117   :  { %1722 = vrcp.f32 %v716_v8  ;;  %v717_v11 = vadd.f32 1.0, %v1719_v12  ;;  %v1721_v7 = vpop.eup %1720 }
 0x118   :  { %1724 = vtanh.f32 %v706_v62  ;;  %v718_v10 = vadd.f32 1.0, %v1721_v7 }
 0x119   :  { %1726 = vrcp.f32 %v717_v11 }
 0x11a   :  { %1728 = vrcp.f32 %v718_v10 }
 0x124   :  { %v1723_v17 = vpop.eup %1722 }
 0x125   :  { %v1725_v1 = vpop.eup %1724 }
 0x126   :  { %v1727_v16 = vpop.eup %1726  ;;  %v727_v21 = vmul.f32 %v1725_v1, %v1723_v17 }
 0x127   :  { %v726_v19 = vmul.f32 %v1727_v16, %v32_v15  ;;  %v1729_v23 = vpop.eup %1728 }
 0x129   :  { %v2360_v28 = vadd.f32 %v727_v21, %v726_v19 }
 0x12b   :  { %1730 = vtanh.f32 %v2360_v28 }
 0x138   :  { %v1731_v9 = vpop.eup %1730 }
 0x139   :  { %v730_v13 = vmul.f32 %v1731_v9, %v1729_v23 }
 0x13b   :  { %v731_v22 = vpack.c.bf16 %v730_v13, %v730_v13 }
 0x13d   :  { %765 = vmatmul.mubr.bf16.vlgmr.msra.gmra.mxu0 %v731_v22  ;;  %806 = vmatmul.mubr.bf16.vlgmr.msra.gmra.mxu1 %v731_v22 }
 0x13e   :  { %844 = vmatpush1.bf16.msra.mxu0 %v2031_v36  ;;  %885 = vmatpush1.bf16.msra.mxu1 %v2036_v37 }
 0x13f   :  { %845 = vmatprep.subr.bf16.mxu0 %v2043_v38  ;;  %886 = vmatprep.subr.bf16.mxu1 %v2048_v39 }
 0x140   :  { %875 = vmatprep.mubr.bf16.mxu0 %v2779_v14  ;;  %916 = vmatprep.mubr.bf16.mxu1 %v2779_v14 }
 0x142   :  { %846 = vmatpush1.bf16.msra.mxu0 %v2053_v40  ;;  %887 = vmatpush1.bf16.msra.mxu1 %v2060_v41 }
 0x143   :  { %847 = vmatprep.subr.bf16.mxu0 %v2067_v42  ;;  %888 = vmatprep.subr.bf16.mxu1 %v2072_v43 }
 0x146   :  { %848 = vmatpush1.bf16.msra.mxu0 %v2082_v45  ;;  %889 = vmatpush1.bf16.msra.mxu1 %v2087_v46 }
 0x147   :  { %849 = vmatprep.subr.bf16.mxu0 %v2094_v47  ;;  %890 = vmatprep.subr.bf16.mxu1 %v2101_v48 }
 0x14a   :  { %850 = vmatpush1.bf16.msra.mxu0 %v2106_v49  ;;  %891 = vmatpush1.bf16.msra.mxu1 %v2111_v50 }
 0x14b   :  { %851 = vmatprep.subr.bf16.mxu0 %v2118_v51  ;;  %892 = vmatprep.subr.bf16.mxu1 %v2125_v52 }
 0x14e   :  { %852 = vmatpush1.bf16.msra.mxu0 %v2137_v54  ;;  %893 = vmatpush1.bf16.msra.mxu1 %v2142_v55 }
 0x14f   :  { %853 = vmatprep.subr.bf16.mxu0 %v2149_v56  ;;  %894 = vmatprep.subr.bf16.mxu1 %v2154_v57 }
 0x152   :  { %854 = vmatpush1.bf16.msra.mxu0 %v2161_v58  ;;  %895 = vmatpush1.bf16.msra.mxu1 %v2166_v59 }
 0x153   :  { %855 = vmatprep.subr.bf16.mxu0 %v2173_v60  ;;  %896 = vmatprep.subr.bf16.mxu1 %v2178_v61 }
 0x156   :  { %856 = vmatpush1.bf16.msra.mxu0 %v2190_v63  ;;  %897 = vmatpush1.bf16.msra.mxu1 %v2195_v0 }
 0x157   :  { %857 = vmatprep.subr.bf16.mxu0 %v2202_v2  ;;  %898 = vmatprep.subr.bf16.mxu1 %v2207_v3 }
 0x15a   :  { %858 = vmatpush1.bf16.msra.mxu0 %v2214_v4  ;;  %899 = vmatpush1.bf16.msra.mxu1 %v2219_v5 }
 0x15b   :  { %954 = vmatprep.subr.bf16.mxu0 %v2018_v33  ;;  %995 = vmatprep.subr.bf16.mxu1 %v2023_v34 }
 0x1fd   :  { %v766_v20 = vpop.f32.mrf.mxu0  ;;  %v807_v27 = vpop.f32.mrf.mxu1 }
 0x1fe   :  { %v814_v31 = vadd.f32 %v766_v20, %v2281_v25  ;;  %v816_v1 = vadd.f32 %v807_v27, %v2284_v26 }
 0x1ff   :  { %v768_v18 = vpop.f32.mrf.mxu0  ;;  %v809_v24 = vpop.f32.mrf.mxu1 }
 0x200   :  { %v1594_v62 = vmul.f32 -1.442695, %v814_v31  ;;  %v815_v8 = vadd.f32 %v768_v18, %v2286_v29  ;;  %v1596_v16 = vmul.f32 -1.442695, %v816_v1  ;;  %v817_v10 = vadd.f32 %v809_v24, %v2289_v30 }
 0x201   :  { %v770_v12 = vpop.f32.mrf.mxu0  ;;  %v811_v11 = vpop.f32.mrf.mxu1 }
 0x202   :  { %1732 = vpow2.f32 %v1594_v62  ;;  %v1595_v7 = vmul.f32 -1.442695, %v815_v8 }
 0x203   :  { %v771_v17 = vpop.f32.mrf.mxu0  ;;  %v812_v15 = vpop.f32.mrf.mxu1 }
 0x204   :  { %1734 = vpow2.f32 %v1595_v7 }
 0x205   :  { %1736 = vpow2.f32 %v1596_v16 }
 0x206   :  { %1738 = vtanh.f32 %v817_v10 }
 0x20f   :  { %v1733_v19 = vpop.eup %1732 }
 0x210   :  { %v827_v21 = vadd.f32 1.0, %v1733_v19 }
 0x211   :  { %v1735_v25 = vpop.eup %1734 }
 0x212   :  { %1740 = vrcp.f32 %v827_v21  ;;  %v828_v23 = vadd.f32 1.0, %v1735_v25  ;;  %v1737_v29 = vpop.eup %1736 }
 0x213   :  { %v1739_v9 = vpop.eup %1738  ;;  %v829_v31 = vadd.f32 1.0, %v1737_v29  ;;  %v2780_v29 = vld [vmem:[#allocation4_spill] sm:$0xff] }
 0x214   :  { %1742 = vrcp.f32 %v828_v23 }
 0x215   :  { %1744 = vrcp.f32 %v829_v31 }
 0x21f   :  { %v1741_v13 = vpop.eup %1740 }
 0x220   :  { %v838_v22 = vmul.f32 %v1741_v13, %v1739_v9 }
 0x221   :  { %v1743_v20 = vpop.eup %1742 }
 0x222   :  { %v837_v18 = vmul.f32 %v1743_v20, %v2360_v28  ;;  %v1745_v30 = vpop.eup %1744 }
 0x224   :  { %v2402_v26 = vadd.f32 %v838_v22, %v837_v18 }
 0x226   :  { %1746 = vtanh.f32 %v2402_v26 }
 0x233   :  { %v1747_v27 = vpop.eup %1746 }
 0x234   :  { %v841_v24 = vmul.f32 %v1747_v27, %v1745_v30 }
 0x236   :  { %v842_v62 = vpack.c.bf16 %v841_v24, %v841_v24 }
 0x238   :  { %876 = vmatmul.mubr.bf16.vlgmr.msra.gmra.mxu0 %v842_v62  ;;  %917 = vmatmul.mubr.bf16.vlgmr.msra.gmra.mxu1 %v842_v62 }
 0x239   :  { %955 = vmatpush1.bf16.msra.mxu0 %v2031_v36  ;;  %996 = vmatpush1.bf16.msra.mxu1 %v2036_v37 }
 0x23a   :  { %956 = vmatprep.subr.bf16.mxu0 %v2043_v38  ;;  %997 = vmatprep.subr.bf16.mxu1 %v2048_v39 }
 0x23b   :  { %986 = vmatprep.mubr.bf16.mxu0 %v2779_v14  ;;  %1027 = vmatprep.mubr.bf16.mxu1 %v2779_v14 }
 0x23d   :  { %957 = vmatpush1.bf16.msra.mxu0 %v2053_v40  ;;  %998 = vmatpush1.bf16.msra.mxu1 %v2060_v41 }
 0x23e   :  { %958 = vmatprep.subr.bf16.mxu0 %v2067_v42  ;;  %999 = vmatprep.subr.bf16.mxu1 %v2072_v43 }
 0x241   :  { %959 = vmatpush1.bf16.msra.mxu0 %v2082_v45  ;;  %1000 = vmatpush1.bf16.msra.mxu1 %v2087_v46 }
 0x242   :  { %960 = vmatprep.subr.bf16.mxu0 %v2094_v47  ;;  %1001 = vmatprep.subr.bf16.mxu1 %v2101_v48 }
 0x245   :  { %961 = vmatpush1.bf16.msra.mxu0 %v2106_v49  ;;  %1002 = vmatpush1.bf16.msra.mxu1 %v2111_v50 }
 0x246   :  { %962 = vmatprep.subr.bf16.mxu0 %v2118_v51  ;;  %1003 = vmatprep.subr.bf16.mxu1 %v2125_v52 }
 0x249   :  { %963 = vmatpush1.bf16.msra.mxu0 %v2137_v54  ;;  %1004 = vmatpush1.bf16.msra.mxu1 %v2142_v55 }
 0x24a   :  { %964 = vmatprep.subr.bf16.mxu0 %v2149_v56  ;;  %1005 = vmatprep.subr.bf16.mxu1 %v2154_v57 }
 0x24d   :  { %965 = vmatpush1.bf16.msra.mxu0 %v2161_v58  ;;  %1006 = vmatpush1.bf16.msra.mxu1 %v2166_v59 }
 0x24e   :  { %966 = vmatprep.subr.bf16.mxu0 %v2173_v60  ;;  %1007 = vmatprep.subr.bf16.mxu1 %v2178_v61 }
 0x251   :  { %967 = vmatpush1.bf16.msra.mxu0 %v2190_v63  ;;  %1008 = vmatpush1.bf16.msra.mxu1 %v2195_v0 }
 0x252   :  { %968 = vmatprep.subr.bf16.mxu0 %v2202_v2  ;;  %1009 = vmatprep.subr.bf16.mxu1 %v2207_v3 }
 0x255   :  { %969 = vmatpush1.bf16.msra.mxu0 %v2214_v4  ;;  %1010 = vmatpush1.bf16.msra.mxu1 %v2219_v5 }
 0x256   :  { %1065 = vmatprep.subr.bf16.mxu0 %v2018_v33  ;;  %1106 = vmatprep.subr.bf16.mxu1 %v2023_v34 }
 0x2f8   :  { %v877_v28 = vpop.f32.mrf.mxu0  ;;  %v918_v8 = vpop.f32.mrf.mxu1 }
 0x2f9   :  { %v925_v12 = vadd.f32 %v877_v28, %v2291_v35  ;;  %v927_v25 = vadd.f32 %v918_v8, %v2294_v44 }
 0x2fa   :  { %v879_v11 = vpop.f32.mrf.mxu0  ;;  %v920_v7 = vpop.f32.mrf.mxu1 }
 0x2fb   :  { %v1597_v17 = vmul.f32 -1.442695, %v925_v12  ;;  %v926_v15 = vadd.f32 %v879_v11, %v2296_v6  ;;  %v1599_v23 = vmul.f32 -1.442695, %v927_v25  ;;  %v928_v9 = vadd.f32 %v920_v7, %v2780_v29 }
 0x2fc   :  { %v881_v1 = vpop.f32.mrf.mxu0  ;;  %v922_v16 = vpop.f32.mrf.mxu1 }
 0x2fd   :  { %1748 = vpow2.f32 %v1597_v17  ;;  %v1598_v10 = vmul.f32 -1.442695, %v926_v15  ;;  %v2781_v17 = vld [vmem:[#allocation5_spill] sm:$0xff] }
 0x2fe   :  { %v882_v19 = vpop.f32.mrf.mxu0  ;;  %v923_v21 = vpop.f32.mrf.mxu1 }
 0x2ff   :  { %1750 = vpow2.f32 %v1598_v10  ;;  %v2782_v19 = vld [vmem:[#allocation7_spill] sm:$0xff] }
 0x300   :  { %1752 = vpow2.f32 %v1599_v23 }
 0x301   :  { %1754 = vtanh.f32 %v928_v9 }
 0x30a   :  { %v1749_v13 = vpop.eup %1748 }
 0x30b   :  { %v938_v22 = vadd.f32 1.0, %v1749_v13 }
 0x30c   :  { %v1751_v35 = vpop.eup %1750 }
 0x30d   :  { %1756 = vrcp.f32 %v938_v22  ;;  %v939_v20 = vadd.f32 1.0, %v1751_v35  ;;  %v1753_v6 = vpop.eup %1752  ;;  %v2783_v22 = vld [vmem:[#allocation6_spill] sm:$0xff] }
 0x30e   :  { %v1755_v31 = vpop.eup %1754  ;;  %v940_v24 = vadd.f32 1.0, %v1753_v6 }
 0x30f   :  { %1758 = vrcp.f32 %v939_v20 }
 0x310   :  { %1760 = vrcp.f32 %v940_v24 }
 0x31a   :  { %v1757_v18 = vpop.eup %1756 }
 0x31b   :  { %v949_v30 = vmul.f32 %v1757_v18, %v1755_v31 }
 0x31c   :  { %v1759_v27 = vpop.eup %1758 }
 0x31d   :  { %v948_v62 = vmul.f32 %v1759_v27, %v2402_v26  ;;  %v1761_v28 = vpop.eup %1760 }
 0x31f   :  { %v2444_v44 = vadd.f32 %v949_v30, %v948_v62 }
 0x321   :  { %1762 = vtanh.f32 %v2444_v44 }
 0x32e   :  { %v1763_v8 = vpop.eup %1762 }
 0x32f   :  { %v952_v12 = vmul.f32 %v1763_v8, %v1761_v28 }
 0x331   :  { %v953_v11 = vpack.c.bf16 %v952_v12, %v952_v12 }
 0x333   :  { %987 = vmatmul.mubr.bf16.vlgmr.msra.gmra.mxu0 %v953_v11  ;;  %1028 = vmatmul.mubr.bf16.vlgmr.msra.gmra.mxu1 %v953_v11 }
 0x334   :  { %1066 = vmatpush1.bf16.msra.mxu0 %v2031_v36  ;;  %1107 = vmatpush1.bf16.msra.mxu1 %v2036_v37 }
 0x335   :  { %1067 = vmatprep.subr.bf16.mxu0 %v2043_v38  ;;  %1108 = vmatprep.subr.bf16.mxu1 %v2048_v39 }
 0x336   :  { %1097 = vmatprep.mubr.bf16.mxu0 %v2779_v14  ;;  %1138 = vmatprep.mubr.bf16.mxu1 %v2779_v14 }
 0x338   :  { %1068 = vmatpush1.bf16.msra.mxu0 %v2053_v40  ;;  %1109 = vmatpush1.bf16.msra.mxu1 %v2060_v41 }
 0x339   :  { %1069 = vmatprep.subr.bf16.mxu0 %v2067_v42  ;;  %1110 = vmatprep.subr.bf16.mxu1 %v2072_v43 }
 0x33c   :  { %1070 = vmatpush1.bf16.msra.mxu0 %v2082_v45  ;;  %1111 = vmatpush1.bf16.msra.mxu1 %v2087_v46 }
 0x33d   :  { %1071 = vmatprep.subr.bf16.mxu0 %v2094_v47  ;;  %1112 = vmatprep.subr.bf16.mxu1 %v2101_v48 }
 0x340   :  { %1072 = vmatpush1.bf16.msra.mxu0 %v2106_v49  ;;  %1113 = vmatpush1.bf16.msra.mxu1 %v2111_v50 }
 0x341   :  { %1073 = vmatprep.subr.bf16.mxu0 %v2118_v51  ;;  %1114 = vmatprep.subr.bf16.mxu1 %v2125_v52 }
 0x344   :  { %1074 = vmatpush1.bf16.msra.mxu0 %v2137_v54  ;;  %1115 = vmatpush1.bf16.msra.mxu1 %v2142_v55 }
 0x345   :  { %1075 = vmatprep.subr.bf16.mxu0 %v2149_v56  ;;  %1116 = vmatprep.subr.bf16.mxu1 %v2154_v57 }
 0x348   :  { %1076 = vmatpush1.bf16.msra.mxu0 %v2161_v58  ;;  %1117 = vmatpush1.bf16.msra.mxu1 %v2166_v59 }
 0x349   :  { %1077 = vmatprep.subr.bf16.mxu0 %v2173_v60  ;;  %1118 = vmatprep.subr.bf16.mxu1 %v2178_v61 }
 0x34c   :  { %1078 = vmatpush1.bf16.msra.mxu0 %v2190_v63  ;;  %1119 = vmatpush1.bf16.msra.mxu1 %v2195_v0 }
 0x34d   :  { %1079 = vmatprep.subr.bf16.mxu0 %v2202_v2  ;;  %1120 = vmatprep.subr.bf16.mxu1 %v2207_v3 }
 0x350   :  { %1080 = vmatpush1.bf16.msra.mxu0 %v2214_v4  ;;  %1121 = vmatpush1.bf16.msra.mxu1 %v2219_v5 }
 0x351   :  { %1176 = vmatprep.subr.bf16.mxu0 %v2018_v33  ;;  %1217 = vmatprep.subr.bf16.mxu1 %v2023_v34  ;;  %v2784_v34 = vld [vmem:[#allocation8_spill] sm:$0xff] }
 0x3f3   :  { %v988_v26 = vpop.f32.mrf.mxu0  ;;  %v1029_v7 = vpop.f32.mrf.mxu1 }
 0x3f4   :  { %v1036_v15 = vadd.f32 %v988_v26, %v2781_v17  ;;  %v1038_v33 = vadd.f32 %v1029_v7, %v2783_v22 }
 0x3f5   :  { %v990_v1 = vpop.f32.mrf.mxu0  ;;  %v1031_v16 = vpop.f32.mrf.mxu1 }
 0x3f6   :  { %v1600_v10 = vmul.f32 -1.442695, %v1036_v15  ;;  %v1037_v21 = vadd.f32 %v990_v1, %v2782_v19  ;;  %v1602_v35 = vmul.f32 -1.442695, %v1038_v33  ;;  %v1039_v20 = vadd.f32 %v1031_v16, %v2784_v34 }
 0x3f7   :  { %v992_v25 = vpop.f32.mrf.mxu0  ;;  %v1033_v23 = vpop.f32.mrf.mxu1 }
 0x3f8   :  { %1764 = vpow2.f32 %v1600_v10  ;;  %v1601_v29 = vmul.f32 -1.442695, %v1037_v21 }
 0x3f9   :  { %v993_v9 = vpop.f32.mrf.mxu0  ;;  %v1034_v13 = vpop.f32.mrf.mxu1 }
 0x3fa   :  { %1766 = vpow2.f32 %v1601_v29 }
 0x3fb   :  { %1768 = vpow2.f32 %v1602_v35 }
 0x3fc   :  { %1770 = vtanh.f32 %v1039_v20 }
 0x405   :  { %v1765_v6 = vpop.eup %1764 }
 0x406   :  { %v1049_v31 = vadd.f32 1.0, %v1765_v6 }
 0x407   :  { %v1767_v18 = vpop.eup %1766 }
 0x408   :  { %1772 = vrcp.f32 %v1049_v31  ;;  %v1050_v30 = vadd.f32 1.0, %v1767_v18  ;;  %v1769_v27 = vpop.eup %1768  ;;  %v2544_v18 = vld [vmem:[%s2752_s3 + $0xe0] ss:$16 sps:$4 sm:$0xff]  }
 0x409   :  { %v1771_v24 = vpop.eup %1770  ;;  %v1051_v12 = vadd.f32 1.0, %v1769_v27  ;;  %v2556_v27 = vld [vmem:[%s2752_s3 + $0xc4] ss:$16 sps:$4 sm:$0xff]  }
 0x40a   :  { %1774 = vrcp.f32 %v1050_v30  ;;  %v2550_v30 = vld [vmem:[%s2752_s3 + $0xe8] ss:$16 sps:$4 sm:$0xff]  }
 0x40b   :  { %1776 = vrcp.f32 %v1051_v12  ;;  %v2588_v12 = vld [vmem:[%s2752_s3 + $0xac] ss:$16 sps:$4 sm:$0xff]  }
 0x415   :  { %v1773_v62 = vpop.eup %1772 }
 0x416   :  { %v1060_v28 = vmul.f32 %v1773_v62, %v1771_v24  ;;  %v2562_v24 = vld [vmem:[%s2752_s3 + $0xcc] ss:$16 sps:$4 sm:$0xff]   ;;  %v2570_v62 = vld [vmem:[%s2752_s3 + $0xc0] ss:$16 sps:$4 sm:$0xff]  }
 0x417   :  { %v1775_v8 = vpop.eup %1774 }
 0x418   :  { %v1059_v11 = vmul.f32 %v1775_v8, %v2444_v44  ;;  %v1777_v7 = vpop.eup %1776  ;;  %v2582_v8 = vld [vmem:[%s2752_s3 + $0xa4] ss:$16 sps:$4 sm:$0xff]  }
 0x41a   :  { %v2486_v26 = vadd.f32 %v1060_v28, %v1059_v11  ;;  %v2576_v28 = vld [vmem:[%s2752_s3 + $0xc8] ss:$16 sps:$4 sm:$0xff]   ;;  %v2594_v11 = vld [vmem:[%s2752_s3 + $0xa0] ss:$16 sps:$4 sm:$0xff]  }
 0x41c   :  { %1778 = vtanh.f32 %v2486_v26 }
 0x429   :  { %v1779_v17 = vpop.eup %1778 }
 0x42a   :  { %v1063_v15 = vmul.f32 %v1779_v17, %v1777_v7  ;;  %v2606_v7 = vld [vmem:[%s2752_s3 + $0x84] ss:$16 sps:$4 sm:$0xff]   ;;  %v2612_v17 = vld [vmem:[%s2752_s3 + $0x8c] ss:$16 sps:$4 sm:$0xff]  }
 0x42c   :  { %v1064_v1 = vpack.c.bf16 %v1063_v15, %v1063_v15  ;;  %v2618_v15 = vld [vmem:[%s2752_s3 + $0x80] ss:$16 sps:$4 sm:$0xff]  }
 0x42e   :  { %1098 = vmatmul.mubr.bf16.vlgmr.msra.gmra.mxu0 %v1064_v1  ;;  %1139 = vmatmul.mubr.bf16.vlgmr.msra.gmra.mxu1 %v1064_v1  ;;  %v2624_v1 = vld [vmem:[%s2752_s3 + $0x88] ss:$16 sps:$4 sm:$0xff]  }
 0x42f   :  { %1177 = vmatpush1.bf16.msra.mxu0 %v2031_v36  ;;  %1218 = vmatpush1.bf16.msra.mxu1 %v2036_v37  ;;  %v2524_v36 = vld [vmem:[%s2752_s3 + $0xe4] ss:$16 sps:$4 sm:$0xff]   ;;  %v2530_v37 = vld [vmem:[%s2752_s3 + $0xec] ss:$16 sps:$4 sm:$0xff]  }
 0x430   :  { %1178 = vmatprep.subr.bf16.mxu0 %v2043_v38  ;;  %1219 = vmatprep.subr.bf16.mxu1 %v2048_v39 }
 0x431   :  { %1208 = vmatprep.mubr.bf16.mxu0 %v2779_v14  ;;  %1249 = vmatprep.mubr.bf16.mxu1 %v2779_v14 }
 0x433   :  { %1179 = vmatpush1.bf16.msra.mxu0 %v2053_v40  ;;  %1220 = vmatpush1.bf16.msra.mxu1 %v2060_v41  ;;  %v2785_v40 = vld [vmem:[#allocation9_spill] sm:$0xff] }
 0x434   :  { %1180 = vmatprep.subr.bf16.mxu0 %v2067_v42  ;;  %1221 = vmatprep.subr.bf16.mxu1 %v2072_v43 }
 0x437   :  { %1181 = vmatpush1.bf16.msra.mxu0 %v2082_v45  ;;  %1222 = vmatpush1.bf16.msra.mxu1 %v2087_v46  ;;  %v2786_v46 = vld [vmem:[#allocation11_spill] sm:$0xff] }
 0x438   :  { %1182 = vmatprep.subr.bf16.mxu0 %v2094_v47  ;;  %1223 = vmatprep.subr.bf16.mxu1 %v2101_v48 }
 0x43b   :  { %1183 = vmatpush1.bf16.msra.mxu0 %v2106_v49  ;;  %1224 = vmatpush1.bf16.msra.mxu1 %v2111_v50 }
 0x43c   :  { %1184 = vmatprep.subr.bf16.mxu0 %v2118_v51  ;;  %1225 = vmatprep.subr.bf16.mxu1 %v2125_v52 }
 0x43f   :  { %1185 = vmatpush1.bf16.msra.mxu0 %v2137_v54  ;;  %1226 = vmatpush1.bf16.msra.mxu1 %v2142_v55  ;;  %v2787_v54 = vld [vmem:[#allocation10_spill] sm:$0xff] }
 0x440   :  { %1186 = vmatprep.subr.bf16.mxu0 %v2149_v56  ;;  %1227 = vmatprep.subr.bf16.mxu1 %v2154_v57  ;;  %v2788_v57 = vld [vmem:[#allocation12_spill] sm:$0xff] }
 0x443   :  { %1187 = vmatpush1.bf16.msra.mxu0 %v2161_v58  ;;  %1228 = vmatpush1.bf16.msra.mxu1 %v2166_v59 }
 0x444   :  { %1188 = vmatprep.subr.bf16.mxu0 %v2173_v60  ;;  %1229 = vmatprep.subr.bf16.mxu1 %v2178_v61 }
 0x447   :  { %1189 = vmatpush1.bf16.msra.mxu0 %v2190_v63  ;;  %1230 = vmatpush1.bf16.msra.mxu1 %v2195_v0 }
 0x448   :  { %1190 = vmatprep.subr.bf16.mxu0 %v2202_v2  ;;  %1231 = vmatprep.subr.bf16.mxu1 %v2207_v3 }
 0x44b   :  { %1191 = vmatpush1.bf16.msra.mxu0 %v2214_v4  ;;  %1232 = vmatpush1.bf16.msra.mxu1 %v2219_v5 }
 0x44c   :  { %1287 = vmatprep.subr.bf16.mxu0 %v2524_v36  ;;  %1328 = vmatprep.subr.bf16.mxu1 %v2530_v37 }
 0x4ee   :  { %v1099_v38 = vpop.f32.mrf.mxu0  ;;  %v1140_v39 = vpop.f32.mrf.mxu1 }
 0x4ef   :  { %v1147_v41 = vadd.f32 %v1099_v38, %v2785_v40  ;;  %v1149_v55 = vadd.f32 %v1140_v39, %v2787_v54  ;;  %v2630_v38 = vld [vmem:[%s2752_s3 + $0x64] ss:$16 sps:$4 sm:$0xff]   ;;  %v2636_v39 = vld [vmem:[%s2752_s3 + $0x6c] ss:$16 sps:$4 sm:$0xff]   ;;  %v2642_v40 = vld [vmem:[%s2752_s3 + $0x60] ss:$16 sps:$4 sm:$0xff]  }
 0x4f0   :  { %v1101_v42 = vpop.f32.mrf.mxu0  ;;  %v1142_v43 = vpop.f32.mrf.mxu1 }
 0x4f1   :  { %v1603_v45 = vmul.f32 -1.442695, %v1147_v41  ;;  %v1148_v47 = vadd.f32 %v1101_v42, %v2786_v46  ;;  %v1605_v56 = vmul.f32 -1.442695, %v1149_v55  ;;  %v1150_v44 = vadd.f32 %v1142_v43, %v2788_v57  ;;  %v2648_v41 = vld [vmem:[%s2752_s3 + $0x68] ss:$16 sps:$4 sm:$0xff]  }
 0x4f2   :  { %v1103_v48 = vpop.f32.mrf.mxu0  ;;  %v1144_v49 = vpop.f32.mrf.mxu1  ;;  %v2654_v42 = vld [vmem:[%s2752_s3 + $0x44] ss:$16 sps:$4 sm:$0xff]   ;;  %v2660_v43 = vld [vmem:[%s2752_s3 + $0x4c] ss:$16 sps:$4 sm:$0xff]  }
 0x4f3   :  { %1780 = vpow2.f32 %v1603_v45  ;;  %v1604_v50 = vmul.f32 -1.442695, %v1148_v47 }
 0x4f4   :  { %v1104_v51 = vpop.f32.mrf.mxu0  ;;  %v1145_v52 = vpop.f32.mrf.mxu1 }
 0x4f5   :  { %1782 = vpow2.f32 %v1604_v50 }
 0x4f6   :  { %1784 = vpow2.f32 %v1605_v56 }
 0x4f7   :  { %1786 = vtanh.f32 %v1150_v44 }
 0x500   :  { %v1781_v16 = vpop.eup %1780 }
 0x501   :  { %v1160_v10 = vadd.f32 1.0, %v1781_v16 }
 0x502   :  { %v1783_v19 = vpop.eup %1782 }
 0x503   :  { %1788 = vrcp.f32 %v1160_v10  ;;  %v1161_v21 = vadd.f32 1.0, %v1783_v19  ;;  %v1785_v25 = vpop.eup %1784 }
 0x504   :  { %v1787_v23 = vpop.eup %1786  ;;  %v1162_v22 = vadd.f32 1.0, %v1785_v25 }
 0x505   :  { %1790 = vrcp.f32 %v1161_v21 }
 0x506   :  { %1792 = vrcp.f32 %v1162_v22 }
 0x510   :  { %v1789_v29 = vpop.eup %1788 }
 0x511   :  { %v1171_v9 = vmul.f32 %v1789_v29, %v1787_v23 }
 0x512   :  { %v1791_v13 = vpop.eup %1790 }
 0x513   :  { %v1170_v33 = vmul.f32 %v1791_v13, %v2486_v26  ;;  %v1793_v34 = vpop.eup %1792  ;;  %v2600_v26 = vld [vmem:[%s2752_s3 + $0xa8] ss:$16 sps:$4 sm:$0xff]  }
 0x515   :  { %v2538_v35 = vadd.f32 %v1171_v9, %v1170_v33  ;;  %v1867_v33 = vld [vmem:[%s2752_s3 + $0x48] ss:$16 sps:$4 sm:$0xff]  }
 0x517   :  { %1794 = vtanh.f32 %v2538_v35 }
 0x524   :  { %v1795_v20 = vpop.eup %1794 }
 0x525   :  { %v1174_v6 = vmul.f32 %v1795_v20, %v1793_v34  ;;  %v1869_v34 = vld [vmem:[%s2752_s3 + $0x2c] ss:$16 sps:$4 sm:$0xff]   ;;  %v1870_v20 = vld [vmem:[%s2752_s3 + $0x20] ss:$16 sps:$4 sm:$0xff]  }
 0x527   :  { %v1175_v31 = vpack.c.bf16 %v1174_v6, %v1174_v6  ;;  %v1871_v6 = vld [vmem:[%s2752_s3 + $0x28] ss:$16 sps:$4 sm:$0xff]  }
 0x529   :  { %1209 = vmatmul.mubr.bf16.vlgmr.msra.gmra.mxu0 %v1175_v31  ;;  %1250 = vmatmul.mubr.bf16.vlgmr.msra.gmra.mxu1 %v1175_v31  ;;  %v1872_v31 = vld [vmem:[%s2752_s3 + $0x4] ss:$16 sps:$4 sm:$0xff]  }
 0x52a   :  { %1288 = vmatpush1.bf16.msra.mxu0 %v2544_v18  ;;  %1329 = vmatpush1.bf16.msra.mxu1 %v2550_v30 }
 0x52b   :  { %1289 = vmatprep.subr.bf16.mxu0 %v2556_v27  ;;  %1330 = vmatprep.subr.bf16.mxu1 %v2562_v24 }
 0x52c   :  { %1319 = vmatprep.mubr.bf16.mxu0 %v2779_v14  ;;  %1360 = vmatprep.mubr.bf16.mxu1 %v2779_v14 }
 0x52e   :  { %1290 = vmatpush1.bf16.msra.mxu0 %v2570_v62  ;;  %1331 = vmatpush1.bf16.msra.mxu1 %v2576_v28 }
 0x52f   :  { %1291 = vmatprep.subr.bf16.mxu0 %v2582_v8  ;;  %1332 = vmatprep.subr.bf16.mxu1 %v2588_v12 }
 0x532   :  { %1292 = vmatpush1.bf16.msra.mxu0 %v2594_v11  ;;  %1333 = vmatpush1.bf16.msra.mxu1 %v2600_v26 }
 0x533   :  { %1293 = vmatprep.subr.bf16.mxu0 %v2606_v7  ;;  %1334 = vmatprep.subr.bf16.mxu1 %v2612_v17 }
 0x536   :  { %1294 = vmatpush1.bf16.msra.mxu0 %v2618_v15  ;;  %1335 = vmatpush1.bf16.msra.mxu1 %v2624_v1 }
 0x537   :  { %1295 = vmatprep.subr.bf16.mxu0 %v2630_v38  ;;  %1336 = vmatprep.subr.bf16.mxu1 %v2636_v39 }
 0x53a   :  { %1296 = vmatpush1.bf16.msra.mxu0 %v2642_v40  ;;  %1337 = vmatpush1.bf16.msra.mxu1 %v2648_v41 }
 0x53b   :  { %1297 = vmatprep.subr.bf16.mxu0 %v2654_v42  ;;  %1338 = vmatprep.subr.bf16.mxu1 %v2660_v43 }
 0x53e   :  { %1298 = vmatpush1.bf16.msra.mxu0 %v2161_v58  ;;  %1339 = vmatpush1.bf16.msra.mxu1 %v2166_v59 }
 0x53f   :  { %1299 = vmatprep.subr.bf16.mxu0 %v2173_v60  ;;  %1340 = vmatprep.subr.bf16.mxu1 %v2178_v61  ;;  %v2789_v60 = vld [vmem:[#allocation13_spill] sm:$0xff] }
 0x542   :  { %1300 = vmatpush1.bf16.msra.mxu0 %v2190_v63  ;;  %1341 = vmatpush1.bf16.msra.mxu1 %v2195_v0  ;;  %v2790_v0 = vld [vmem:[#allocation15_spill] sm:$0xff] }
 0x543   :  { %1301 = vmatprep.subr.bf16.mxu0 %v2202_v2  ;;  %1342 = vmatprep.subr.bf16.mxu1 %v2207_v3 }
 0x546   :  { %1302 = vmatpush1.bf16.msra.mxu0 %v2214_v4  ;;  %1343 = vmatpush1.bf16.msra.mxu1 %v2219_v5  ;;  %v2791_v5 = vld [vmem:[#allocation14_spill] sm:$0xff] }
 0x547   :  { %1398 = vmatprep.subr.bf16.mxu0 %v2524_v36  ;;  %1439 = vmatprep.subr.bf16.mxu1 %v2530_v37  ;;  %v2792_v37 = vld [vmem:[#allocation16_spill] sm:$0xff] }
 0x5e9   :  { %v1210_v58 = vpop.f32.mrf.mxu0  ;;  %v1251_v59 = vpop.f32.mrf.mxu1 }
 0x5ea   :  { %v1258_v61 = vadd.f32 %v1210_v58, %v2789_v60  ;;  %v1260_v36 = vadd.f32 %v1251_v59, %v2791_v5  ;;  %v2796_v58 = vld [vmem:[#allocation20_spill] sm:$0xff] }
 0x5eb   :  { %v1212_v45 = vpop.f32.mrf.mxu0  ;;  %v1253_v63 = vpop.f32.mrf.mxu1 }
 0x5ec   :  { %v1606_v46 = vmul.f32 -1.442695, %v1258_v61  ;;  %v1259_v47 = vadd.f32 %v1212_v45, %v2790_v0  ;;  %v1608_v50 = vmul.f32 -1.442695, %v1260_v36  ;;  %v1261_v51 = vadd.f32 %v1253_v63, %v2792_v37 }
 0x5ed   :  { %v1214_v2 = vpop.f32.mrf.mxu0  ;;  %v1255_v48 = vpop.f32.mrf.mxu1 }
 0x5ee   :  { %1796 = vpow2.f32 %v1606_v46  ;;  %v1607_v3 = vmul.f32 -1.442695, %v1259_v47 }
 0x5ef   :  { %v1215_v4 = vpop.f32.mrf.mxu0  ;;  %v1256_v49 = vpop.f32.mrf.mxu1 }
 0x5f0   :  { %1798 = vpow2.f32 %v1607_v3 }
 0x5f1   :  { %1800 = vpow2.f32 %v1608_v50 }
 0x5f2   :  { %1802 = vtanh.f32 %v1261_v51 }
 0x5fb   :  { %v1797_v52 = vpop.eup %1796 }
 0x5fc   :  { %v1271_v54 = vadd.f32 1.0, %v1797_v52 }
 0x5fd   :  { %v1799_v55 = vpop.eup %1798 }
 0x5fe   :  { %1804 = vrcp.f32 %v1271_v54  ;;  %v1272_v56 = vadd.f32 1.0, %v1799_v55  ;;  %v1801_v57 = vpop.eup %1800  ;;  %v2797_v54 = vld [vmem:[#allocation21_spill] sm:$0xff] }
 0x5ff   :  { %v1803_v44 = vpop.eup %1802  ;;  %v1273_v21 = vadd.f32 1.0, %v1801_v57 }
 0x600   :  { %1806 = vrcp.f32 %v1272_v56 }
 0x601   :  { %1808 = vrcp.f32 %v1273_v21 }
 0x60b   :  { %v1805_v16 = vpop.eup %1804 }
 0x60c   :  { %v1282_v10 = vmul.f32 %v1805_v16, %v1803_v44 }
 0x60d   :  { %v1807_v19 = vpop.eup %1806 }
 0x60e   :  { %v1281_v25 = vmul.f32 %v1807_v19, %v2538_v35  ;;  %v1809_v29 = vpop.eup %1808  ;;  %v1868_v35 = vld [vmem:[%s2752_s3 + $0x24] ss:$16 sps:$4 sm:$0xff]  }
 0x610   :  { %v2680_v23 = vadd.f32 %v1282_v10, %v1281_v25 }
 0x612   :  { %1810 = vtanh.f32 %v2680_v23 }
 0x61f   :  { %v1811_v9 = vpop.eup %1810 }
 0x620   :  { %v1285_v13 = vmul.f32 %v1811_v9, %v1809_v29  ;;  %v2798_v29 = vld [vmem:[#allocation22_spill] sm:$0xff] }
 0x622   :  { %v1286_v22 = vpack.c.bf16 %v1285_v13, %v1285_v13 }
 0x624   :  { %1320 = vmatmul.mubr.bf16.vlgmr.msra.gmra.mxu0 %v1286_v22  ;;  %1361 = vmatmul.mubr.bf16.vlgmr.msra.gmra.mxu1 %v1286_v22 }
 0x625   :  { %1399 = vmatpush1.bf16.msra.mxu0 %v2544_v18  ;;  %1440 = vmatpush1.bf16.msra.mxu1 %v2550_v30  ;;  %v1873_v18 = vld [vmem:[%s2752_s3 + $0xc] ss:$16 sps:$4 sm:$0xff]   ;;  %v1874_v30 = vld [vmem:[%s2752_s3] ss:$16 sps:$4 sm:$0xff]  }
 0x626   :  { %1400 = vmatprep.subr.bf16.mxu0 %v2556_v27  ;;  %1441 = vmatprep.subr.bf16.mxu1 %v2562_v24  ;;  %v1875_v27 = vld [vmem:[%s2752_s3 + $0x8] ss:$16 sps:$4 sm:$0xff]  }
 0x627   :  { %1430 = vmatprep.mubr.bf16.mxu0 %v2779_v14  ;;  %1471 = vmatprep.mubr.bf16.mxu1 %v2779_v14  ;;  %v1866_v14 = vld [vmem:[%s2752_s3 + $0x40] ss:$16 sps:$4 sm:$0xff]  }
 0x629   :  { %1401 = vmatpush1.bf16.msra.mxu0 %v2570_v62  ;;  %1442 = vmatpush1.bf16.msra.mxu1 %v2576_v28  ;;  %v2793_v28 = vld [vmem:[#allocation17_spill] sm:$0xff] }
 0x62a   :  { %1402 = vmatprep.subr.bf16.mxu0 %v2582_v8  ;;  %1443 = vmatprep.subr.bf16.mxu1 %v2588_v12 }
 0x62d   :  { %1403 = vmatpush1.bf16.msra.mxu0 %v2594_v11  ;;  %1444 = vmatpush1.bf16.msra.mxu1 %v2600_v26 }
 0x62e   :  { %1404 = vmatprep.subr.bf16.mxu0 %v2606_v7  ;;  %1445 = vmatprep.subr.bf16.mxu1 %v2612_v17  ;;  %v2794_v7 = vld [vmem:[#allocation19_spill] sm:$0xff] }
 0x631   :  { %1405 = vmatpush1.bf16.msra.mxu0 %v2618_v15  ;;  %1446 = vmatpush1.bf16.msra.mxu1 %v2624_v1 }
 0x632   :  { %1406 = vmatprep.subr.bf16.mxu0 %v2630_v38  ;;  %1447 = vmatprep.subr.bf16.mxu1 %v2636_v39 }
 0x635   :  { %1407 = vmatpush1.bf16.msra.mxu0 %v2642_v40  ;;  %1448 = vmatpush1.bf16.msra.mxu1 %v2648_v41  ;;  %v2795_v41 = vld [vmem:[#allocation18_spill] sm:$0xff] }
 0x636   :  { %1408 = vmatprep.subr.bf16.mxu0 %v2654_v42  ;;  %1449 = vmatprep.subr.bf16.mxu1 %v2660_v43 }
 0x639   :  { %1409 = vmatpush1.bf16.msra.mxu0 %v1866_v14  ;;  %1450 = vmatpush1.bf16.msra.mxu1 %v1867_v33 }
 0x63a   :  { %1410 = vmatprep.subr.bf16.mxu0 %v1868_v35  ;;  %1451 = vmatprep.subr.bf16.mxu1 %v1869_v34 }
 0x63d   :  { %1411 = vmatpush1.bf16.msra.mxu0 %v1870_v20  ;;  %1452 = vmatpush1.bf16.msra.mxu1 %v1871_v6 }
 0x63e   :  { %1412 = vmatprep.subr.bf16.mxu0 %v1872_v31  ;;  %1453 = vmatprep.subr.bf16.mxu1 %v1873_v18 }
 0x641   :  { %1413 = vmatpush1.bf16.msra.mxu0 %v1874_v30  ;;  %1454 = vmatpush1.bf16.msra.mxu1 %v1875_v27 }
 0x6e4   :  { %v1321_v24 = vpop.f32.mrf.mxu0  ;;  %v1362_v62 = vpop.f32.mrf.mxu1 }
 0x6e5   :  { %v1369_v8 = vadd.f32 %v1321_v24, %v2793_v28  ;;  %v1371_v42 = vadd.f32 %v1362_v62, %v2795_v41 }
 0x6e6   :  { %v1323_v12 = vpop.f32.mrf.mxu0  ;;  %v1364_v11 = vpop.f32.mrf.mxu1 }
 0x6e7   :  { %v1609_v26 = vmul.f32 -1.442695, %v1369_v8  ;;  %v1370_v17 = vadd.f32 %v1323_v12, %v2794_v7  ;;  %v1611_v43 = vmul.f32 -1.442695, %v1371_v42  ;;  %v1372_v59 = vadd.f32 %v1364_v11, %v2796_v58 }
 0x6e8   :  { %v1325_v15 = vpop.f32.mrf.mxu0  ;;  %v1366_v1 = vpop.f32.mrf.mxu1 }
 0x6e9   :  { %1812 = vpow2.f32 %v1609_v26  ;;  %v1610_v38 = vmul.f32 -1.442695, %v1370_v17 }
 0x6ea   :  { %v1326_v39 = vpop.f32.mrf.mxu0  ;;  %v1367_v40 = vpop.f32.mrf.mxu1 }
 0x6eb   :  { %1814 = vpow2.f32 %v1610_v38 }
 0x6ec   :  { %1816 = vpow2.f32 %v1611_v43 }
 0x6ed   :  { %1818 = vtanh.f32 %v1372_v59 }
 0x6f6   :  { %v1813_v60 = vpop.eup %1812 }
 0x6f7   :  { %v1382_v61 = vadd.f32 1.0, %v1813_v60 }
 0x6f8   :  { %v1815_v45 = vpop.eup %1814 }
 0x6f9   :  { %1820 = vrcp.f32 %v1382_v61  ;;  %v1383_v63 = vadd.f32 1.0, %v1815_v45  ;;  %v1817_v46 = vpop.eup %1816 }
 0x6fa   :  { %v1819_v0 = vpop.eup %1818  ;;  %v1384_v3 = vadd.f32 1.0, %v1817_v46 }
 0x6fb   :  { %1822 = vrcp.f32 %v1383_v63 }
 0x6fc   :  { %1824 = vrcp.f32 %v1384_v3 }
 0x706   :  { %v1821_v47 = vpop.eup %1820 }
 0x707   :  { %v1393_v2 = vmul.f32 %v1821_v47, %v1819_v0 }
 0x708   :  { %v1823_v48 = vpop.eup %1822 }
 0x709   :  { %v1392_v4 = vmul.f32 %v1823_v48, %v2680_v23  ;;  %v1825_v5 = vpop.eup %1824 }
 0x70b   :  { %v1394_v49 = vadd.f32 %v1393_v2, %v1392_v4 }
 0x70d   :  { %1826 = vtanh.f32 %v1394_v49 }
 0x71a   :  { %v1827_v36 = vpop.eup %1826 }
 0x71b   :  { %v1396_v50 = vmul.f32 %v1827_v36, %v1825_v5 }
 0x71d   :  { %v1397_v37 = vpack.c.bf16 %v1396_v50, %v1396_v50 }
 0x71f   :  { %1431 = vmatmul.mubr.bf16.vlgmr.msra.gmra.mxu0 %v1397_v37  ;;  %1472 = vmatmul.mubr.bf16.vlgmr.msra.gmra.mxu1 %v1397_v37 }
 0x7df   :  { %v1432_v51 = vpop.f32.mrf.mxu0  ;;  %v1473_v52 = vpop.f32.mrf.mxu1 }
 0x7e0   :  { %v1480_v55 = vadd.f32 %v1432_v51, %v2797_v54  ;;  %v1482_v9 = vadd.f32 %v1473_v52, %v2798_v29 }
 0x7e1   :  { %v1434_v56 = vpop.f32.mrf.mxu0  ;;  %v1475_v57 = vpop.f32.mrf.mxu1 }
 0x7e2   :  { %v1612_v44 = vmul.f32 -1.442695, %v1480_v55  ;;  %v1481_v16 = vadd.f32 %v1434_v56, %v2347_v32  ;;  %v1614_v13 = vmul.f32 -1.442695, %v1482_v9  ;;  %v1483_v22 = vadd.f32 %v1475_v57, %v2350_v53 }
 0x7e3   :  { %v1436_v10 = vpop.f32.mrf.mxu0  ;;  %v1477_v19 = vpop.f32.mrf.mxu1 }
 0x7e4   :  { %1828 = vpow2.f32 %v1612_v44  ;;  %v1613_v21 = vmul.f32 -1.442695, %v1481_v16 }
 0x7e5   :  { %v1437_v25 = vpop.f32.mrf.mxu0  ;;  %v1478_v23 = vpop.f32.mrf.mxu1 }
 0x7e6   :  { %1830 = vpow2.f32 %v1613_v21 }
 0x7e7   :  { %1832 = vpow2.f32 %v1614_v13 }
 0x7e8   :  { %1834 = vtanh.f32 %v1483_v22 }
 0x7f1   :  { %v1829_v14 = vpop.eup %1828 }
 0x7f2   :  { %v1493_v33 = vadd.f32 1.0, %v1829_v14 }
 0x7f3   :  { %v1831_v35 = vpop.eup %1830 }
 0x7f4   :  { %1836 = vrcp.f32 %v1493_v33  ;;  %v1494_v34 = vadd.f32 1.0, %v1831_v35  ;;  %v1833_v32 = vpop.eup %1832 }
 0x7f5   :  { %v1835_v20 = vpop.eup %1834  ;;  %v1495_v30 = vadd.f32 1.0, %v1833_v32 }
 0x7f6   :  { %1838 = vrcp.f32 %v1494_v34 }
 0x7f7   :  { %1840 = vrcp.f32 %v1495_v30 }
 0x801   :  { %v1837_v6 = vpop.eup %1836 }
 0x802   :  { %v1504_v31 = vmul.f32 %v1837_v6, %v1835_v20 }
 0x803   :  { %v1839_v18 = vpop.eup %1838 }
 0x804   :  { %v1503_v27 = vmul.f32 %v1839_v18, %v1394_v49  ;;  %v1841_v53 = vpop.eup %1840 }
 0x806   :  { %v1505_v24 = vadd.f32 %v1504_v31, %v1503_v27 }
 0x808   :  { %1842 = vtanh.f32 %v1505_v24  ;;  %1514 = vst [vmem:[%s2756_s7] sm:$0xff] %v1505_v24 }
 0x815   :  { %v1843_v62 = vpop.eup %1842 }
 0x816   :  { %v1507_v28 = vmul.f32 %v1843_v62, %v1841_v53 }
 0x818   :  { %1513 = vst [vmem:[%s2757_s6] sm:$0xff] %v1507_v28 }

// kernel: seq2seq_forward.4
= control target key start
LH: loop header
LB: loop body
LE: loop exit
PB: predicated region body
PF: predicated region fallthrough
CT: control target
= control target key end

     0   :  { %14 = vsyncpa [#allocation5], 0  ;;  %v5380_v2 = vmov 0   ;;  %s5371_s0 = inlined_call_operand.vmem [shape: bf16[8,8,128], index: 0, kind: input, shape index: {}]   ;;  %s5372_s1 = inlined_call_operand.vmem [shape: bf16[128,512], index: 1, kind: input, shape index: {}]   ;;  %s5373_s2 = inlined_call_operand.vmem [shape: f32[1,512], index: 2, kind: input, shape index: {}]   ;;  %s5374_s3 = inlined_call_operand.vmem [shape: bf16[128,512], index: 3, kind: input, shape index: {}]   ;;  %s5375_s4 = inlined_call_operand.vmem [shape: f32[8,128], index: 4, kind: input, shape index: {}]   ;;  %s5376_s5 = inlined_call_operand.vmem [shape: f32[8,128], index: 5, kind: input, shape index: {}]   ;;  %s5377_s6 = inlined_call_operand.vmem [shape: f32[8,8,128], index: 6, kind: output, shape index: {0}]   ;;  %s5378_s7 = inlined_call_operand.hbm [shape: f32[8,128], index: 7, kind: output, shape index: {1}]   ;;  %s5379_s8 = inlined_call_operand.hbm [shape: f32[8,128], index: 8, kind: output, shape index: {2}]  }
   0x1   :  { %v3774_v0 = vld [vmem:[%s5372_s1 + $0xe4] ss:$16 sps:$4 sm:$0xff]   ;;  %v3776_v1 = vld [vmem:[%s5372_s1 + $0xec] ss:$16 sps:$4 sm:$0xff]   ;;  %315 = vmatprep.mubr.bf16.mxu0 %v5380_v2  ;;  %388 = vmatprep.mubr.bf16.mxu1 %v5380_v2  ;;  %v3778_v3 = vld [vmem:[%s5372_s1 + $0xe0] ss:$16 sps:$4 sm:$0xff]  }
   0x2   :  { %283 = vmatprep.subr.bf16.mxu0 %v3774_v0  ;;  %v3779_v4 = vld [vmem:[%s5372_s1 + $0xe8] ss:$16 sps:$4 sm:$0xff]   ;;  %356 = vmatprep.subr.bf16.mxu1 %v3776_v1  ;;  %v3780_v5 = vld [vmem:[%s5372_s1 + $0xc4] ss:$16 sps:$4 sm:$0xff]   ;;  %v3782_v6 = vld [vmem:[%s5372_s1 + $0xcc] ss:$16 sps:$4 sm:$0xff]  }
   0x3   :  { %284 = vmatpush1.bf16.msra.mxu0 %v3778_v3  ;;  %357 = vmatpush1.bf16.msra.mxu1 %v3779_v4  ;;  %v3784_v7 = vld [vmem:[%s5372_s1 + $0xc0] ss:$16 sps:$4 sm:$0xff]   ;;  %v3785_v8 = vld [vmem:[%s5372_s1 + $0xc8] ss:$16 sps:$4 sm:$0xff]   ;;  %v3786_v9 = vld [vmem:[%s5372_s1 + $0xa4] ss:$16 sps:$4 sm:$0xff]  }
   0x4   :  { %285 = vmatprep.subr.bf16.mxu0 %v3780_v5  ;;  %358 = vmatprep.subr.bf16.mxu1 %v3782_v6  ;;  %v3788_v10 = vld [vmem:[%s5372_s1 + $0xac] ss:$16 sps:$4 sm:$0xff]   ;;  %v3790_v11 = vld [vmem:[%s5372_s1 + $0xa0] ss:$16 sps:$4 sm:$0xff]   ;;  %v3791_v12 = vld [vmem:[%s5372_s1 + $0xa8] ss:$16 sps:$4 sm:$0xff]  }
   0x5   :  { %v3792_v13 = vld [vmem:[%s5372_s1 + $0x84] ss:$16 sps:$4 sm:$0xff]   ;;  %v3794_v14 = vld [vmem:[%s5372_s1 + $0x8c] ss:$16 sps:$4 sm:$0xff]   ;;  %v3796_v15 = vld [vmem:[%s5372_s1 + $0x80] ss:$16 sps:$4 sm:$0xff]  }
   0x6   :  { %v3797_v16 = vld [vmem:[%s5372_s1 + $0x88] ss:$16 sps:$4 sm:$0xff]   ;;  %v3798_v17 = vld [vmem:[%s5372_s1 + $0x64] ss:$16 sps:$4 sm:$0xff]   ;;  %v3800_v18 = vld [vmem:[%s5372_s1 + $0x6c] ss:$16 sps:$4 sm:$0xff]  }
   0x7   :  { %286 = vmatpush1.bf16.msra.mxu0 %v3784_v7  ;;  %359 = vmatpush1.bf16.msra.mxu1 %v3785_v8  ;;  %v3802_v19 = vld [vmem:[%s5372_s1 + $0x60] ss:$16 sps:$4 sm:$0xff]   ;;  %v3803_v20 = vld [vmem:[%s5372_s1 + $0x68] ss:$16 sps:$4 sm:$0xff]   ;;  %v3804_v21 = vld [vmem:[%s5372_s1 + $0x44] ss:$16 sps:$4 sm:$0xff]  }
   0x8   :  { %287 = vmatprep.subr.bf16.mxu0 %v3786_v9  ;;  %360 = vmatprep.subr.bf16.mxu1 %v3788_v10  ;;  %v3806_v22 = vld [vmem:[%s5372_s1 + $0x4c] ss:$16 sps:$4 sm:$0xff]   ;;  %v3808_v23 = vld [vmem:[%s5372_s1 + $0x40] ss:$16 sps:$4 sm:$0xff]   ;;  %v3809_v24 = vld [vmem:[%s5372_s1 + $0x48] ss:$16 sps:$4 sm:$0xff]  }
   0x9   :  { %v3810_v25 = vld [vmem:[%s5372_s1 + $0x24] ss:$16 sps:$4 sm:$0xff]   ;;  %v3812_v26 = vld [vmem:[%s5372_s1 + $0x2c] ss:$16 sps:$4 sm:$0xff]   ;;  %v3814_v27 = vld [vmem:[%s5372_s1 + $0x20] ss:$16 sps:$4 sm:$0xff]  }
   0xa   :  { %v3815_v28 = vld [vmem:[%s5372_s1 + $0x28] ss:$16 sps:$4 sm:$0xff]   ;;  %v3816_v29 = vld [vmem:[%s5372_s1 + $0x4] ss:$16 sps:$4 sm:$0xff]   ;;  %v3818_v30 = vld [vmem:[%s5372_s1 + $0xc] ss:$16 sps:$4 sm:$0xff]  }
   0xb   :  { %288 = vmatpush1.bf16.msra.mxu0 %v3790_v11  ;;  %361 = vmatpush1.bf16.msra.mxu1 %v3791_v12  ;;  %v3820_v31 = vld [vmem:[%s5372_s1] ss:$16 sps:$4 sm:$0xff]   ;;  %v3821_v32 = vld [vmem:[%s5372_s1 + $0x8] ss:$16 sps:$4 sm:$0xff]   ;;  %v4292_v33 = vld [vmem:[%s5374_s3 + $0xe4] ss:$16 sps:$4 sm:$0xff]  }
   0xc   :  { %289 = vmatprep.subr.bf16.mxu0 %v3792_v13  ;;  %362 = vmatprep.subr.bf16.mxu1 %v3794_v14  ;;  %v4297_v34 = vld [vmem:[%s5374_s3 + $0xec] ss:$16 sps:$4 sm:$0xff]   ;;  %v3822_v35 = vld [vmem:[%s5371_s0] sm:$0xff]   ;;  %v4310_v37 = vld [vmem:[%s5374_s3 + $0xe8] ss:$16 sps:$4 sm:$0xff]  }
   0xd   :  { %v4305_v36 = vld [vmem:[%s5374_s3 + $0xe0] ss:$16 sps:$4 sm:$0xff]   ;;  %v4317_v38 = vld [vmem:[%s5374_s3 + $0xc4] ss:$16 sps:$4 sm:$0xff]   ;;  %v4322_v39 = vld [vmem:[%s5374_s3 + $0xcc] ss:$16 sps:$4 sm:$0xff]  }
   0xe   :  { %v4327_v40 = vld [vmem:[%s5374_s3 + $0xc0] ss:$16 sps:$4 sm:$0xff]   ;;  %v4334_v41 = vld [vmem:[%s5374_s3 + $0xc8] ss:$16 sps:$4 sm:$0xff]   ;;  %v4341_v42 = vld [vmem:[%s5374_s3 + $0xa4] ss:$16 sps:$4 sm:$0xff]  }
   0xf   :  { %290 = vmatpush1.bf16.msra.mxu0 %v3796_v15  ;;  %363 = vmatpush1.bf16.msra.mxu1 %v3797_v16  ;;  %v4346_v43 = vld [vmem:[%s5374_s3 + $0xac] ss:$16 sps:$4 sm:$0xff]   ;;  %v4356_v45 = vld [vmem:[%s5374_s3 + $0xa0] ss:$16 sps:$4 sm:$0xff]   ;;  %v4361_v46 = vld [vmem:[%s5374_s3 + $0xa8] ss:$16 sps:$4 sm:$0xff]  }
  0x10   :  { %291 = vmatprep.subr.bf16.mxu0 %v3798_v17  ;;  %364 = vmatprep.subr.bf16.mxu1 %v3800_v18  ;;  %v3835_v44 = vld [vmem:[%s5371_s0 + $0x8] sm:$0xff]   ;;  %v4368_v47 = vld [vmem:[%s5374_s3 + $0x84] ss:$16 sps:$4 sm:$0xff]   ;;  %v4380_v49 = vld [vmem:[%s5374_s3 + $0x80] ss:$16 sps:$4 sm:$0xff]  }
  0x11   :  { %v4375_v48 = vld [vmem:[%s5374_s3 + $0x8c] ss:$16 sps:$4 sm:$0xff]   ;;  %v4385_v50 = vld [vmem:[%s5374_s3 + $0x88] ss:$16 sps:$4 sm:$0xff]   ;;  %v4392_v51 = vld [vmem:[%s5374_s3 + $0x64] ss:$16 sps:$4 sm:$0xff]  }
  0x12   :  { %v4399_v52 = vld [vmem:[%s5374_s3 + $0x6c] ss:$16 sps:$4 sm:$0xff]   ;;  %v3848_v53 = vld [vmem:[%s5371_s0 + $0x10] sm:$0xff]   ;;  %v4414_v55 = vld [vmem:[%s5374_s3 + $0x68] ss:$16 sps:$4 sm:$0xff]  }
  0x13   :  { %292 = vmatpush1.bf16.msra.mxu0 %v3802_v19  ;;  %365 = vmatpush1.bf16.msra.mxu1 %v3803_v20  ;;  %v4409_v54 = vld [vmem:[%s5374_s3 + $0x60] ss:$16 sps:$4 sm:$0xff]   ;;  %v4419_v56 = vld [vmem:[%s5374_s3 + $0x44] ss:$16 sps:$4 sm:$0xff]   ;;  %v4424_v57 = vld [vmem:[%s5374_s3 + $0x4c] ss:$16 sps:$4 sm:$0xff]  }
  0x14   :  { %293 = vmatprep.subr.bf16.mxu0 %v3804_v21  ;;  %366 = vmatprep.subr.bf16.mxu1 %v3806_v22  ;;  %v4433_v58 = vld [vmem:[%s5374_s3 + $0x40] ss:$16 sps:$4 sm:$0xff]   ;;  %v4438_v59 = vld [vmem:[%s5374_s3 + $0x48] ss:$16 sps:$4 sm:$0xff]   ;;  %v4443_v60 = vld [vmem:[%s5374_s3 + $0x24] ss:$16 sps:$4 sm:$0xff]  }
  0x15   :  { %v4448_v61 = vld [vmem:[%s5374_s3 + $0x2c] ss:$16 sps:$4 sm:$0xff]   ;;  %v4462_v63 = vld [vmem:[%s5374_s3 + $0x20] ss:$16 sps:$4 sm:$0xff]   ;;  %v4467_v0 = vld [vmem:[%s5374_s3 + $0x28] ss:$16 sps:$4 sm:$0xff]  }
  0x16   :  { %v3861_v62 = vld [vmem:[%s5371_s0 + $0x18] sm:$0xff]   ;;  %v4472_v1 = vld [vmem:[%s5374_s3 + $0x4] ss:$16 sps:$4 sm:$0xff]   ;;  %v4486_v4 = vld [vmem:[%s5374_s3] ss:$16 sps:$4 sm:$0xff]  }
  0x17   :  { %294 = vmatpush1.bf16.msra.mxu0 %v3808_v23  ;;  %367 = vmatpush1.bf16.msra.mxu1 %v3809_v24  ;;  %v4477_v3 = vld [vmem:[%s5374_s3 + $0xc] ss:$16 sps:$4 sm:$0xff]   ;;  %v4491_v5 = vld [vmem:[%s5374_s3 + $0x8] ss:$16 sps:$4 sm:$0xff]   ;;  %v33_v6 = vld [vmem:[%s5375_s4] sm:$0xff] }
  0x18   :  { %295 = vmatprep.subr.bf16.mxu0 %v3810_v25  ;;  %368 = vmatprep.subr.bf16.mxu1 %v3812_v26  ;;  %v431_v7 = vpack.c.bf16 %v33_v6, %v33_v6 }
  0x1b   :  { %296 = vmatpush1.bf16.msra.mxu0 %v3814_v27  ;;  %369 = vmatpush1.bf16.msra.mxu1 %v3815_v28 }
  0x1c   :  { %297 = vmatprep.subr.bf16.mxu0 %v3816_v29  ;;  %370 = vmatprep.subr.bf16.mxu1 %v3818_v30 }
  0x1f   :  { %298 = vmatpush1.bf16.msra.mxu0 %v3820_v31  ;;  %371 = vmatpush1.bf16.msra.mxu1 %v3821_v32 }
  0x20   :  { %624 = vmatprep.subr.bf16.mxu0 %v4292_v33  ;;  %665 = vmatprep.subr.bf16.mxu1 %v4297_v34 }
  0x22   :  { %316 = vmatmul.mubr.bf16.vlgmr.msra.gmra.mxu0 %v3822_v35  ;;  %389 = vmatmul.mubr.bf16.vlgmr.msra.gmra.mxu1 %v3822_v35 }
  0x23   :  { %625 = vmatpush1.bf16.msra.mxu0 %v4305_v36  ;;  %666 = vmatpush1.bf16.msra.mxu1 %v4310_v37 }
  0x24   :  { %626 = vmatprep.subr.bf16.mxu0 %v4317_v38  ;;  %667 = vmatprep.subr.bf16.mxu1 %v4322_v39 }
  0x25   :  { %325 = vmatprep.mubr.bf16.mxu0 %v5380_v2  ;;  %398 = vmatprep.mubr.bf16.mxu1 %v5380_v2 }
  0x27   :  { %627 = vmatpush1.bf16.msra.mxu0 %v4327_v40  ;;  %668 = vmatpush1.bf16.msra.mxu1 %v4334_v41 }
  0x28   :  { %628 = vmatprep.subr.bf16.mxu0 %v4341_v42  ;;  %669 = vmatprep.subr.bf16.mxu1 %v4346_v43 }
  0x2a   :  { %326 = vmatmul.mubr.bf16.gmra.mxu0 %v3835_v44  ;;  %399 = vmatmul.mubr.bf16.gmra.mxu1 %v3835_v44 }
  0x2b   :  { %629 = vmatpush1.bf16.msra.mxu0 %v4356_v45  ;;  %670 = vmatpush1.bf16.msra.mxu1 %v4361_v46 }
  0x2c   :  { %630 = vmatprep.subr.bf16.mxu0 %v4368_v47  ;;  %671 = vmatprep.subr.bf16.mxu1 %v4375_v48 }
  0x2d   :  { %335 = vmatprep.mubr.bf16.mxu0 %v5380_v2  ;;  %408 = vmatprep.mubr.bf16.mxu1 %v5380_v2 }
  0x2f   :  { %631 = vmatpush1.bf16.msra.mxu0 %v4380_v49  ;;  %672 = vmatpush1.bf16.msra.mxu1 %v4385_v50 }
  0x30   :  { %632 = vmatprep.subr.bf16.mxu0 %v4392_v51  ;;  %673 = vmatprep.subr.bf16.mxu1 %v4399_v52 }
  0x32   :  { %336 = vmatmul.mubr.bf16.gmra.mxu0 %v3848_v53  ;;  %409 = vmatmul.mubr.bf16.gmra.mxu1 %v3848_v53 }
  0x33   :  { %633 = vmatpush1.bf16.msra.mxu0 %v4409_v54  ;;  %674 = vmatpush1.bf16.msra.mxu1 %v4414_v55 }
  0x34   :  { %634 = vmatprep.subr.bf16.mxu0 %v4419_v56  ;;  %675 = vmatprep.subr.bf16.mxu1 %v4424_v57 }
  0x35   :  { %345 = vmatprep.mubr.bf16.mxu0 %v5380_v2  ;;  %418 = vmatprep.mubr.bf16.mxu1 %v5380_v2 }
  0x37   :  { %635 = vmatpush1.bf16.msra.mxu0 %v4433_v58  ;;  %676 = vmatpush1.bf16.msra.mxu1 %v4438_v59 }
  0x38   :  { %636 = vmatprep.subr.bf16.mxu0 %v4443_v60  ;;  %677 = vmatprep.subr.bf16.mxu1 %v4448_v61 }
  0x3a   :  { %346 = vmatmul.mubr.bf16.gmra.mxu0 %v3861_v62  ;;  %419 = vmatmul.mubr.bf16.gmra.mxu1 %v3861_v62 }
  0x3b   :  { %637 = vmatpush1.bf16.msra.mxu0 %v4462_v63  ;;  %678 = vmatpush1.bf16.msra.mxu1 %v4467_v0 }
  0x3c   :  { %638 = vmatprep.subr.bf16.mxu0 %v4472_v1  ;;  %679 = vmatprep.subr.bf16.mxu1 %v4477_v3 }
  0x3d   :  { %656 = vmatprep.mubr.bf16.mxu0 %v5380_v2  ;;  %697 = vmatprep.mubr.bf16.mxu1 %v5380_v2 }
  0x3f   :  { %639 = vmatpush1.bf16.msra.mxu0 %v4486_v4  ;;  %680 = vmatpush1.bf16.msra.mxu1 %v4491_v5 }
  0x40   :  { %993 = vmatprep.subr.bf16.mxu0 %v4292_v33  ;;  %1034 = vmatprep.subr.bf16.mxu1 %v4297_v34 }
  0x42   :  { %657 = vmatmul.mubr.bf16.vlgmr.msra.gmra.mxu0 %v431_v7  ;;  %698 = vmatmul.mubr.bf16.vlgmr.msra.gmra.mxu1 %v431_v7 }
  0x43   :  { %994 = vmatpush1.bf16.msra.mxu0 %v4305_v36  ;;  %1035 = vmatpush1.bf16.msra.mxu1 %v4310_v37 }
  0x44   :  { %15 = vsyncpa [#allocation7], 0  ;;  %995 = vmatprep.subr.bf16.mxu0 %v4317_v38  ;;  %1036 = vmatprep.subr.bf16.mxu1 %v4322_v39  ;;  %v79_v8 = vlaneseq  ;;  %v77_v13 = vld [vmem:[%s5373_s2] sm:$0xf]  ;;  %s4144_s4 = smov [#allocation6]  }
  0x45   :  { %1025 = vmatprep.mubr.bf16.mxu0 %v5380_v2  ;;  %1066 = vmatprep.mubr.bf16.mxu1 %v5380_v2  ;;  %s3408_s29 = sshll.u32 %s4144_s4, 4  ;;  %s3409_s29 = int_to_ptr.vmem [resolvable:$true] %s3408_s29 }
  0x46   :  { %v4540_v9 = vshrl.u32 %v79_v8, 7  ;;  %s4098_s2 = scalar_lea.vmem %s3409_s29, 128  ;;  %p4103_p1 = scmp.lt.s32.totalorder %s3409_s29, %s3409_s29 }
  0x47   :  { %996 = vmatpush1.bf16.msra.mxu0 %v4327_v40  ;;  %1037 = vmatpush1.bf16.msra.mxu1 %v4334_v41  ;;  %p4099_p0 = scmp.ne.s32.totalorder %s3409_s29, %s4098_s2  ;;  %p4104_p2 = scmp.lt.s32.totalorder %s4098_s2, %s4098_s2 }
  0x48   :  { %997 = vmatprep.subr.bf16.mxu0 %v4341_v42  ;;  %1038 = vmatprep.subr.bf16.mxu1 %v4346_v43  ;;  %v89_v10 = vsub.s32 2, %v4540_v9  ;;  %v81_v11 = vsub.s32 0, %v4540_v9  ;;  %v93_v12 = vsub.s32 3, %v4540_v9  ;;  %v85_v17 = vsub.s32 1, %v4540_v9 }
  0x49   :  { %p4105_p3 = por %p4104_p2, %p4103_p1 }
  0x4a   :  { %v4552_v16 = vrot.slane %v77_v13, %v89_v10  ;;  %v82_v20 = vrot.slane %v77_v13, %v81_v11  ;;  %v4559_v21 = vrot.slane %v77_v13, %v93_v12  ;;  %v86_v24 = vrot.slane %v77_v13, %v85_v17 }
  0x4b   :  { %998 = vmatpush1.bf16.msra.mxu0 %v4356_v45  ;;  %1039 = vmatpush1.bf16.msra.mxu1 %v4361_v46  ;;  %p4106_p4 = pnand %p4105_p3, %p4099_p0 }
  0x4c   :  { %999 = vmatprep.subr.bf16.mxu0 %v4368_v47  ;;  %1040 = vmatprep.subr.bf16.mxu1 %v4375_v48 }
  0x4f   :  { %1000 = vmatpush1.bf16.msra.mxu0 %v4380_v49  ;;  %1041 = vmatpush1.bf16.msra.mxu1 %v4385_v50 }
  0x50   :  { %1001 = vmatprep.subr.bf16.mxu0 %v4392_v51  ;;  %1042 = vmatprep.subr.bf16.mxu1 %v4399_v52 }
  0x53   :  { %1002 = vmatpush1.bf16.msra.mxu0 %v4409_v54  ;;  %1043 = vmatpush1.bf16.msra.mxu1 %v4414_v55 }
  0x54   :  { %1003 = vmatprep.subr.bf16.mxu0 %v4419_v56  ;;  %1044 = vmatprep.subr.bf16.mxu1 %v4424_v57 }
  0x57   :  { %1004 = vmatpush1.bf16.msra.mxu0 %v4433_v58  ;;  %1045 = vmatpush1.bf16.msra.mxu1 %v4438_v59 }
  0x58   :  { %1005 = vmatprep.subr.bf16.mxu0 %v4443_v60  ;;  %1046 = vmatprep.subr.bf16.mxu1 %v4448_v61 }
  0x5b   :  { %1006 = vmatpush1.bf16.msra.mxu0 %v4462_v63  ;;  %1047 = vmatpush1.bf16.msra.mxu1 %v4467_v0 }
  0x5c   :  { %1007 = vmatprep.subr.bf16.mxu0 %v4472_v1  ;;  %1048 = vmatprep.subr.bf16.mxu1 %v4477_v3 }
  0x5f   :  { %1008 = vmatpush1.bf16.msra.mxu0 %v4486_v4  ;;  %1049 = vmatpush1.bf16.msra.mxu1 %v4491_v5 }
  0x60   :  { %1362 = vmatprep.subr.bf16.mxu0 %v4292_v33  ;;  %1403 = vmatprep.subr.bf16.mxu1 %v4297_v34 }
  0xe2   :  { %v4548_v14 = vpop.f32.mrf.mxu0  ;;  %v4550_v15 = vpop.f32.mrf.mxu1 }
  0xe4   :  { %v4555_v18 = vpop.f32.mrf.mxu0  ;;  %v4557_v19 = vpop.f32.mrf.mxu1 }
  0xe6   :  { %v321_v22 = vpop.f32.mrf.mxu0  ;;  %v394_v23 = vpop.f32.mrf.mxu1 }
  0xe7   :  { %v4561_v25 = vadd.f32 %v321_v22, %v82_v20  ;;  %v4564_v26 = vadd.f32 %v394_v23, %v4552_v16 }
  0xe8   :  { %v323_v27 = vpop.f32.mrf.mxu0  ;;  %v396_v28 = vpop.f32.mrf.mxu1 }
  0xe9   :  { %v4566_v29 = vadd.f32 %v323_v27, %v86_v24  ;;  %v4569_v30 = vadd.f32 %v396_v28, %v4559_v21 }
  0xea   :  { %v327_v31 = vpop.f32.mrf.mxu0  ;;  %v400_v32 = vpop.f32.mrf.mxu1 }
  0xeb   :  { %v4571_v33 = vadd.f32 %v327_v31, %v82_v20  ;;  %v4574_v34 = vadd.f32 %v400_v32, %v4552_v16 }
  0xec   :  { %v329_v35 = vpop.f32.mrf.mxu0  ;;  %v402_v44 = vpop.f32.mrf.mxu1 }
  0xed   :  { %v4576_v53 = vadd.f32 %v329_v35, %v86_v24  ;;  %v4579_v62 = vadd.f32 %v402_v44, %v4559_v21 }
  0xee   :  { %v331_v6 = vpop.f32.mrf.mxu0  ;;  %v404_v7 = vpop.f32.mrf.mxu1 }
  0xef   :  { %v4581_v8 = vadd.f32 %v331_v6, %v82_v20  ;;  %v4584_v10 = vadd.f32 %v404_v7, %v4552_v16 }
  0xf0   :  { %v333_v11 = vpop.f32.mrf.mxu0  ;;  %v406_v12 = vpop.f32.mrf.mxu1 }
  0xf1   :  { %5382 = vst [vmem:[#allocation10_spill] sm:$0xff] %v4581_v8  ;;  %5383 = vst [vmem:[#allocation11_spill] sm:$0xff] %v4584_v10  ;;  %v4586_v13 = vadd.f32 %v333_v11, %v86_v24  ;;  %v4589_v17 = vadd.f32 %v406_v12, %v4559_v21 }
  0xf2   :  { %v337_v22 = vpop.f32.mrf.mxu0  ;;  %v410_v23 = vpop.f32.mrf.mxu1 }
  0xf3   :  { %5384 = vst [vmem:[#allocation12_spill] sm:$0xff] %v4586_v13  ;;  %5385 = vst [vmem:[#allocation13_spill] sm:$0xff] %v4589_v17  ;;  %v4591_v27 = vadd.f32 %v337_v22, %v82_v20  ;;  %v4594_v28 = vadd.f32 %v410_v23, %v4552_v16 }
  0xf4   :  { %v339_v31 = vpop.f32.mrf.mxu0  ;;  %v412_v32 = vpop.f32.mrf.mxu1 }
  0xf5   :  { %5386 = vst [vmem:[#allocation14_spill] sm:$0xff] %v4591_v27  ;;  %5387 = vst [vmem:[#allocation15_spill] sm:$0xff] %v4594_v28  ;;  %v4596_v35 = vadd.f32 %v339_v31, %v86_v24  ;;  %v4599_v44 = vadd.f32 %v412_v32, %v4559_v21 }
  0xf6   :  { %v341_v6 = vpop.f32.mrf.mxu0  ;;  %v414_v7 = vpop.f32.mrf.mxu1 }
  0xf7   :  { %5388 = vst [vmem:[#allocation16_spill] sm:$0xff] %v4596_v35  ;;  %5389 = vst [vmem:[#allocation17_spill] sm:$0xff] %v4599_v44  ;;  %v4601_v11 = vadd.f32 %v341_v6, %v82_v20  ;;  %v4604_v12 = vadd.f32 %v414_v7, %v4552_v16 }
  0xf8   :  { %v343_v2 = vpop.f32.mrf.mxu0  ;;  %v416_v22 = vpop.f32.mrf.mxu1 }
  0xf9   :  { %5390 = vst [vmem:[#allocation18_spill] sm:$0xff] %v4601_v11  ;;  %5391 = vst [vmem:[#allocation19_spill] sm:$0xff] %v4604_v12  ;;  %v4606_v27 = vadd.f32 %v343_v2, %v86_v24  ;;  %v4609_v23 = vadd.f32 %v416_v22, %v4559_v21 }
  0xfa   :  { %v347_v28 = vpop.f32.mrf.mxu0  ;;  %v420_v31 = vpop.f32.mrf.mxu1 }
  0xfb   :  { %5392 = vst [vmem:[#allocation20_spill] sm:$0xff] %v4606_v27  ;;  %5393 = vst [vmem:[#allocation21_spill] sm:$0xff] %v4609_v23  ;;  %v4611_v35 = vadd.f32 %v347_v28, %v82_v20  ;;  %v4614_v32 = vadd.f32 %v420_v31, %v4552_v16 }
  0xfc   :  { %v349_v44 = vpop.f32.mrf.mxu0  ;;  %v422_v6 = vpop.f32.mrf.mxu1 }
  0xfd   :  { %5394 = vst [vmem:[#allocation22_spill] sm:$0xff] %v4611_v35  ;;  %5395 = vst [vmem:[#allocation23_spill] sm:$0xff] %v4614_v32  ;;  %v4616_v11 = vadd.f32 %v349_v44, %v86_v24  ;;  %v4619_v7 = vadd.f32 %v422_v6, %v4559_v21  ;;  %v318_v35 = vadd.f32 %v4548_v14, %v82_v20 }
  0xfe   :  { %v351_v12 = vpop.f32.mrf.mxu0  ;;  %v424_v2 = vpop.f32.mrf.mxu1  ;;  %v320_v6 = vadd.f32 %v4555_v18, %v86_v24 }
  0xff   :  { %5396 = vst [vmem:[#allocation24_spill] sm:$0xff] %v4616_v11  ;;  %5397 = vst [vmem:[#allocation25_spill] sm:$0xff] %v4619_v7  ;;  %v4621_v27 = vadd.f32 %v351_v12, %v82_v20  ;;  %v4624_v22 = vadd.f32 %v424_v2, %v4552_v16  ;;  %v391_v20 = vadd.f32 %v4550_v15, %v4552_v16  ;;  %v35_v15 = vld [vmem:[%s5376_s5] sm:$0xff] }
 0x100   :  { %v353_v23 = vpop.f32.mrf.mxu0  ;;  %v426_v28 = vpop.f32.mrf.mxu1 }
 0x101   :  { %5398 = vst [vmem:[#allocation26_spill] sm:$0xff] %v4621_v27  ;;  %5399 = vst [vmem:[#allocation27_spill] sm:$0xff] %v4624_v22  ;;  %v4627_v31 = vadd.f32 %v353_v23, %v86_v24  ;;  %v4630_v32 = vadd.f32 %v426_v28, %v4559_v21  ;;  %v393_v28 = vadd.f32 %v4557_v19, %v4559_v21 }
 0x102   :  { %v658_v44 = vpop.f32.mrf.mxu0  ;;  %v699_v11 = vpop.f32.mrf.mxu1 }
 0x103   :  { %v706_v7 = vadd.f32 %v658_v44, %v318_v35  ;;  %v708_v23 = vadd.f32 %v699_v11, %v391_v20 }
 0x104   :  { %v660_v17 = vpop.f32.mrf.mxu0  ;;  %v701_v12 = vpop.f32.mrf.mxu1 }
 0x105   :  { %v3490_v27 = vmul.f32 -1.442695, %v706_v7  ;;  %v707_v10 = vadd.f32 %v660_v17, %v320_v6  ;;  %v3492_v18 = vmul.f32 -1.442695, %v708_v23  ;;  %v709_v35 = vadd.f32 %v701_v12, %v393_v28 }
 0x106   :  { %v662_v2 = vpop.f32.mrf.mxu0  ;;  %v703_v22 = vpop.f32.mrf.mxu1 }
 0x107   :  { %3970 = vpow2.f32 %v3490_v27  ;;  %v3491_v13 = vmul.f32 -1.442695, %v707_v10  ;;  %v4143_v22 = vmov 1966171168  }
 0x108   :  { %v663_v8 = vpop.f32.mrf.mxu0  ;;  %v704_v14 = vpop.f32.mrf.mxu1  ;;  %v737_v6 = vunpack.c.l.s4 %v4143_v22 }
 0x109   :  { %3972 = vpow2.f32 %v3491_v13 }
 0x10a   :  { %3974 = vpow2.f32 %v3492_v18  ;;  %v738_v12 = vunpack.c.0.s8 %v737_v6 }
 0x10c   :  { %v4644_v14 = vsub.s32 %v738_v12, %v4540_v9 }
 0x114   :  { %v3971_v24 = vpop.eup %3970 }
 0x115   :  { %v719_v44 = vadd.f32 1.0, %v3971_v24 }
 0x116   :  { %v3973_v7 = vpop.eup %3972 }
 0x117   :  { %3976 = vrcp.f32 %v719_v44  ;;  %v720_v17 = vadd.f32 1.0, %v3973_v7  ;;  %v3975_v8 = vpop.eup %3974 }
 0x118   :  { %3978 = vtanh.f32 %v709_v35  ;;  %v721_v27 = vadd.f32 1.0, %v3975_v8 }
 0x119   :  { %3980 = vrcp.f32 %v720_v17 }
 0x11a   :  { %3982 = vrcp.f32 %v721_v27 }
 0x124   :  { %v3977_v10 = vpop.eup %3976 }
 0x125   :  { %v3979_v16 = vpop.eup %3978 }
 0x126   :  { %v3981_v13 = vpop.eup %3980  ;;  %v730_v21 = vmul.f32 %v3979_v16, %v3977_v10 }
 0x127   :  { %v729_v19 = vmul.f32 %v3981_v13, %v35_v15  ;;  %v3983_v2 = vpop.eup %3982 }
 0x129   :  { %v4640_v11 = vadd.f32 %v730_v21, %v729_v19 }
 0x12b   :  { %3984 = vtanh.f32 %v4640_v11 }
 0x138   :  { %v3985_v20 = vpop.eup %3984 }
 0x139   :  { %v733_v23 = vmul.f32 %v3985_v20, %v3983_v2 }
 0x13b   :  { %v735_v28 = vcombine.high %v733_v23, %v733_v23  ;;  %v742_v18 = vrot.slane %v733_v23, %v4644_v14  ;;  %v800_v24 = vpack.c.bf16 %v733_v23, %v733_v23 }
 0x13d   :  { %v749_v35 = vrot.slane %v735_v28, %v4644_v14  ;;  %v750_v44 = vcombine.high %v742_v18, %v742_v18  ;;  %v758_v7 = vrot.slane %v742_v18, %v4644_v14  ;;  %3493 = vst.sshfl [vmem:[%s5377_s6] sm:$0x1 pattern:$0x73625140] %v742_v18  ;;  %1026 = vmatmul.mubr.bf16.vlgmr.msra.gmra.mxu0 %v800_v24 }
 0x13e   :  { %1067 = vmatmul.mubr.bf16.vlgmr.msra.gmra.mxu1 %v800_v24  ;;  %1363 = vmatpush1.bf16.msra.mxu0 %v4305_v36  ;;  %v5400_v36 = vmov 0   ;;  %v4751_v24 = vld [vmem:[%s5374_s3 + $0xe4] ss:$16 sps:$4 sm:$0xff]  }
 0x13f   :  { %1404 = vmatpush1.bf16.msra.mxu1 %v4310_v37  ;;  %v751_v9 = vcombine.high %v749_v35, %v749_v35  ;;  %v765_v17 = vrot.slane %v749_v35, %v4644_v14  ;;  %v772_v8 = vrot.slane %v750_v44, %v4644_v14  ;;  %v780_v10 = vcombine.high %v758_v7, %v758_v7  ;;  %v4766_v7 = vld [vmem:[%s5374_s3 + $0xe8] ss:$16 sps:$4 sm:$0xff]  }
 0x140   :  { %3494 = vst.sshfl [vmem:[%s5377_s6 + $0x8] sm:$0x1 pattern:$0x73625140] %v750_v44  ;;  %1364 = vmatprep.subr.bf16.mxu0 %v4317_v38  ;;  %1405 = vmatprep.subr.bf16.mxu1 %v4322_v39  ;;  %v4761_v44 = vld [vmem:[%s5374_s3 + $0xe0] ss:$16 sps:$4 sm:$0xff]  }
 0x141   :  { %3495 = vst.sshfl [vmem:[%s5377_s6 + $0x20] sm:$0x1 pattern:$0x73625140] %v749_v35  ;;  %1394 = vmatprep.mubr.bf16.mxu0 %v5400_v36  ;;  %v779_v37 = vrot.slane %v751_v9, %v4644_v14  ;;  %v781_v15 = vcombine.high %v765_v17, %v765_v17  ;;  %v782_v16 = vcombine.high %v772_v8, %v772_v8  ;;  %794 = vst [vmem:[%s5377_s6 + $0x10] sm:$0x1] %v780_v10 }
 0x142   :  { %3496 = vst.sshfl [vmem:[%s5377_s6 + $0x28] sm:$0x1 pattern:$0x73625140] %v751_v9  ;;  %1435 = vmatprep.mubr.bf16.mxu1 %v5400_v36  ;;  %1365 = vmatpush1.bf16.msra.mxu0 %v4327_v40  ;;  %v4756_v35 = vld [vmem:[%s5374_s3 + $0xec] ss:$16 sps:$4 sm:$0xff]  }
 0x143   :  { %1406 = vmatpush1.bf16.msra.mxu1 %v4334_v41  ;;  %v783_v38 = vcombine.high %v779_v37, %v779_v37  ;;  %795 = vst [vmem:[%s5377_s6 + $0x18] sm:$0x1] %v782_v16  ;;  %798 = vst [vmem:[%s5377_s6 + $0x30] sm:$0x1] %v781_v15  ;;  %1366 = vmatprep.subr.bf16.mxu0 %v4341_v42  ;;  %v4775_v9 = vld [vmem:[%s5374_s3 + $0xc4] ss:$16 sps:$4 sm:$0xff]  }
 0x144   :  { %1407 = vmatprep.subr.bf16.mxu1 %v4346_v43  ;;  %v4780_v17 = vld [vmem:[%s5374_s3 + $0xcc] ss:$16 sps:$4 sm:$0xff]   ;;  %v4785_v8 = vld [vmem:[%s5374_s3 + $0xc0] ss:$16 sps:$4 sm:$0xff]   ;;  %v4790_v10 = vld [vmem:[%s5374_s3 + $0xc8] ss:$16 sps:$4 sm:$0xff]  }
 0x145   :  { %799 = vst [vmem:[%s5377_s6 + $0x38] sm:$0x1] %v783_v38  ;;  %v4799_v37 = vld [vmem:[%s5374_s3 + $0xa4] ss:$16 sps:$4 sm:$0xff]   ;;  %v4804_v15 = vld [vmem:[%s5374_s3 + $0xac] ss:$16 sps:$4 sm:$0xff]  }
 0x146   :  { %1367 = vmatpush1.bf16.msra.mxu0 %v4356_v45  ;;  %v4809_v16 = vld [vmem:[%s5374_s3 + $0xa0] ss:$16 sps:$4 sm:$0xff]   ;;  %v4814_v38 = vld [vmem:[%s5374_s3 + $0xa8] ss:$16 sps:$4 sm:$0xff]  }
 0x147   :  { %1408 = vmatpush1.bf16.msra.mxu1 %v4361_v46  ;;  %1368 = vmatprep.subr.bf16.mxu0 %v4368_v47 }
 0x148   :  { %1409 = vmatprep.subr.bf16.mxu1 %v4375_v48 }
 0x14a   :  { %1369 = vmatpush1.bf16.msra.mxu0 %v4380_v49 }
 0x14b   :  { %1410 = vmatpush1.bf16.msra.mxu1 %v4385_v50  ;;  %1370 = vmatprep.subr.bf16.mxu0 %v4392_v51 }
 0x14c   :  { %1411 = vmatprep.subr.bf16.mxu1 %v4399_v52 }
 0x14e   :  { %1371 = vmatpush1.bf16.msra.mxu0 %v4409_v54 }
 0x14f   :  { %1412 = vmatpush1.bf16.msra.mxu1 %v4414_v55  ;;  %1372 = vmatprep.subr.bf16.mxu0 %v4419_v56 }
 0x150   :  { %1413 = vmatprep.subr.bf16.mxu1 %v4424_v57 }
 0x152   :  { %1373 = vmatpush1.bf16.msra.mxu0 %v4433_v58 }
 0x153   :  { %1414 = vmatpush1.bf16.msra.mxu1 %v4438_v59  ;;  %1374 = vmatprep.subr.bf16.mxu0 %v4443_v60 }
 0x154   :  { %1415 = vmatprep.subr.bf16.mxu1 %v4448_v61 }
 0x156   :  { %1375 = vmatpush1.bf16.msra.mxu0 %v4462_v63 }
 0x157   :  { %1416 = vmatpush1.bf16.msra.mxu1 %v4467_v0  ;;  %1376 = vmatprep.subr.bf16.mxu0 %v4472_v1 }
 0x158   :  { %1417 = vmatprep.subr.bf16.mxu1 %v4477_v3 }
 0x15a   :  { %1377 = vmatpush1.bf16.msra.mxu0 %v4486_v4 }
 0x15b   :  { %1418 = vmatpush1.bf16.msra.mxu1 %v4491_v5  ;;  %1731 = vmatprep.subr.bf16.mxu0 %v4751_v24 }
 0x15c   :  { %1772 = vmatprep.subr.bf16.mxu1 %v4756_v35 }
 0x1fd   :  { %v1027_v39 = vpop.f32.mrf.mxu0 }
 0x1fe   :  { %v1068_v40 = vpop.f32.mrf.mxu1  ;;  %v1075_v41 = vadd.f32 %v1027_v39, %v4561_v25  ;;  %v4823_v39 = vld [vmem:[%s5374_s3 + $0x84] ss:$16 sps:$4 sm:$0xff]  }
 0x1ff   :  { %v1029_v42 = vpop.f32.mrf.mxu0  ;;  %v1077_v52 = vadd.f32 %v1068_v40, %v4564_v26  ;;  %v4828_v40 = vld [vmem:[%s5374_s3 + $0x8c] ss:$16 sps:$4 sm:$0xff]  }
 0x200   :  { %v1070_v43 = vpop.f32.mrf.mxu1  ;;  %v3529_v45 = vmul.f32 -1.442695, %v1075_v41  ;;  %v1076_v46 = vadd.f32 %v1029_v42, %v4566_v29  ;;  %v4833_v41 = vld [vmem:[%s5374_s3 + $0x80] ss:$16 sps:$4 sm:$0xff]   ;;  %v4838_v42 = vld [vmem:[%s5374_s3 + $0x88] ss:$16 sps:$4 sm:$0xff]  }
 0x201   :  { %v1031_v47 = vpop.f32.mrf.mxu0  ;;  %v3531_v54 = vmul.f32 -1.442695, %v1077_v52  ;;  %v1078_v55 = vadd.f32 %v1070_v43, %v4569_v30  ;;  %v4845_v43 = vld [vmem:[%s5374_s3 + $0x64] ss:$16 sps:$4 sm:$0xff]  }
 0x202   :  { %v1072_v48 = vpop.f32.mrf.mxu1  ;;  %3986 = vpow2.f32 %v3529_v45  ;;  %v3530_v49 = vmul.f32 -1.442695, %v1076_v46  ;;  %v4850_v45 = vld [vmem:[%s5374_s3 + $0x6c] ss:$16 sps:$4 sm:$0xff]   ;;  %v4857_v46 = vld [vmem:[%s5374_s3 + $0x60] ss:$16 sps:$4 sm:$0xff]  }
 0x203   :  { %v1032_v50 = vpop.f32.mrf.mxu0  ;;  %v4862_v47 = vld [vmem:[%s5374_s3 + $0x68] ss:$16 sps:$4 sm:$0xff]   ;;  %v4869_v48 = vld [vmem:[%s5374_s3 + $0x44] ss:$16 sps:$4 sm:$0xff]  }
 0x204   :  { %v1073_v51 = vpop.f32.mrf.mxu1  ;;  %3988 = vpow2.f32 %v3530_v49  ;;  %v4874_v49 = vld [vmem:[%s5374_s3 + $0x4c] ss:$16 sps:$4 sm:$0xff]   ;;  %v4881_v50 = vld [vmem:[%s5374_s3 + $0x40] ss:$16 sps:$4 sm:$0xff]   ;;  %v4893_v52 = vld [vmem:[%s5374_s3 + $0x24] ss:$16 sps:$4 sm:$0xff]  }
 0x205   :  { %3990 = vpow2.f32 %v3531_v54  ;;  %v4886_v51 = vld [vmem:[%s5374_s3 + $0x48] ss:$16 sps:$4 sm:$0xff]   ;;  %v4898_v54 = vld [vmem:[%s5374_s3 + $0x2c] ss:$16 sps:$4 sm:$0xff]  }
 0x206   :  { %3992 = vtanh.f32 %v1078_v55  ;;  %v4905_v55 = vld [vmem:[%s5374_s3 + $0x20] ss:$16 sps:$4 sm:$0xff]  }
 0x20f   :  { %v3987_v56 = vpop.eup %3986 }
 0x210   :  { %v1088_v57 = vadd.f32 1.0, %v3987_v56  ;;  %v4910_v56 = vld [vmem:[%s5374_s3 + $0x28] ss:$16 sps:$4 sm:$0xff]  }
 0x211   :  { %v3989_v58 = vpop.eup %3988 }
 0x212   :  { %3994 = vrcp.f32 %v1088_v57  ;;  %v1089_v59 = vadd.f32 1.0, %v3989_v58  ;;  %v3991_v60 = vpop.eup %3990  ;;  %v4917_v57 = vld [vmem:[%s5374_s3 + $0x4] ss:$16 sps:$4 sm:$0xff]   ;;  %v4922_v58 = vld [vmem:[%s5374_s3 + $0xc] ss:$16 sps:$4 sm:$0xff]  }
 0x213   :  { %v3993_v61 = vpop.eup %3992  ;;  %v1090_v3 = vadd.f32 1.0, %v3991_v60  ;;  %v4934_v60 = vld [vmem:[%s5374_s3 + $0x8] ss:$16 sps:$4 sm:$0xff]  }
 0x214   :  { %3996 = vrcp.f32 %v1089_v59  ;;  %v4929_v59 = vld [vmem:[%s5374_s3] ss:$16 sps:$4 sm:$0xff]  }
 0x215   :  { %3998 = vrcp.f32 %v1090_v3 }
 0x21f   :  { %v3995_v63 = vpop.eup %3994 }
 0x220   :  { %v1099_v0 = vmul.f32 %v3995_v63, %v3993_v61 }
 0x221   :  { %v3997_v1 = vpop.eup %3996 }
 0x222   :  { %v1098_v4 = vmul.f32 %v3997_v1, %v4640_v11  ;;  %v3999_v25 = vpop.eup %3998 }
 0x224   :  { %v4713_v5 = vadd.f32 %v1099_v0, %v1098_v4 }
 0x226   :  { %4000 = vtanh.f32 %v4713_v5 }
 0x233   :  { %v4001_v26 = vpop.eup %4000 }
 0x234   :  { %v1102_v29 = vmul.f32 %v4001_v26, %v3999_v25 }
 0x236   :  { %v1104_v30 = vcombine.high %v1102_v29, %v1102_v29  ;;  %v1111_v13 = vrot.slane %v1102_v29, %v4644_v14  ;;  %v1169_v27 = vpack.c.bf16 %v1102_v29, %v1102_v29 }
 0x238   :  { %v1118_v19 = vrot.slane %v1104_v30, %v4644_v14  ;;  %v1119_v21 = vcombine.high %v1111_v13, %v1111_v13  ;;  %v1127_v22 = vrot.slane %v1111_v13, %v4644_v14  ;;  %3532 = vst.sshfl [vmem:[%s5377_s6 + $0x1] sm:$0x1 pattern:$0x73625140] %v1111_v13  ;;  %1395 = vmatmul.mubr.bf16.vlgmr.msra.gmra.mxu0 %v1169_v27 }
 0x239   :  { %1436 = vmatmul.mubr.bf16.vlgmr.msra.gmra.mxu1 %v1169_v27  ;;  %1763 = vmatprep.mubr.bf16.mxu0 %v5400_v36 }
 0x23a   :  { %1804 = vmatprep.mubr.bf16.mxu1 %v5400_v36  ;;  %v1120_v11 = vcombine.high %v1118_v19, %v1118_v19  ;;  %v1134_v6 = vrot.slane %v1118_v19, %v4644_v14  ;;  %v1141_v12 = vrot.slane %v1119_v21, %v4644_v14  ;;  %v1149_v2 = vcombine.high %v1127_v22, %v1127_v22 }
 0x23b   :  { %3533 = vst.sshfl [vmem:[%s5377_s6 + $0x9] sm:$0x1 pattern:$0x73625140] %v1119_v21  ;;  %1732 = vmatpush1.bf16.msra.mxu0 %v4761_v44  ;;  %1773 = vmatpush1.bf16.msra.mxu1 %v4766_v7 }
 0x23c   :  { %3534 = vst.sshfl [vmem:[%s5377_s6 + $0x21] sm:$0x1 pattern:$0x73625140] %v1118_v19  ;;  %v1148_v20 = vrot.slane %v1120_v11, %v4644_v14  ;;  %v1150_v23 = vcombine.high %v1134_v6, %v1134_v6  ;;  %v1151_v28 = vcombine.high %v1141_v12, %v1141_v12  ;;  %1163 = vst [vmem:[%s5377_s6 + $0x11] sm:$0x1] %v1149_v2  ;;  %1733 = vmatprep.subr.bf16.mxu0 %v4775_v9 }
 0x23d   :  { %3535 = vst.sshfl [vmem:[%s5377_s6 + $0x29] sm:$0x1 pattern:$0x73625140] %v1120_v11  ;;  %1774 = vmatprep.subr.bf16.mxu1 %v4780_v17 }
 0x23e   :  { %v1152_v18 = vcombine.high %v1148_v20, %v1148_v20  ;;  %1164 = vst [vmem:[%s5377_s6 + $0x19] sm:$0x1] %v1151_v28  ;;  %1167 = vst [vmem:[%s5377_s6 + $0x31] sm:$0x1] %v1150_v23 }
 0x23f   :  { %1734 = vmatpush1.bf16.msra.mxu0 %v4785_v8  ;;  %1775 = vmatpush1.bf16.msra.mxu1 %v4790_v10 }
 0x240   :  { %1168 = vst [vmem:[%s5377_s6 + $0x39] sm:$0x1] %v1152_v18  ;;  %1735 = vmatprep.subr.bf16.mxu0 %v4799_v37  ;;  %1776 = vmatprep.subr.bf16.mxu1 %v4804_v15 }
 0x243   :  { %1736 = vmatpush1.bf16.msra.mxu0 %v4809_v16  ;;  %1777 = vmatpush1.bf16.msra.mxu1 %v4814_v38 }
 0x244   :  { %1737 = vmatprep.subr.bf16.mxu0 %v4823_v39  ;;  %1778 = vmatprep.subr.bf16.mxu1 %v4828_v40 }
 0x247   :  { %1738 = vmatpush1.bf16.msra.mxu0 %v4833_v41  ;;  %1779 = vmatpush1.bf16.msra.mxu1 %v4838_v42 }
 0x248   :  { %1739 = vmatprep.subr.bf16.mxu0 %v4845_v43  ;;  %1780 = vmatprep.subr.bf16.mxu1 %v4850_v45 }
 0x24b   :  { %1740 = vmatpush1.bf16.msra.mxu0 %v4857_v46  ;;  %1781 = vmatpush1.bf16.msra.mxu1 %v4862_v47 }
 0x24c   :  { %1741 = vmatprep.subr.bf16.mxu0 %v4869_v48  ;;  %1782 = vmatprep.subr.bf16.mxu1 %v4874_v49 }
 0x24f   :  { %1742 = vmatpush1.bf16.msra.mxu0 %v4881_v50  ;;  %1783 = vmatpush1.bf16.msra.mxu1 %v4886_v51 }
 0x250   :  { %1743 = vmatprep.subr.bf16.mxu0 %v4893_v52  ;;  %1784 = vmatprep.subr.bf16.mxu1 %v4898_v54 }
 0x253   :  { %1744 = vmatpush1.bf16.msra.mxu0 %v4905_v55  ;;  %1785 = vmatpush1.bf16.msra.mxu1 %v4910_v56 }
 0x254   :  { %1745 = vmatprep.subr.bf16.mxu0 %v4917_v57  ;;  %1786 = vmatprep.subr.bf16.mxu1 %v4922_v58 }
 0x257   :  { %1746 = vmatpush1.bf16.msra.mxu0 %v4929_v59  ;;  %1787 = vmatpush1.bf16.msra.mxu1 %v4934_v60 }
 0x258   :  { %2100 = vmatprep.subr.bf16.mxu0 %v4751_v24  ;;  %2141 = vmatprep.subr.bf16.mxu1 %v4756_v35 }
 0x2f8   :  { %v1396_v61 = vpop.f32.mrf.mxu0 }
 0x2f9   :  { %v1437_v63 = vpop.f32.mrf.mxu1  ;;  %v1444_v0 = vadd.f32 %v1396_v61, %v4571_v33 }
 0x2fa   :  { %v1398_v1 = vpop.f32.mrf.mxu0  ;;  %v1446_v19 = vadd.f32 %v1437_v63, %v4574_v34 }
 0x2fb   :  { %v1439_v3 = vpop.f32.mrf.mxu1  ;;  %v3568_v4 = vmul.f32 -1.442695, %v1444_v0  ;;  %v1445_v25 = vadd.f32 %v1398_v1, %v4576_v53 }
 0x2fc   :  { %v1400_v26 = vpop.f32.mrf.mxu0  ;;  %v3570_v21 = vmul.f32 -1.442695, %v1446_v19  ;;  %v1447_v22 = vadd.f32 %v1439_v3, %v4579_v62 }
 0x2fd   :  { %v1441_v29 = vpop.f32.mrf.mxu1  ;;  %4002 = vpow2.f32 %v3568_v4  ;;  %v3569_v30 = vmul.f32 -1.442695, %v1445_v25 }
 0x2fe   :  { %v1401_v13 = vpop.f32.mrf.mxu0 }
 0x2ff   :  { %v1442_v27 = vpop.f32.mrf.mxu1  ;;  %4004 = vpow2.f32 %v3569_v30 }
 0x300   :  { %4006 = vpow2.f32 %v3570_v21 }
 0x301   :  { %4008 = vtanh.f32 %v1447_v22 }
 0x30a   :  { %v4003_v11 = vpop.eup %4002 }
 0x30b   :  { %v1457_v6 = vadd.f32 1.0, %v4003_v11 }
 0x30c   :  { %v4005_v33 = vpop.eup %4004 }
 0x30d   :  { %4010 = vrcp.f32 %v1457_v6  ;;  %v1458_v12 = vadd.f32 1.0, %v4005_v33  ;;  %v4007_v53 = vpop.eup %4006 }
 0x30e   :  { %v4009_v2 = vpop.eup %4008  ;;  %v1459_v18 = vadd.f32 1.0, %v4007_v53 }
 0x30f   :  { %4012 = vrcp.f32 %v1458_v12  ;;  %v5401_v12 = vld [vmem:[#allocation10_spill] sm:$0xff] }
 0x310   :  { %4014 = vrcp.f32 %v1459_v18 }
 0x31a   :  { %v4011_v20 = vpop.eup %4010 }
 0x31b   :  { %v1468_v23 = vmul.f32 %v4011_v20, %v4009_v2 }
 0x31c   :  { %v4013_v28 = vpop.eup %4012 }
 0x31d   :  { %v1467_v61 = vmul.f32 %v4013_v28, %v4713_v5  ;;  %v4015_v62 = vpop.eup %4014  ;;  %v5402_v28 = vld [vmem:[#allocation12_spill] sm:$0xff] }
 0x31f   :  { %v4947_v34 = vadd.f32 %v1468_v23, %v1467_v61 }
 0x321   :  { %4016 = vtanh.f32 %v4947_v34 }
 0x32e   :  { %v4017_v63 = vpop.eup %4016 }
 0x32f   :  { %v1471_v0 = vmul.f32 %v4017_v63, %v4015_v62 }
 0x331   :  { %v1473_v1 = vcombine.high %v1471_v0, %v1471_v0  ;;  %v1480_v3 = vrot.slane %v1471_v0, %v4644_v14  ;;  %v1538_v4 = vpack.c.bf16 %v1471_v0, %v1471_v0 }
 0x333   :  { %v1487_v25 = vrot.slane %v1473_v1, %v4644_v14  ;;  %v1488_v26 = vcombine.high %v1480_v3, %v1480_v3  ;;  %v1496_v29 = vrot.slane %v1480_v3, %v4644_v14  ;;  %3571 = vst.sshfl [vmem:[%s5377_s6 + $0x2] sm:$0x1 pattern:$0x73625140] %v1480_v3  ;;  %1764 = vmatmul.mubr.bf16.vlgmr.msra.gmra.mxu0 %v1538_v4  ;;  %v5403_v3 = vld [vmem:[#allocation11_spill] sm:$0xff] }
 0x334   :  { %1805 = vmatmul.mubr.bf16.vlgmr.msra.gmra.mxu1 %v1538_v4  ;;  %2101 = vmatpush1.bf16.msra.mxu0 %v4761_v44 }
 0x335   :  { %2142 = vmatpush1.bf16.msra.mxu1 %v4766_v7  ;;  %v1489_v5 = vcombine.high %v1487_v25, %v1487_v25  ;;  %v1503_v30 = vrot.slane %v1487_v25, %v4644_v14  ;;  %v1510_v13 = vrot.slane %v1488_v26, %v4644_v14  ;;  %v1518_v27 = vcombine.high %v1496_v29, %v1496_v29 }
 0x336   :  { %3572 = vst.sshfl [vmem:[%s5377_s6 + $0xa] sm:$0x1 pattern:$0x73625140] %v1488_v26  ;;  %2102 = vmatprep.subr.bf16.mxu0 %v4775_v9  ;;  %2143 = vmatprep.subr.bf16.mxu1 %v4780_v17  ;;  %v5404_v26 = vld [vmem:[#allocation13_spill] sm:$0xff] }
 0x337   :  { %3573 = vst.sshfl [vmem:[%s5377_s6 + $0x22] sm:$0x1 pattern:$0x73625140] %v1487_v25  ;;  %2132 = vmatprep.mubr.bf16.mxu0 %v5400_v36  ;;  %v1517_v19 = vrot.slane %v1489_v5, %v4644_v14  ;;  %v1519_v21 = vcombine.high %v1503_v30, %v1503_v30  ;;  %v1520_v22 = vcombine.high %v1510_v13, %v1510_v13  ;;  %1532 = vst [vmem:[%s5377_s6 + $0x12] sm:$0x1] %v1518_v27 }
 0x338   :  { %3574 = vst.sshfl [vmem:[%s5377_s6 + $0x2a] sm:$0x1 pattern:$0x73625140] %v1489_v5  ;;  %2173 = vmatprep.mubr.bf16.mxu1 %v5400_v36  ;;  %2103 = vmatpush1.bf16.msra.mxu0 %v4785_v8 }
 0x339   :  { %2144 = vmatpush1.bf16.msra.mxu1 %v4790_v10  ;;  %v1521_v11 = vcombine.high %v1517_v19, %v1517_v19  ;;  %1533 = vst [vmem:[%s5377_s6 + $0x1a] sm:$0x1] %v1520_v22  ;;  %1536 = vst [vmem:[%s5377_s6 + $0x32] sm:$0x1] %v1519_v21  ;;  %2104 = vmatprep.subr.bf16.mxu0 %v4799_v37 }
 0x33a   :  { %2145 = vmatprep.subr.bf16.mxu1 %v4804_v15 }
 0x33b   :  { %1537 = vst [vmem:[%s5377_s6 + $0x3a] sm:$0x1] %v1521_v11 }
 0x33c   :  { %2105 = vmatpush1.bf16.msra.mxu0 %v4809_v16 }
 0x33d   :  { %2146 = vmatpush1.bf16.msra.mxu1 %v4814_v38  ;;  %2106 = vmatprep.subr.bf16.mxu0 %v4823_v39 }
 0x33e   :  { %2147 = vmatprep.subr.bf16.mxu1 %v4828_v40 }
 0x340   :  { %2107 = vmatpush1.bf16.msra.mxu0 %v4833_v41 }
 0x341   :  { %2148 = vmatpush1.bf16.msra.mxu1 %v4838_v42  ;;  %2108 = vmatprep.subr.bf16.mxu0 %v4845_v43 }
 0x342   :  { %2149 = vmatprep.subr.bf16.mxu1 %v4850_v45 }
 0x344   :  { %2109 = vmatpush1.bf16.msra.mxu0 %v4857_v46 }
 0x345   :  { %2150 = vmatpush1.bf16.msra.mxu1 %v4862_v47  ;;  %2110 = vmatprep.subr.bf16.mxu0 %v4869_v48 }
 0x346   :  { %2151 = vmatprep.subr.bf16.mxu1 %v4874_v49 }
 0x348   :  { %2111 = vmatpush1.bf16.msra.mxu0 %v4881_v50 }
 0x349   :  { %2152 = vmatpush1.bf16.msra.mxu1 %v4886_v51  ;;  %2112 = vmatprep.subr.bf16.mxu0 %v4893_v52 }
 0x34a   :  { %2153 = vmatprep.subr.bf16.mxu1 %v4898_v54 }
 0x34c   :  { %2113 = vmatpush1.bf16.msra.mxu0 %v4905_v55 }
 0x34d   :  { %2154 = vmatpush1.bf16.msra.mxu1 %v4910_v56  ;;  %2114 = vmatprep.subr.bf16.mxu0 %v4917_v57 }
 0x34e   :  { %2155 = vmatprep.subr.bf16.mxu1 %v4922_v58 }
 0x350   :  { %2115 = vmatpush1.bf16.msra.mxu0 %v4929_v59 }
 0x351   :  { %2156 = vmatpush1.bf16.msra.mxu1 %v4934_v60  ;;  %2469 = vmatprep.subr.bf16.mxu0 %v4751_v24 }
 0x352   :  { %2510 = vmatprep.subr.bf16.mxu1 %v4756_v35 }
 0x3f3   :  { %v1765_v6 = vpop.f32.mrf.mxu0 }
 0x3f4   :  { %v1806_v33 = vpop.f32.mrf.mxu1  ;;  %v1813_v53 = vadd.f32 %v1765_v6, %v5401_v12 }
 0x3f5   :  { %v1767_v2 = vpop.f32.mrf.mxu0  ;;  %v1815_v4 = vadd.f32 %v1806_v33, %v5403_v3 }
 0x3f6   :  { %v1808_v20 = vpop.f32.mrf.mxu1  ;;  %v3607_v23 = vmul.f32 -1.442695, %v1813_v53  ;;  %v1814_v18 = vadd.f32 %v1767_v2, %v5402_v28 }
 0x3f7   :  { %v1769_v61 = vpop.f32.mrf.mxu0  ;;  %v3609_v25 = vmul.f32 -1.442695, %v1815_v4  ;;  %v1816_v29 = vadd.f32 %v1808_v20, %v5404_v26 }
 0x3f8   :  { %v1810_v62 = vpop.f32.mrf.mxu1  ;;  %4018 = vpow2.f32 %v3607_v23  ;;  %v3608_v63 = vmul.f32 -1.442695, %v1814_v18 }
 0x3f9   :  { %v1770_v0 = vpop.f32.mrf.mxu0 }
 0x3fa   :  { %v1811_v1 = vpop.f32.mrf.mxu1  ;;  %4020 = vpow2.f32 %v3608_v63 }
 0x3fb   :  { %4022 = vpow2.f32 %v3609_v25 }
 0x3fc   :  { %4024 = vtanh.f32 %v1816_v29 }
 0x405   :  { %v4019_v5 = vpop.eup %4018 }
 0x406   :  { %v1826_v30 = vadd.f32 1.0, %v4019_v5 }
 0x407   :  { %v4021_v13 = vpop.eup %4020 }
 0x408   :  { %4026 = vrcp.f32 %v1826_v30  ;;  %v1827_v27 = vadd.f32 1.0, %v4021_v13  ;;  %v4023_v19 = vpop.eup %4022 }
 0x409   :  { %v4025_v21 = vpop.eup %4024  ;;  %v1828_v12 = vadd.f32 1.0, %v4023_v19 }
 0x40a   :  { %4028 = vrcp.f32 %v1827_v27  ;;  %v5405_v27 = vld [vmem:[#allocation14_spill] sm:$0xff] }
 0x40b   :  { %4030 = vrcp.f32 %v1828_v12 }
 0x415   :  { %v4027_v22 = vpop.eup %4026 }
 0x416   :  { %v1837_v11 = vmul.f32 %v4027_v22, %v4025_v21 }
 0x417   :  { %v4029_v6 = vpop.eup %4028 }
 0x418   :  { %v1836_v53 = vmul.f32 %v4029_v6, %v4947_v34  ;;  %v4031_v2 = vpop.eup %4030  ;;  %v5406_v6 = vld [vmem:[#allocation16_spill] sm:$0xff] }
 0x41a   :  { %v5019_v33 = vadd.f32 %v1837_v11, %v1836_v53 }
 0x41c   :  { %4032 = vtanh.f32 %v5019_v33 }
 0x429   :  { %v4033_v20 = vpop.eup %4032 }
 0x42a   :  { %v1840_v23 = vmul.f32 %v4033_v20, %v4031_v2 }
 0x42c   :  { %v1842_v28 = vcombine.high %v1840_v23, %v1840_v23  ;;  %v1849_v18 = vrot.slane %v1840_v23, %v4644_v14  ;;  %v1907_v61 = vpack.c.bf16 %v1840_v23, %v1840_v23 }
 0x42e   :  { %v1856_v62 = vrot.slane %v1842_v28, %v4644_v14  ;;  %v1857_v63 = vcombine.high %v1849_v18, %v1849_v18  ;;  %v1865_v0 = vrot.slane %v1849_v18, %v4644_v14  ;;  %3610 = vst.sshfl [vmem:[%s5377_s6 + $0x3] sm:$0x1 pattern:$0x73625140] %v1849_v18  ;;  %2133 = vmatmul.mubr.bf16.vlgmr.msra.gmra.mxu0 %v1907_v61  ;;  %v5407_v18 = vld [vmem:[#allocation15_spill] sm:$0xff] }
 0x42f   :  { %2174 = vmatmul.mubr.bf16.vlgmr.msra.gmra.mxu1 %v1907_v61  ;;  %2470 = vmatpush1.bf16.msra.mxu0 %v4761_v44 }
 0x430   :  { %2511 = vmatpush1.bf16.msra.mxu1 %v4766_v7  ;;  %v1858_v34 = vcombine.high %v1856_v62, %v1856_v62  ;;  %v1872_v1 = vrot.slane %v1856_v62, %v4644_v14  ;;  %v1879_v3 = vrot.slane %v1857_v63, %v4644_v14  ;;  %v1887_v4 = vcombine.high %v1865_v0, %v1865_v0 }
 0x431   :  { %3611 = vst.sshfl [vmem:[%s5377_s6 + $0xb] sm:$0x1 pattern:$0x73625140] %v1857_v63  ;;  %2471 = vmatprep.subr.bf16.mxu0 %v4775_v9  ;;  %2512 = vmatprep.subr.bf16.mxu1 %v4780_v17 }
 0x432   :  { %3612 = vst.sshfl [vmem:[%s5377_s6 + $0x23] sm:$0x1 pattern:$0x73625140] %v1856_v62  ;;  %2501 = vmatprep.mubr.bf16.mxu0 %v5400_v36  ;;  %v1886_v25 = vrot.slane %v1858_v34, %v4644_v14  ;;  %v1888_v26 = vcombine.high %v1872_v1, %v1872_v1  ;;  %v1889_v29 = vcombine.high %v1879_v3, %v1879_v3  ;;  %1901 = vst [vmem:[%s5377_s6 + $0x13] sm:$0x1] %v1887_v4 }
 0x433   :  { %3613 = vst.sshfl [vmem:[%s5377_s6 + $0x2b] sm:$0x1 pattern:$0x73625140] %v1858_v34  ;;  %2542 = vmatprep.mubr.bf16.mxu1 %v5400_v36  ;;  %2472 = vmatpush1.bf16.msra.mxu0 %v4785_v8 }
 0x434   :  { %2513 = vmatpush1.bf16.msra.mxu1 %v4790_v10  ;;  %v1890_v5 = vcombine.high %v1886_v25, %v1886_v25  ;;  %1902 = vst [vmem:[%s5377_s6 + $0x1b] sm:$0x1] %v1889_v29  ;;  %1905 = vst [vmem:[%s5377_s6 + $0x33] sm:$0x1] %v1888_v26  ;;  %2473 = vmatprep.subr.bf16.mxu0 %v4799_v37 }
 0x435   :  { %2514 = vmatprep.subr.bf16.mxu1 %v4804_v15 }
 0x436   :  { %1906 = vst [vmem:[%s5377_s6 + $0x3b] sm:$0x1] %v1890_v5 }
 0x437   :  { %2474 = vmatpush1.bf16.msra.mxu0 %v4809_v16 }
 0x438   :  { %2515 = vmatpush1.bf16.msra.mxu1 %v4814_v38  ;;  %2475 = vmatprep.subr.bf16.mxu0 %v4823_v39 }
 0x439   :  { %2516 = vmatprep.subr.bf16.mxu1 %v4828_v40 }
 0x43b   :  { %2476 = vmatpush1.bf16.msra.mxu0 %v4833_v41 }
 0x43c   :  { %2517 = vmatpush1.bf16.msra.mxu1 %v4838_v42  ;;  %2477 = vmatprep.subr.bf16.mxu0 %v4845_v43 }
 0x43d   :  { %2518 = vmatprep.subr.bf16.mxu1 %v4850_v45 }
 0x43f   :  { %2478 = vmatpush1.bf16.msra.mxu0 %v4857_v46 }
 0x440   :  { %2519 = vmatpush1.bf16.msra.mxu1 %v4862_v47  ;;  %2479 = vmatprep.subr.bf16.mxu0 %v4869_v48 }
 0x441   :  { %2520 = vmatprep.subr.bf16.mxu1 %v4874_v49 }
 0x443   :  { %2480 = vmatpush1.bf16.msra.mxu0 %v4881_v50 }
 0x444   :  { %2521 = vmatpush1.bf16.msra.mxu1 %v4886_v51  ;;  %2481 = vmatprep.subr.bf16.mxu0 %v4893_v52 }
 0x445   :  { %2522 = vmatprep.subr.bf16.mxu1 %v4898_v54 }
 0x447   :  { %2482 = vmatpush1.bf16.msra.mxu0 %v4905_v55 }
 0x448   :  { %2523 = vmatpush1.bf16.msra.mxu1 %v4910_v56  ;;  %2483 = vmatprep.subr.bf16.mxu0 %v4917_v57 }
 0x449   :  { %2524 = vmatprep.subr.bf16.mxu1 %v4922_v58 }
 0x44b   :  { %2484 = vmatpush1.bf16.msra.mxu0 %v4929_v59 }
 0x44c   :  { %2525 = vmatpush1.bf16.msra.mxu1 %v4934_v60  ;;  %2838 = vmatprep.subr.bf16.mxu0 %v4751_v24 }
 0x44d   :  { %2879 = vmatprep.subr.bf16.mxu1 %v4756_v35  ;;  %v5408_v35 = vld [vmem:[#allocation17_spill] sm:$0xff] }
 0x4ee   :  { %v2134_v30 = vpop.f32.mrf.mxu0 }
 0x4ef   :  { %v2175_v13 = vpop.f32.mrf.mxu1  ;;  %v2182_v19 = vadd.f32 %v2134_v30, %v5405_v27 }
 0x4f0   :  { %v2136_v21 = vpop.f32.mrf.mxu0  ;;  %v2184_v24 = vadd.f32 %v2175_v13, %v5407_v18 }
 0x4f1   :  { %v2177_v22 = vpop.f32.mrf.mxu1  ;;  %v3646_v11 = vmul.f32 -1.442695, %v2182_v19  ;;  %v2183_v12 = vadd.f32 %v2136_v21, %v5406_v6 }
 0x4f2   :  { %v2138_v53 = vpop.f32.mrf.mxu0  ;;  %v3648_v61 = vmul.f32 -1.442695, %v2184_v24  ;;  %v2185_v62 = vadd.f32 %v2177_v22, %v5408_v35 }
 0x4f3   :  { %v2179_v2 = vpop.f32.mrf.mxu1  ;;  %4034 = vpow2.f32 %v3646_v11  ;;  %v3647_v20 = vmul.f32 -1.442695, %v2183_v12 }
 0x4f4   :  { %v2139_v23 = vpop.f32.mrf.mxu0 }
 0x4f5   :  { %v2180_v28 = vpop.f32.mrf.mxu1  ;;  %4036 = vpow2.f32 %v3647_v20 }
 0x4f6   :  { %4038 = vpow2.f32 %v3648_v61 }
 0x4f7   :  { %4040 = vtanh.f32 %v2185_v62 }
 0x500   :  { %v4035_v63 = vpop.eup %4034 }
 0x501   :  { %v2195_v0 = vadd.f32 1.0, %v4035_v63 }
 0x502   :  { %v4037_v34 = vpop.eup %4036 }
 0x503   :  { %4042 = vrcp.f32 %v2195_v0  ;;  %v2196_v1 = vadd.f32 1.0, %v4037_v34  ;;  %v4039_v3 = vpop.eup %4038 }
 0x504   :  { %v4041_v4 = vpop.eup %4040  ;;  %v2197_v5 = vadd.f32 1.0, %v4039_v3 }
 0x505   :  { %4044 = vrcp.f32 %v2196_v1 }
 0x506   :  { %4046 = vrcp.f32 %v2197_v5 }
 0x510   :  { %v4043_v25 = vpop.eup %4042 }
 0x511   :  { %v2206_v26 = vmul.f32 %v4043_v25, %v4041_v4 }
 0x512   :  { %v4045_v29 = vpop.eup %4044 }
 0x513   :  { %v2205_v30 = vmul.f32 %v4045_v29, %v5019_v33  ;;  %v4047_v27 = vpop.eup %4046 }
 0x515   :  { %v5091_v13 = vadd.f32 %v2206_v26, %v2205_v30 }
 0x517   :  { %4048 = vtanh.f32 %v5091_v13 }
 0x524   :  { %v4049_v19 = vpop.eup %4048 }
 0x525   :  { %v2209_v21 = vmul.f32 %v4049_v19, %v4047_v27 }
 0x527   :  { %v2211_v22 = vcombine.high %v2209_v21, %v2209_v21  ;;  %v2218_v11 = vrot.slane %v2209_v21, %v4644_v14  ;;  %v2276_v6 = vpack.c.bf16 %v2209_v21, %v2209_v21 }
 0x529   :  { %v2225_v12 = vrot.slane %v2211_v22, %v4644_v14  ;;  %v2226_v53 = vcombine.high %v2218_v11, %v2218_v11  ;;  %v2234_v2 = vrot.slane %v2218_v11, %v4644_v14  ;;  %3649 = vst.sshfl [vmem:[%s5377_s6 + $0x4] sm:$0x1 pattern:$0x73625140] %v2218_v11  ;;  %2502 = vmatmul.mubr.bf16.vlgmr.msra.gmra.mxu0 %v2276_v6  ;;  %v3924_v11 = vld [vmem:[%s5374_s3 + $0xe4] ss:$16 sps:$4 sm:$0xff]  }
 0x52a   :  { %2543 = vmatmul.mubr.bf16.vlgmr.msra.gmra.mxu1 %v2276_v6  ;;  %2839 = vmatpush1.bf16.msra.mxu0 %v4761_v44  ;;  %v3927_v6 = vld [vmem:[%s5374_s3 + $0xec] ss:$16 sps:$4 sm:$0xff]  }
 0x52b   :  { %2880 = vmatpush1.bf16.msra.mxu1 %v4766_v7  ;;  %v2227_v33 = vcombine.high %v2225_v12, %v2225_v12  ;;  %v2241_v20 = vrot.slane %v2225_v12, %v4644_v14  ;;  %v2248_v23 = vrot.slane %v2226_v53, %v4644_v14  ;;  %v2256_v28 = vcombine.high %v2234_v2, %v2234_v2  ;;  %v3930_v2 = vld [vmem:[%s5374_s3 + $0xc4] ss:$16 sps:$4 sm:$0xff]  }
 0x52c   :  { %3650 = vst.sshfl [vmem:[%s5377_s6 + $0xc] sm:$0x1 pattern:$0x73625140] %v2226_v53  ;;  %2840 = vmatprep.subr.bf16.mxu0 %v4775_v9  ;;  %2881 = vmatprep.subr.bf16.mxu1 %v4780_v17  ;;  %v3925_v53 = vld [vmem:[%s5374_s3 + $0xe8] ss:$16 sps:$4 sm:$0xff]  }
 0x52d   :  { %3651 = vst.sshfl [vmem:[%s5377_s6 + $0x24] sm:$0x1 pattern:$0x73625140] %v2225_v12  ;;  %2870 = vmatprep.mubr.bf16.mxu0 %v5400_v36  ;;  %v2255_v44 = vrot.slane %v2227_v33, %v4644_v14  ;;  %v2257_v7 = vcombine.high %v2241_v20, %v2241_v20  ;;  %v2258_v18 = vcombine.high %v2248_v23, %v2248_v23  ;;  %2270 = vst [vmem:[%s5377_s6 + $0x14] sm:$0x1] %v2256_v28 }
 0x52e   :  { %3652 = vst.sshfl [vmem:[%s5377_s6 + $0x2c] sm:$0x1 pattern:$0x73625140] %v2227_v33  ;;  %2911 = vmatprep.mubr.bf16.mxu1 %v5400_v36  ;;  %2841 = vmatpush1.bf16.msra.mxu0 %v4785_v8  ;;  %v3922_v12 = vld [vmem:[%s5374_s3 + $0xe0] ss:$16 sps:$4 sm:$0xff]  }
 0x52f   :  { %2882 = vmatpush1.bf16.msra.mxu1 %v4790_v10  ;;  %v2259_v9 = vcombine.high %v2255_v44, %v2255_v44  ;;  %2271 = vst [vmem:[%s5377_s6 + $0x1c] sm:$0x1] %v2258_v18  ;;  %2274 = vst [vmem:[%s5377_s6 + $0x34] sm:$0x1] %v2257_v7  ;;  %2842 = vmatprep.subr.bf16.mxu0 %v4799_v37  ;;  %v5409_v10 = vld [vmem:[#allocation18_spill] sm:$0xff] }
 0x530   :  { %2883 = vmatprep.subr.bf16.mxu1 %v4804_v15  ;;  %v3933_v33 = vld [vmem:[%s5374_s3 + $0xcc] ss:$16 sps:$4 sm:$0xff]   ;;  %v3928_v20 = vld [vmem:[%s5374_s3 + $0xc0] ss:$16 sps:$4 sm:$0xff]   ;;  %v3931_v23 = vld [vmem:[%s5374_s3 + $0xc8] ss:$16 sps:$4 sm:$0xff]  }
 0x531   :  { %2275 = vst [vmem:[%s5377_s6 + $0x3c] sm:$0x1] %v2259_v9  ;;  %v3936_v28 = vld [vmem:[%s5374_s3 + $0xa4] ss:$16 sps:$4 sm:$0xff]   ;;  %v3939_v44 = vld [vmem:[%s5374_s3 + $0xac] ss:$16 sps:$4 sm:$0xff]  }
 0x532   :  { %2843 = vmatpush1.bf16.msra.mxu0 %v4809_v16  ;;  %v3934_v7 = vld [vmem:[%s5374_s3 + $0xa0] ss:$16 sps:$4 sm:$0xff]   ;;  %v3937_v18 = vld [vmem:[%s5374_s3 + $0xa8] ss:$16 sps:$4 sm:$0xff]   ;;  %v3942_v9 = vld [vmem:[%s5374_s3 + $0x84] ss:$16 sps:$4 sm:$0xff]  }
 0x533   :  { %2884 = vmatpush1.bf16.msra.mxu1 %v4814_v38  ;;  %2844 = vmatprep.subr.bf16.mxu0 %v4823_v39  ;;  %v5410_v39 = vld [vmem:[#allocation20_spill] sm:$0xff] }
 0x534   :  { %2885 = vmatprep.subr.bf16.mxu1 %v4828_v40 }
 0x536   :  { %2845 = vmatpush1.bf16.msra.mxu0 %v4833_v41 }
 0x537   :  { %2886 = vmatpush1.bf16.msra.mxu1 %v4838_v42  ;;  %2846 = vmatprep.subr.bf16.mxu0 %v4845_v43 }
 0x538   :  { %2887 = vmatprep.subr.bf16.mxu1 %v4850_v45 }
 0x53a   :  { %2847 = vmatpush1.bf16.msra.mxu0 %v4857_v46 }
 0x53b   :  { %2888 = vmatpush1.bf16.msra.mxu1 %v4862_v47  ;;  %2848 = vmatprep.subr.bf16.mxu0 %v4869_v48  ;;  %v5411_v47 = vld [vmem:[#allocation19_spill] sm:$0xff] }
 0x53c   :  { %2889 = vmatprep.subr.bf16.mxu1 %v4874_v49 }
 0x53e   :  { %2849 = vmatpush1.bf16.msra.mxu0 %v4881_v50  ;;  %v5412_v50 = vld [vmem:[#allocation21_spill] sm:$0xff] }
 0x53f   :  { %2890 = vmatpush1.bf16.msra.mxu1 %v4886_v51  ;;  %2850 = vmatprep.subr.bf16.mxu0 %v4893_v52 }
 0x540   :  { %2891 = vmatprep.subr.bf16.mxu1 %v4898_v54 }
 0x542   :  { %2851 = vmatpush1.bf16.msra.mxu0 %v4905_v55 }
 0x543   :  { %2892 = vmatpush1.bf16.msra.mxu1 %v4910_v56  ;;  %2852 = vmatprep.subr.bf16.mxu0 %v4917_v57 }
 0x544   :  { %2893 = vmatprep.subr.bf16.mxu1 %v4922_v58 }
 0x546   :  { %2853 = vmatpush1.bf16.msra.mxu0 %v4929_v59 }
 0x547   :  { %2894 = vmatpush1.bf16.msra.mxu1 %v4934_v60  ;;  %3207 = vmatprep.subr.bf16.mxu0 %v3924_v11 }
 0x548   :  { %3248 = vmatprep.subr.bf16.mxu1 %v3927_v6 }
 0x5e9   :  { %v2503_v17 = vpop.f32.mrf.mxu0 }
 0x5ea   :  { %v2544_v8 = vpop.f32.mrf.mxu1  ;;  %v2551_v37 = vadd.f32 %v2503_v17, %v5409_v10  ;;  %v3945_v17 = vld [vmem:[%s5374_s3 + $0x8c] ss:$16 sps:$4 sm:$0xff]   ;;  %v3943_v10 = vld [vmem:[%s5374_s3 + $0x88] ss:$16 sps:$4 sm:$0xff]  }
 0x5eb   :  { %v2505_v15 = vpop.f32.mrf.mxu0  ;;  %v2553_v48 = vadd.f32 %v2544_v8, %v5411_v47  ;;  %v3940_v8 = vld [vmem:[%s5374_s3 + $0x80] ss:$16 sps:$4 sm:$0xff]   ;;  %v3961_v47 = vld [vmem:[%s5374_s3 + $0x28] ss:$16 sps:$4 sm:$0xff]  }
 0x5ec   :  { %v2546_v16 = vpop.f32.mrf.mxu1  ;;  %v3685_v38 = vmul.f32 -1.442695, %v2551_v37  ;;  %v2552_v40 = vadd.f32 %v2505_v15, %v5410_v39  ;;  %v3948_v37 = vld [vmem:[%s5374_s3 + $0x64] ss:$16 sps:$4 sm:$0xff]   ;;  %v3951_v15 = vld [vmem:[%s5374_s3 + $0x6c] ss:$16 sps:$4 sm:$0xff]  }
 0x5ed   :  { %v2507_v41 = vpop.f32.mrf.mxu0  ;;  %v3687_v49 = vmul.f32 -1.442695, %v2553_v48  ;;  %v2554_v51 = vadd.f32 %v2546_v16, %v5412_v50  ;;  %v3946_v16 = vld [vmem:[%s5374_s3 + $0x60] ss:$16 sps:$4 sm:$0xff]   ;;  %v3954_v39 = vld [vmem:[%s5374_s3 + $0x44] ss:$16 sps:$4 sm:$0xff]  }
 0x5ee   :  { %v2548_v42 = vpop.f32.mrf.mxu1  ;;  %4050 = vpow2.f32 %v3685_v38  ;;  %v3686_v43 = vmul.f32 -1.442695, %v2552_v40  ;;  %v3949_v38 = vld [vmem:[%s5374_s3 + $0x68] ss:$16 sps:$4 sm:$0xff]   ;;  %v3957_v40 = vld [vmem:[%s5374_s3 + $0x4c] ss:$16 sps:$4 sm:$0xff]  }
 0x5ef   :  { %v2508_v45 = vpop.f32.mrf.mxu0  ;;  %v3952_v41 = vld [vmem:[%s5374_s3 + $0x40] ss:$16 sps:$4 sm:$0xff]   ;;  %v3955_v42 = vld [vmem:[%s5374_s3 + $0x48] ss:$16 sps:$4 sm:$0xff]   ;;  %v3966_v48 = vld [vmem:[%s5374_s3 + $0x4] ss:$16 sps:$4 sm:$0xff]  }
 0x5f0   :  { %v2549_v46 = vpop.f32.mrf.mxu1  ;;  %4052 = vpow2.f32 %v3686_v43  ;;  %v3960_v43 = vld [vmem:[%s5374_s3 + $0x24] ss:$16 sps:$4 sm:$0xff]   ;;  %v3963_v45 = vld [vmem:[%s5374_s3 + $0x2c] ss:$16 sps:$4 sm:$0xff]   ;;  %v3964_v50 = vld [vmem:[%s5374_s3] ss:$16 sps:$4 sm:$0xff]  }
 0x5f1   :  { %4054 = vpow2.f32 %v3687_v49  ;;  %v3958_v46 = vld [vmem:[%s5374_s3 + $0x20] ss:$16 sps:$4 sm:$0xff]   ;;  %v3969_v49 = vld [vmem:[%s5374_s3 + $0xc] ss:$16 sps:$4 sm:$0xff]  }
 0x5f2   :  { %4056 = vtanh.f32 %v2554_v51  ;;  %v3967_v51 = vld [vmem:[%s5374_s3 + $0x8] ss:$16 sps:$4 sm:$0xff]  }
 0x5fb   :  { %v4051_v52 = vpop.eup %4050 }
 0x5fc   :  { %v2564_v54 = vadd.f32 1.0, %v4051_v52 }
 0x5fd   :  { %v4053_v55 = vpop.eup %4052 }
 0x5fe   :  { %4058 = vrcp.f32 %v2564_v54  ;;  %v2565_v56 = vadd.f32 1.0, %v4053_v55  ;;  %v4055_v57 = vpop.eup %4054  ;;  %v5413_v55 = vld [vmem:[#allocation22_spill] sm:$0xff] }
 0x5ff   :  { %v4057_v58 = vpop.eup %4056  ;;  %v2566_v61 = vadd.f32 1.0, %v4055_v57 }
 0x600   :  { %4060 = vrcp.f32 %v2565_v56 }
 0x601   :  { %4062 = vrcp.f32 %v2566_v61 }
 0x60b   :  { %v4059_v59 = vpop.eup %4058 }
 0x60c   :  { %v2575_v60 = vmul.f32 %v4059_v59, %v4057_v58 }
 0x60d   :  { %v4061_v24 = vpop.eup %4060 }
 0x60e   :  { %v2574_v35 = vmul.f32 %v4061_v24, %v5091_v13  ;;  %v4063_v63 = vpop.eup %4062 }
 0x610   :  { %v5161_v62 = vadd.f32 %v2575_v60, %v2574_v35  ;;  %v5414_v60 = vld [vmem:[#allocation24_spill] sm:$0xff] }
 0x612   :  { %4064 = vtanh.f32 %v5161_v62 }
 0x61f   :  { %v4065_v0 = vpop.eup %4064 }
 0x620   :  { %v2578_v34 = vmul.f32 %v4065_v0, %v4063_v63 }
 0x622   :  { %v2580_v1 = vcombine.high %v2578_v34, %v2578_v34  ;;  %v2587_v3 = vrot.slane %v2578_v34, %v4644_v14  ;;  %v2645_v4 = vpack.c.bf16 %v2578_v34, %v2578_v34 }
 0x624   :  { %v2594_v25 = vrot.slane %v2580_v1, %v4644_v14  ;;  %v2595_v26 = vcombine.high %v2587_v3, %v2587_v3  ;;  %v2603_v29 = vrot.slane %v2587_v3, %v4644_v14  ;;  %3688 = vst.sshfl [vmem:[%s5377_s6 + $0x5] sm:$0x1 pattern:$0x73625140] %v2587_v3  ;;  %2871 = vmatmul.mubr.bf16.vlgmr.msra.gmra.mxu0 %v2645_v4  ;;  %v5415_v1 = vld [vmem:[#allocation23_spill] sm:$0xff] }
 0x625   :  { %2912 = vmatmul.mubr.bf16.vlgmr.msra.gmra.mxu1 %v2645_v4  ;;  %3239 = vmatprep.mubr.bf16.mxu0 %v5400_v36 }
 0x626   :  { %3280 = vmatprep.mubr.bf16.mxu1 %v5400_v36  ;;  %v2596_v5 = vcombine.high %v2594_v25, %v2594_v25  ;;  %v2610_v30 = vrot.slane %v2594_v25, %v4644_v14  ;;  %v2617_v13 = vrot.slane %v2595_v26, %v4644_v14  ;;  %v2625_v27 = vcombine.high %v2603_v29, %v2603_v29 }
 0x627   :  { %3689 = vst.sshfl [vmem:[%s5377_s6 + $0xd] sm:$0x1 pattern:$0x73625140] %v2595_v26  ;;  %3208 = vmatpush1.bf16.msra.mxu0 %v3922_v12  ;;  %3249 = vmatpush1.bf16.msra.mxu1 %v3925_v53 }
 0x628   :  { %3690 = vst.sshfl [vmem:[%s5377_s6 + $0x25] sm:$0x1 pattern:$0x73625140] %v2594_v25  ;;  %v2624_v19 = vrot.slane %v2596_v5, %v4644_v14  ;;  %v2626_v21 = vcombine.high %v2610_v30, %v2610_v30  ;;  %v2627_v22 = vcombine.high %v2617_v13, %v2617_v13  ;;  %2639 = vst [vmem:[%s5377_s6 + $0x15] sm:$0x1] %v2625_v27  ;;  %3209 = vmatprep.subr.bf16.mxu0 %v3930_v2 }
 0x629   :  { %3691 = vst.sshfl [vmem:[%s5377_s6 + $0x2d] sm:$0x1 pattern:$0x73625140] %v2596_v5  ;;  %3250 = vmatprep.subr.bf16.mxu1 %v3933_v33  ;;  %v5416_v25 = vld [vmem:[#allocation25_spill] sm:$0xff] }
 0x62a   :  { %v2628_v36 = vcombine.high %v2624_v19, %v2624_v19  ;;  %2640 = vst [vmem:[%s5377_s6 + $0x1d] sm:$0x1] %v2627_v22  ;;  %2643 = vst [vmem:[%s5377_s6 + $0x35] sm:$0x1] %v2626_v21 }
 0x62b   :  { %3210 = vmatpush1.bf16.msra.mxu0 %v3928_v20  ;;  %3251 = vmatpush1.bf16.msra.mxu1 %v3931_v23 }
 0x62c   :  { %2644 = vst [vmem:[%s5377_s6 + $0x3d] sm:$0x1] %v2628_v36  ;;  %3211 = vmatprep.subr.bf16.mxu0 %v3936_v28  ;;  %3252 = vmatprep.subr.bf16.mxu1 %v3939_v44 }
 0x62f   :  { %3212 = vmatpush1.bf16.msra.mxu0 %v3934_v7  ;;  %3253 = vmatpush1.bf16.msra.mxu1 %v3937_v18 }
 0x630   :  { %3213 = vmatprep.subr.bf16.mxu0 %v3942_v9  ;;  %3254 = vmatprep.subr.bf16.mxu1 %v3945_v17 }
 0x633   :  { %3214 = vmatpush1.bf16.msra.mxu0 %v3940_v8  ;;  %3255 = vmatpush1.bf16.msra.mxu1 %v3943_v10 }
 0x634   :  { %3215 = vmatprep.subr.bf16.mxu0 %v3948_v37  ;;  %3256 = vmatprep.subr.bf16.mxu1 %v3951_v15 }
 0x637   :  { %3216 = vmatpush1.bf16.msra.mxu0 %v3946_v16  ;;  %3257 = vmatpush1.bf16.msra.mxu1 %v3949_v38 }
 0x638   :  { %3217 = vmatprep.subr.bf16.mxu0 %v3954_v39  ;;  %3258 = vmatprep.subr.bf16.mxu1 %v3957_v40  ;;  %v5417_v40 = vld [vmem:[#allocation26_spill] sm:$0xff] }
 0x63b   :  { %3218 = vmatpush1.bf16.msra.mxu0 %v3952_v41  ;;  %3259 = vmatpush1.bf16.msra.mxu1 %v3955_v42 }
 0x63c   :  { %3219 = vmatprep.subr.bf16.mxu0 %v3960_v43  ;;  %3260 = vmatprep.subr.bf16.mxu1 %v3963_v45 }
 0x63f   :  { %3220 = vmatpush1.bf16.msra.mxu0 %v3958_v46  ;;  %3261 = vmatpush1.bf16.msra.mxu1 %v3961_v47 }
 0x640   :  { %3221 = vmatprep.subr.bf16.mxu0 %v3966_v48  ;;  %3262 = vmatprep.subr.bf16.mxu1 %v3969_v49 }
 0x643   :  { %3222 = vmatpush1.bf16.msra.mxu0 %v3964_v50  ;;  %3263 = vmatpush1.bf16.msra.mxu1 %v3967_v51 }
 0x6e4   :  { %v2872_v52 = vpop.f32.mrf.mxu0 }
 0x6e5   :  { %v2913_v54 = vpop.f32.mrf.mxu1  ;;  %v2920_v56 = vadd.f32 %v2872_v52, %v5413_v55  ;;  %v5418_v52 = vld [vmem:[#allocation27_spill] sm:$0xff] }
 0x6e6   :  { %v2874_v57 = vpop.f32.mrf.mxu0  ;;  %v2922_v3 = vadd.f32 %v2913_v54, %v5415_v1 }
 0x6e7   :  { %v2915_v58 = vpop.f32.mrf.mxu1  ;;  %v3724_v59 = vmul.f32 -1.442695, %v2920_v56  ;;  %v2921_v24 = vadd.f32 %v2874_v57, %v5414_v60 }
 0x6e8   :  { %v2876_v61 = vpop.f32.mrf.mxu0  ;;  %v3726_v4 = vmul.f32 -1.442695, %v2922_v3  ;;  %v2923_v26 = vadd.f32 %v2915_v58, %v5416_v25 }
 0x6e9   :  { %v2917_v35 = vpop.f32.mrf.mxu1  ;;  %4066 = vpow2.f32 %v3724_v59  ;;  %v3725_v63 = vmul.f32 -1.442695, %v2921_v24 }
 0x6ea   :  { %v2877_v0 = vpop.f32.mrf.mxu0 }
 0x6eb   :  { %v2918_v34 = vpop.f32.mrf.mxu1  ;;  %4068 = vpow2.f32 %v3725_v63 }
 0x6ec   :  { %4070 = vpow2.f32 %v3726_v4 }
 0x6ed   :  { %4072 = vtanh.f32 %v2923_v26 }
 0x6f6   :  { %v4067_v29 = vpop.eup %4066 }
 0x6f7   :  { %v2933_v5 = vadd.f32 1.0, %v4067_v29 }
 0x6f8   :  { %v4069_v30 = vpop.eup %4068 }
 0x6f9   :  { %4074 = vrcp.f32 %v2933_v5  ;;  %v2934_v13 = vadd.f32 1.0, %v4069_v30  ;;  %v4071_v27 = vpop.eup %4070 }
 0x6fa   :  { %v4073_v19 = vpop.eup %4072  ;;  %v2935_v11 = vadd.f32 1.0, %v4071_v27 }
 0x6fb   :  { %4076 = vrcp.f32 %v2934_v13 }
 0x6fc   :  { %4078 = vrcp.f32 %v2935_v11 }
 0x706   :  { %v4075_v21 = vpop.eup %4074 }
 0x707   :  { %v2944_v22 = vmul.f32 %v4075_v21, %v4073_v19 }
 0x708   :  { %v4077_v36 = vpop.eup %4076 }
 0x709   :  { %v2943_v6 = vmul.f32 %v4077_v36, %v5161_v62  ;;  %v4079_v53 = vpop.eup %4078 }
 0x70b   :  { %v5297_v12 = vadd.f32 %v2944_v22, %v2943_v6 }
 0x70d   :  { %4080 = vtanh.f32 %v5297_v12 }
 0x71a   :  { %v4081_v2 = vpop.eup %4080 }
 0x71b   :  { %v2947_v33 = vmul.f32 %v4081_v2, %v4079_v53 }
 0x71d   :  { %v2949_v20 = vcombine.high %v2947_v33, %v2947_v33  ;;  %v2956_v23 = vrot.slane %v2947_v33, %v4644_v14  ;;  %v3014_v28 = vpack.c.bf16 %v2947_v33, %v2947_v33 }
 0x71f   :  { %v2963_v44 = vrot.slane %v2949_v20, %v4644_v14  ;;  %v2964_v7 = vcombine.high %v2956_v23, %v2956_v23  ;;  %v2972_v18 = vrot.slane %v2956_v23, %v4644_v14  ;;  %3727 = vst.sshfl [vmem:[%s5377_s6 + $0x6] sm:$0x1 pattern:$0x73625140] %v2956_v23  ;;  %3240 = vmatmul.mubr.bf16.vlgmr.msra.gmra.mxu0 %v3014_v28 }
 0x720   :  { %3281 = vmatmul.mubr.bf16.vlgmr.msra.gmra.mxu1 %v3014_v28 }
 0x721   :  { %v2965_v62 = vcombine.high %v2963_v44, %v2963_v44  ;;  %v2979_v9 = vrot.slane %v2963_v44, %v4644_v14  ;;  %v2986_v17 = vrot.slane %v2964_v7, %v4644_v14  ;;  %v2994_v8 = vcombine.high %v2972_v18, %v2972_v18  ;;  %3728 = vst.sshfl [vmem:[%s5377_s6 + $0xe] sm:$0x1 pattern:$0x73625140] %v2964_v7 }
 0x722   :  { %3729 = vst.sshfl [vmem:[%s5377_s6 + $0x26] sm:$0x1 pattern:$0x73625140] %v2963_v44 }
 0x723   :  { %v2993_v10 = vrot.slane %v2965_v62, %v4644_v14  ;;  %v2995_v37 = vcombine.high %v2979_v9, %v2979_v9  ;;  %v2996_v15 = vcombine.high %v2986_v17, %v2986_v17  ;;  %3008 = vst [vmem:[%s5377_s6 + $0x16] sm:$0x1] %v2994_v8  ;;  %3730 = vst.sshfl [vmem:[%s5377_s6 + $0x2e] sm:$0x1 pattern:$0x73625140] %v2965_v62 }
 0x725   :  { %v2997_v16 = vcombine.high %v2993_v10, %v2993_v10  ;;  %3009 = vst [vmem:[%s5377_s6 + $0x1e] sm:$0x1] %v2996_v15  ;;  %3012 = vst [vmem:[%s5377_s6 + $0x36] sm:$0x1] %v2995_v37 }
 0x727   :  { %3013 = vst [vmem:[%s5377_s6 + $0x3e] sm:$0x1] %v2997_v16 }
 0x7df   :  { %v3241_v38 = vpop.f32.mrf.mxu0 }
 0x7e0   :  { %v3282_v39 = vpop.f32.mrf.mxu1  ;;  %v3289_v41 = vadd.f32 %v3241_v38, %v5417_v40 }
 0x7e1   :  { %v3243_v42 = vpop.f32.mrf.mxu0  ;;  %v3291_v54 = vadd.f32 %v3282_v39, %v5418_v52 }
 0x7e2   :  { %v3284_v43 = vpop.f32.mrf.mxu1  ;;  %v3763_v45 = vmul.f32 -1.442695, %v3289_v41  ;;  %v3290_v46 = vadd.f32 %v3243_v42, %v4627_v31 }
 0x7e3   :  { %v3245_v47 = vpop.f32.mrf.mxu0  ;;  %v3765_v55 = vmul.f32 -1.442695, %v3291_v54  ;;  %v3292_v56 = vadd.f32 %v3284_v43, %v4630_v32 }
 0x7e4   :  { %v3286_v48 = vpop.f32.mrf.mxu1  ;;  %4082 = vpow2.f32 %v3763_v45  ;;  %v3764_v49 = vmul.f32 -1.442695, %v3290_v46 }
 0x7e5   :  { %v3246_v50 = vpop.f32.mrf.mxu0 }
 0x7e6   :  { %v3287_v51 = vpop.f32.mrf.mxu1  ;;  %4084 = vpow2.f32 %v3764_v49 }
 0x7e7   :  { %4086 = vpow2.f32 %v3765_v55 }
 0x7e8   :  { %4088 = vtanh.f32 %v3292_v56 }
 0x7f1   :  { %v4083_v57 = vpop.eup %4082 }
 0x7f2   :  { %v3302_v58 = vadd.f32 1.0, %v4083_v57 }
 0x7f3   :  { %v4085_v59 = vpop.eup %4084 }
 0x7f4   :  { %4090 = vrcp.f32 %v3302_v58  ;;  %v3303_v60 = vadd.f32 1.0, %v4085_v59  ;;  %v4087_v31 = vpop.eup %4086 }
 0x7f5   :  { %v4089_v24 = vpop.eup %4088  ;;  %v3304_v0 = vadd.f32 1.0, %v4087_v31 }
 0x7f6   :  { %4092 = vrcp.f32 %v3303_v60 }
 0x7f7   :  { %4094 = vrcp.f32 %v3304_v0 }
 0x801   :  { %v4091_v61 = vpop.eup %4090 }
 0x802   :  { %v3313_v35 = vmul.f32 %v4091_v61, %v4089_v24 }
 0x803   :  { %v4093_v63 = vpop.eup %4092 }
 0x804   :  { %v3312_v34 = vmul.f32 %v4093_v63, %v5297_v12 }
 0x806   :  { %v3314_v1 = vadd.f32 %v3313_v35, %v3312_v34 }
 0x808   :  { %3389 = vst [vmem:[#allocation6] sm:$0xff] %v3314_v1  ;;  %4096 = vtanh.f32 %v3314_v1 }
 0x809   :  { %4109 = shalt.err (!%p4106_p4)
}
 0x80a   :  { %3411 = dma.vmem_to_hbm [thread:$0]  %s3409_s29, 128, %s5379_s8, [#allocation7]   ;;  %v4095_v32 = vpop.eup %4094 }
 0x80b   :  { %s4145_s9 = smov [#allocation4]  }
 0x80c   :  { %s3398_s1 = sshll.u32 %s4145_s9, 4  ;;  %s3399_s1 = int_to_ptr.vmem [resolvable:$true] %s3398_s1 }
 0x80d   :  { %s4118_s10 = scalar_lea.vmem %s3399_s1, 128  ;;  %p4123_p6 = scmp.lt.s32.totalorder %s3399_s1, %s3399_s1 }
 0x80e   :  { %p4119_p5 = scmp.ne.s32.totalorder %s3399_s1, %s4118_s10  ;;  %p4124_p7 = scmp.lt.s32.totalorder %s4118_s10, %s4118_s10 }
 0x810   :  { %p4125_p8 = por %p4124_p7, %p4123_p6 }
 0x812   :  { %p4126_p9 = pnand %p4125_p8, %p4119_p5 }
 0x815   :  { %v4097_v3 = vpop.eup %4096 }
 0x816   :  { %v3316_v4 = vmul.f32 %v4097_v3, %v4095_v32 }
 0x818   :  { %v3318_v25 = vcombine.high %v3316_v4, %v3316_v4  ;;  %v3325_v26 = vrot.slane %v3316_v4, %v4644_v14  ;;  %3388 = vst [vmem:[#allocation4] sm:$0xff] %v3316_v4 }
 0x819   :  { %4129 = shalt.err (!%p4126_p9)
}
 0x81a   :  { %3401 = dma.vmem_to_hbm [thread:$0]  %s3399_s1, 128, %s5378_s7, [#allocation5]   ;;  %v3332_v29 = vrot.slane %v3318_v25, %v4644_v14  ;;  %v3333_v5 = vcombine.high %v3325_v26, %v3325_v26  ;;  %v3341_v30 = vrot.slane %v3325_v26, %v4644_v14  ;;  %3766 = vst.sshfl [vmem:[%s5377_s6 + $0x7] sm:$0x1 pattern:$0x73625140] %v3325_v26 }
 0x81c   :  { %v3334_v13 = vcombine.high %v3332_v29, %v3332_v29  ;;  %v3348_v27 = vrot.slane %v3332_v29, %v4644_v14  ;;  %v3355_v19 = vrot.slane %v3333_v5, %v4644_v14  ;;  %v3363_v21 = vcombine.high %v3341_v30, %v3341_v30  ;;  %3767 = vst.sshfl [vmem:[%s5377_s6 + $0xf] sm:$0x1 pattern:$0x73625140] %v3333_v5 }
 0x81d   :  { %3768 = vst.sshfl [vmem:[%s5377_s6 + $0x27] sm:$0x1 pattern:$0x73625140] %v3332_v29 }
 0x81e   :  { %v3362_v22 = vrot.slane %v3334_v13, %v4644_v14  ;;  %v3364_v36 = vcombine.high %v3348_v27, %v3348_v27  ;;  %v3365_v11 = vcombine.high %v3355_v19, %v3355_v19  ;;  %3377 = vst [vmem:[%s5377_s6 + $0x17] sm:$0x1] %v3363_v21  ;;  %3769 = vst.sshfl [vmem:[%s5377_s6 + $0x2f] sm:$0x1 pattern:$0x73625140] %v3334_v13 }
 0x820   :  { %v3366_v6 = vcombine.high %v3362_v22, %v3362_v22  ;;  %3378 = vst [vmem:[%s5377_s6 + $0x1f] sm:$0x1] %v3365_v11  ;;  %3381 = vst [vmem:[%s5377_s6 + $0x37] sm:$0x1] %v3364_v36 }
 0x822   :  { %3382 = vst [vmem:[%s5377_s6 + $0x3f] sm:$0x1] %v3366_v6 }
 0x823   :  { %4138 = dma.done.wait [#allocation5], 128  }
 0x824   :  { %4139 = vsyncadd [#allocation5], 4294967168 }
 0x825   :  { %4140 = dma.done.wait [#allocation7], 128  }
 0x826   :  { %4141 = vsyncadd [#allocation7], 4294967168 }
 0x827   :  { %3420 = vsyncpa [#allocation5], 1 }
 0x828   :  { %3421 = vsyncpa [#allocation7], 1 }

</bundles_post_ra>
